<compile_context>
chip_gen: v7x
topology: tpu7x:2x2x1
jax: 0.10.0
libtpu: 0.0.40
codegen_flags: <defaults>
</compile_context>

<pallas_src>
import functools

import jax
import jax.numpy as jnp
from jax.experimental import pallas as pl
from jax.experimental.pallas import tpu as pltpu

N_LAYERS = 3            # Filter(k=3)
IN_FEATURES = 2
HIDDEN = 16
OUT_FEATURES = 2
EDGE_DIM = 2
LN_EPS = 1e-5
QS_W = 2 * HIDDEN * N_LAYERS     # fused q|skip columns (per-tile projection)
KV_W = 2 * HIDDEN * N_LAYERS     # fused k|v  columns (hoisted to wrapper)
XWD_W = 4                        # merged kernel-1 output: [xw0, xw1, dinv, pad]
NEG_BIG = 1e30


def _vmem_capacity_bytes():
    try:
        return int(pltpu.get_tpu_info().vmem_capacity_bytes)
    except Exception:
        return 128 * 1024 * 1024


def _mm_nn(a, b):
    # a [M, K] @ b [K, N] -> [M, N]
    return jnp.dot(a, b, preferred_element_type=jnp.float32)


def _mm_nt(a, b):
    # a [M, K] @ b[N, K]^T -> [M, N]  (transposed contraction, no explicit transpose)
    return jax.lax.dot_general(
        a, b, (((1,), (1,)), ((), ())), preferred_element_type=jnp.float32)


def _sigmoid(v):
    return 1.0 / (1.0 + jnp.exp(-v))


# ---------------------------------------------------------------------------
# Kernel 1: Filter = 3x edge-conditioned TransformerConv + residual LayerNorm
# (each layer reads the ORIGINAL x, as in the PyTorch code), tiled over dst rows.
# Emits the fused GCN input xw = D^-1/2 * relu(s) @ Wg^T together with D^-1/2 as a
# single merged [tile, 4] output block.
# ---------------------------------------------------------------------------
def filter_kernel(x_ref, adj_ref, eattr_ref, kv_ref, wqs_ref, bqs_ref,
                  we_ref, lng_ref, lnb_ref, wg_ref, xwd_ref):
    xt = x_ref[...]                                   # [T, IN]   this dst tile
    adj = adj_ref[...].astype(jnp.float32)            # [T, Np]   bf16 -> f32
    e0 = eattr_ref[0].astype(jnp.float32)             # [T, Np]   reused by all layers
    e1 = eattr_ref[1].astype(jnp.float32)             # [T, Np]
    kv = kv_ref[...]                                  # [Np, 96]  hoisted k|v projection
    lng = lng_ref[...]                                # [L, H]
    lnb = lnb_ref[...]                                # [L, H]
    t_rows = xt.shape[0]

    # One lane-dense fused q|skip projection for the dst tile (all layers at once).
    qs = _mm_nt(xt, wqs_ref[...]) + bqs_ref[...]      # [T, 96]

    # Mask folded into one additive bias (0 on edges, -1e30 off edges), f32-safe.
    neg_bias = (adj - 1.0) * NEG_BIG
    inv_sqrt_c = 1.0 / (float(HIDDEN) ** 0.5)

    s = jnp.zeros((t_rows, HIDDEN), jnp.float32)
    for l in range(N_LAYERS):
        b = 2 * HIDDEN * l
        q = qs[:, b:b + HIDDEN] * inv_sqrt_c          # [T, H]  (1/sqrt(C) folded in)
        skip = qs[:, b + HIDDEN:b + 2 * HIDDEN]       # [T, H]
        k = kv[:, b:b + HIDDEN]                       # [Np, H]
        v = kv[:, b + HIDDEN:b + 2 * HIDDEN]          # [Np, H]
        we_l = we_ref[l]                              # [H, E]

        # Edge-conditioned attention logits:
        #   alpha[i,j] = q[i].(k[j] + We e(j->i)) / sqrt(C)  (scale folded into q)
        qwe = _mm_nn(q, we_l)                                       # [T, E]
        logits = (_mm_nt(q, k) + neg_bias
                  + e0 * qwe[:, 0:1] + e1 * qwe[:, 1:2])            # [T, Np]

        # Deferred-normalization masked softmax: never materialize attn.
        # row_max clamped at 0 so masked (-1e30) logits underflow to exactly 0.
        row_max = jnp.maximum(jnp.max(logits, axis=1, keepdims=True), 0.0)
        p = jnp.exp(logits - row_max)                               # [T, Np]
        denom = jnp.sum(p, axis=1, keepdims=True)                   # [T, 1]
        inv = pl.reciprocal(jnp.maximum(denom, 1e-30), approx=True)

        # Aggregation: sum_j attn[i,j] * (v[j] + We e(j->i))
        agg = _mm_nn(p, v) * inv                                    # [T, H]
        t2 = jnp.concatenate(
            [jnp.sum(p * e0, axis=1, keepdims=True),
             jnp.sum(p * e1, axis=1, keepdims=True)], axis=1) * inv  # [T, E]
        agg = agg + _mm_nt(t2, we_l)

        # Root/skip connection + residual + LayerNorm (eps=1e-5, affine).
        z = s + agg + skip
        mu = jnp.mean(z, axis=1, keepdims=True)
        var = jnp.mean((z - mu) * (z - mu), axis=1, keepdims=True)
        s = (z - mu) * jax.lax.rsqrt(var + LN_EPS) * lng[l:l + 1, :] + lnb[l:l + 1, :]

    h1 = jnp.maximum(s, 0.0)                                        # relu
    # Fused GCN input: D^-1/2 * h1 @ Wg^T, plus D^-1/2 itself (deg = in-degree + self).
    dinv = jax.lax.rsqrt(jnp.sum(adj, axis=1, keepdims=True) + 1.0)  # [T, 1]
    xw = dinv * _mm_nt(h1, wg_ref[...])                              # [T, OUT]
    pad = jnp.zeros((t_rows, XWD_W - OUT_FEATURES - 1), jnp.float32)
    xwd_ref[...] = jnp.concatenate([xw, dinv, pad], axis=1)          # one merged store


# ---------------------------------------------------------------------------
# Kernel 2: GCNConv(hidden -> out) with symmetric self-loop normalization,
# plus the physical output squashing. Tiled over dst rows; adj-streaming only.
#   y = D^-1/2 (A + I) D^-1/2 H Wg^T + b  with D^-1/2 H Wg^T precomputed in kernel 1.
# ---------------------------------------------------------------------------
def gcn_kernel(tile, x_ref, adj_ref, xwd_ref, bg_ref, out_ref):
    adj = adj_ref[...].astype(jnp.float32)                 # [T, Np]  bf16 -> f32
    xwd = xwd_ref[...]                                     # [Np, 4]  resident
    row0 = pl.multiple_of(pl.program_id(0) * tile, 8)
    xwd_t = xwd_ref[pl.ds(row0, tile), :]                  # [T, 4]  dst rows (no dup DMA)

    xw_full = xwd[:, 0:OUT_FEATURES]                       # [Np, OUT]  D^-1/2 H Wg^T
    xw_t = xwd_t[:, 0:OUT_FEATURES]                        # [T, OUT]   self-loop term
    dinv_t = xwd_t[:, OUT_FEATURES:OUT_FEATURES + 1]       # [T, 1]

    y = dinv_t * (_mm_nn(adj, xw_full) + xw_t) + bg_ref[...]   # [T, OUT]

    # Physical squashing of outputs (vmax/vmin taken from the original node features).
    xt = x_ref[...]                                        # [T, IN]
    vmax = xt[:, 0:1]
    vmin = xt[:, 1:2]
    c0 = (vmax - vmin) * _sigmoid(y[:, 0:1]) + vmin
    c1 = 30.0 * _sigmoid(y[:, 1:2])
    out_ref[...] = jnp.concatenate([c0, c1], axis=1)       # single full-width store


# ---------------------------------------------------------------------------
# Wrapper
# ---------------------------------------------------------------------------
def _choose_tile_dst(n_pad, vmem_cap):
    """Largest dst tile (multiple of 8, dividing n_pad, <= n_pad//2 so v7x megacore gets
    >=2 tiles) that fits a generation-aware VMEM budget covering the double-buffered
    bf16 input blocks AND the ~8 live f32 [T, n_pad] temporaries of the layer loop."""
    budget = min(vmem_cap // 2, 56 * 1024 * 1024)
    resident = (KV_W * 4 + XWD_W * 4 + 64) * n_pad          # kv_full + merged output etc.
    budget = max(budget - resident, 0)
    bytes_per_row = (3 * 2 * 2 + 8 * 4) * n_pad             # 2x-buffered bf16 + f32 temps
    max_rows = max(8, budget // bytes_per_row)
    upper = min(n_pad // 2, max_rows)
    for t in range(int(upper), 7, -1):
        if n_pad % t == 0 and t % 8 == 0:
            return t
    return 8


def init_params(key):
    ks = jax.random.split(key, 12)

    def w(k, shape, scale=0.3):
        return (scale * jax.random.normal(k, shape)).astype(jnp.float32)

    return {
        "wq": w(ks[0], (N_LAYERS, HIDDEN, IN_FEATURES)),
        "bq": w(ks[1], (N_LAYERS, HIDDEN), 0.1),
        "wk": w(ks[2], (N_LAYERS, HIDDEN, IN_FEATURES)),
        "bk": w(ks[3], (N_LAYERS, HIDDEN), 0.1),
        "wv": w(ks[4], (N_LAYERS, HIDDEN, IN_FEATURES)),
        "bv": w(ks[5], (N_LAYERS, HIDDEN), 0.1),
        "we": w(ks[6], (N_LAYERS, HIDDEN, EDGE_DIM)),
        "wskip": w(ks[7], (N_LAYERS, HIDDEN, IN_FEATURES)),
        "bskip": w(ks[8], (N_LAYERS, HIDDEN), 0.1),
        "ln_g": jnp.ones((N_LAYERS, HIDDEN), jnp.float32),   # torch LayerNorm defaults
        "ln_b": jnp.zeros((N_LAYERS, HIDDEN), jnp.float32),
        "wg": w(ks[9], (OUT_FEATURES, HIDDEN)),
        "bg": w(ks[10], (1, OUT_FEATURES), 0.1),
    }


@jax.jit
def powergrid_gnn(x, edge_index, edge_attr, params):
    n = x.shape[0]
    n_pad = -(-n // 128) * 128                 # lane-dense padding (multiple of 128)
    src = edge_index[0]
    dst = edge_index[1]

    # Dense adjacency [dst, src] and edge-attr planes [edge_dim, dst, src] in bf16
    # (0/1 exact; edge_attr loses ~3 decimal digits -- acceptable).  Padded rows/cols
    # are zero so they are masked naturally.
    adj = jnp.zeros((n_pad, n_pad), jnp.bfloat16).at[dst, src].set(1.0)
    eattr = jnp.zeros((EDGE_DIM, n_pad, n_pad), jnp.bfloat16).at[:, dst, src].set(
        edge_attr.T.astype(jnp.bfloat16))
    x_pad = jnp.zeros((n_pad, IN_FEATURES), jnp.float32).at[:n, :].set(
        x.astype(jnp.float32))

    # Fused projection weights.  q|skip stays in-kernel (per dst tile); k|v for ALL
    # nodes is hoisted here (computed once, resident in both TPU kernels' VMEM).
    w_qs = jnp.concatenate([
        jnp.concatenate([params["wq"][l], params["wskip"][l]], axis=0)
        for l in range(N_LAYERS)], axis=0)                         # [QS_W, IN]
    b_qs = jnp.concatenate([
        jnp.concatenate([params["bq"][l], params["bskip"][l]], axis=0)
        for l in range(N_LAYERS)], axis=0)[None, :]                # [1, QS_W]
    w_kv = jnp.concatenate([
        jnp.concatenate([params["wk"][l], params["wv"][l]], axis=0)
        for l in range(N_LAYERS)], axis=0)                         # [KV_W, IN]
    b_kv = jnp.concatenate([
        jnp.concatenate([params["bk"][l], params["bv"][l]], axis=0)
        for l in range(N_LAYERS)], axis=0)[None, :]                # [1, KV_W]
    kv_full = (x_pad @ w_kv.T + b_kv).astype(jnp.float32)          # [Np, KV_W]

    vmem_cap = _vmem_capacity_bytes()
    tile = _choose_tile_dst(n_pad, vmem_cap)
    grid = (n_pad // tile,)
    cparams = pltpu.CompilerParams(
        dimension_semantics=("parallel",),     # independent dst tiles -> megacore / 2 TC
        vmem_limit_bytes=min(int(0.75 * vmem_cap), 100 * 1024 * 1024),
    )

    xwd = pl.pallas_call(
        filter_kernel,
        out_shape=jax.ShapeDtypeStruct((n_pad, XWD_W), jnp.float32),
        grid=grid,
        in_specs=[
            pl.BlockSpec((tile, IN_FEATURES), lambda t: (t, 0)),          # x dst tile
            pl.BlockSpec((tile, n_pad), lambda t: (t, 0)),                # adj tile bf16
            pl.BlockSpec((EDGE_DIM, tile, n_pad), lambda t: (0, t, 0)),   # eattr tile bf16
            pl.BlockSpec((n_pad, KV_W), lambda t: (0, 0)),                # hoisted k|v
            pl.BlockSpec((QS_W, IN_FEATURES), lambda t: (0, 0)),          # fused q|skip W
            pl.BlockSpec((1, QS_W), lambda t: (0, 0)),                    # fused q|skip b
            pl.BlockSpec((N_LAYERS, HIDDEN, EDGE_DIM), lambda t: (0, 0, 0)),  # We
            pl.BlockSpec((N_LAYERS, HIDDEN), lambda t: (0, 0)),           # LN gamma
            pl.BlockSpec((N_LAYERS, HIDDEN), lambda t: (0, 0)),           # LN beta
            pl.BlockSpec((OUT_FEATURES, HIDDEN), lambda t: (0, 0)),       # GCN weight
        ],
        out_specs=pl.BlockSpec((tile, XWD_W), lambda t: (t, 0)),
        compiler_params=cparams,
    )(x_pad, adj, eattr, kv_full, w_qs, b_qs, params["we"],
      params["ln_g"], params["ln_b"], params["wg"])

    out_pad = pl.pallas_call(
        functools.partial(gcn_kernel, tile),
        out_shape=jax.ShapeDtypeStruct((n_pad, OUT_FEATURES), jnp.float32),
        grid=grid,
        in_specs=[
            pl.BlockSpec((tile, IN_FEATURES), lambda t: (t, 0)),   # x dst tile (vmax/vmin)
            pl.BlockSpec((tile, n_pad), lambda t: (t, 0)),         # adj tile bf16
            pl.BlockSpec((n_pad, XWD_W), lambda t: (0, 0)),        # merged xw|dinv
            pl.BlockSpec((1, OUT_FEATURES), lambda t: (0, 0)),     # GCN bias
        ],
        out_specs=pl.BlockSpec((tile, OUT_FEATURES), lambda t: (t, 0)),
        compiler_params=cparams,
    )(x_pad, adj, xwd, params["bg"])

    return out_pad[:n]


if __name__ == "__main__":
    key = jax.random.PRNGKey(0)
    k_x1, k_x2, k_ea, k_p = jax.random.split(key, 4)

    N = 8  # buses
    # Node features: [vmax, vmin] per bus.
    vmax = 1.05 + 0.05 * jax.random.uniform(k_x1, (N,))
    vmin = 0.90 + 0.05 * jax.random.uniform(k_x2, (N,))
    x = jnp.stack([vmax, vmin], axis=1).astype(jnp.float32)        # [8, 2]

    # Bidirectional ring graph: 16 directed edges.
    src = jnp.concatenate([jnp.arange(N), (jnp.arange(N) + 1) % N])
    dst = jnp.concatenate([(jnp.arange(N) + 1) % N, jnp.arange(N)])
    edge_index = jnp.stack([src, dst]).astype(jnp.int32)           # [2, 16]
    edge_attr = (0.5 * jax.random.normal(k_ea, (2 * N, EDGE_DIM))).astype(jnp.float32)

    params = init_params(k_p)

    out = powergrid_gnn(x, edge_index, edge_attr, params)
    out = jax.block_until_ready(out)
    assert out.shape == (N, OUT_FEATURES)
    assert bool(jnp.isfinite(out).all())
    print("KERNEL_OK")
</pallas_src>

<mosaic_0001>
module attributes {stable_mosaic.version = 11 : i64} {
  func.func @gcn_kernel(%arg0: i32, %arg1: memref<64x2xf32, #tpu.memory_space<vmem>>, %arg2: memref<64x128xbf16, #tpu.memory_space<vmem>>, %arg3: memref<128x4xf32, #tpu.memory_space<vmem>>, %arg4: memref<1x2xf32, #tpu.memory_space<vmem>>, %arg5: memref<64x2xf32, #tpu.memory_space<vmem>>) attributes {dimension_semantics = [#tpu.dimension_semantics<parallel>], iteration_bounds = array<i64: 2>, scalar_prefetch = 0 : i64, scratch_operands = 0 : i64, tpu.core_type = #tpu.core_type<tc>, window_params = [{transform_indices = @transform_0, window_bounds = array<i64: 64, 2>}, {transform_indices = @transform_1, window_bounds = array<i64: 64, 128>}, {pipeline_mode = #tpu.pipeline_mode<synchronous>, transform_indices = @transform_2, window_bounds = array<i64: 128, 4>}, {pipeline_mode = #tpu.pipeline_mode<synchronous>, transform_indices = @transform_3, window_bounds = array<i64: 1, 2>}, {transform_indices = @transform_4, window_bounds = array<i64: 64, 2>}]} {
    %c0 = arith.constant 0 : index
    %c0_0 = arith.constant 0 : index
    %0 = vector.load %arg2[%c0, %c0_0] : memref<64x128xbf16, #tpu.memory_space<vmem>>, vector<64x128xbf16>
    %1 = arith.extf %0 : vector<64x128xbf16> to vector<64x128xf32>
    %c0_1 = arith.constant 0 : index
    %c0_2 = arith.constant 0 : index
    %2 = vector.load %arg3[%c0_1, %c0_2] : memref<128x4xf32, #tpu.memory_space<vmem>>, vector<128x4xf32>
    %c64_i32 = arith.constant 64 : i32
    %3 = arith.muli %arg0, %c64_i32 : i32
    %4 = tpu.assume_multiple %3, 8 : i32
    %5 = arith.index_cast %4 : i32 to index
    %c0_3 = arith.constant 0 : index
    %6 = vector.load %arg3[%5, %c0_3] : memref<128x4xf32, #tpu.memory_space<vmem>>, vector<64x4xf32>
    %7 = vector.extract_strided_slice %2 {offsets = [0, 0], sizes = [128, 2], strides = [1, 1]} : vector<128x4xf32> to vector<128x2xf32>
    %8 = vector.extract_strided_slice %6 {offsets = [0, 0], sizes = [64, 2], strides = [1, 1]} : vector<64x4xf32> to vector<64x2xf32>
    %9 = vector.extract_strided_slice %6 {offsets = [0, 2], sizes = [64, 1], strides = [1, 1]} : vector<64x4xf32> to vector<64x1xf32>
    %cst = arith.constant dense<0.000000e+00> : vector<64x2xf32>
    %10 = tpu.matmul %1, %7, %cst {dimension_numbers = #tpu.dot_dimension_numbers<[1], [0], [0], [1], [0, 0, 1, 1], [], []>} : vector<64x128xf32>, vector<128x2xf32>, vector<64x2xf32> -> vector<64x2xf32>
    %11 = arith.addf %10, %8 : vector<64x2xf32>
    %12 = vector.broadcast %9 : vector<64x1xf32> to vector<64x2xf32>
    %13 = arith.mulf %12, %11 : vector<64x2xf32>
    %c0_4 = arith.constant 0 : index
    %c0_5 = arith.constant 0 : index
    %14 = vector.load %arg4[%c0_4, %c0_5] : memref<1x2xf32, #tpu.memory_space<vmem>>, vector<1x2xf32>
    %15 = vector.broadcast %14 : vector<1x2xf32> to vector<64x2xf32>
    %16 = arith.addf %13, %15 : vector<64x2xf32>
    %c0_6 = arith.constant 0 : index
    %c0_7 = arith.constant 0 : index
    %17 = vector.load %arg1[%c0_6, %c0_7] : memref<64x2xf32, #tpu.memory_space<vmem>>, vector<64x2xf32>
    %18 = vector.extract_strided_slice %17 {offsets = [0, 0], sizes = [64, 1], strides = [1, 1]} : vector<64x2xf32> to vector<64x1xf32>
    %19 = vector.extract_strided_slice %17 {offsets = [0, 1], sizes = [64, 1], strides = [1, 1]} : vector<64x2xf32> to vector<64x1xf32>
    %20 = arith.subf %18, %19 : vector<64x1xf32>
    %21 = vector.extract_strided_slice %16 {offsets = [0, 0], sizes = [64, 1], strides = [1, 1]} : vector<64x2xf32> to vector<64x1xf32>
    %cst_8 = arith.constant 0.000000e+00 : f32
    %22 = vector.broadcast %cst_8 : f32 to vector<64x1xf32>
    %23 = arith.subf %22, %21 : vector<64x1xf32>
    %24 = math.exp %23 : vector<64x1xf32>
    %cst_9 = arith.constant 1.000000e+00 : f32
    %25 = vector.broadcast %cst_9 : f32 to vector<64x1xf32>
    %26 = arith.addf %25, %24 : vector<64x1xf32>
    %cst_10 = arith.constant 1.000000e+00 : f32
    %27 = vector.broadcast %cst_10 : f32 to vector<64x1xf32>
    %28 = arith.divf %27, %26 : vector<64x1xf32>
    %29 = arith.mulf %20, %28 : vector<64x1xf32>
    %30 = arith.addf %29, %19 : vector<64x1xf32>
    %31 = vector.extract_strided_slice %16 {offsets = [0, 1], sizes = [64, 1], strides = [1, 1]} : vector<64x2xf32> to vector<64x1xf32>
    %cst_11 = arith.constant 0.000000e+00 : f32
    %32 = vector.broadcast %cst_11 : f32 to vector<64x1xf32>
    %33 = arith.subf %32, %31 : vector<64x1xf32>
    %34 = math.exp %33 : vector<64x1xf32>
    %cst_12 = arith.constant 1.000000e+00 : f32
    %35 = vector.broadcast %cst_12 : f32 to vector<64x1xf32>
    %36 = arith.addf %35, %34 : vector<64x1xf32>
    %cst_13 = arith.constant 1.000000e+00 : f32
    %37 = vector.broadcast %cst_13 : f32 to vector<64x1xf32>
    %38 = arith.divf %37, %36 : vector<64x1xf32>
    %cst_14 = arith.constant 3.000000e+01 : f32
    %39 = vector.broadcast %cst_14 : f32 to vector<64x1xf32>
    %40 = arith.mulf %39, %38 : vector<64x1xf32>
    %41 = tpu.concatenate %30, %40 in 1 : vector<64x1xf32>, vector<64x1xf32> -> vector<64x2xf32>
    %c0_15 = arith.constant 0 : index
    %c0_16 = arith.constant 0 : index
    %42 = vector.load %arg5[%c0_15, %c0_16] : memref<64x2xf32, #tpu.memory_space<vmem>>, vector<64x2xf32>
    tpu.vector_store %arg5[%c0_15, %c0_16], %41 {strides = array<i32>} : memref<64x2xf32, #tpu.memory_space<vmem>>, vector<64x2xf32>,
    return
  }
  func.func @transform_0(%arg0: i32) -> (i32, i32) {
    %c0_i32 = arith.constant 0 : i32
    %c0_i32_0 = arith.constant 0 : i32
    return %arg0, %c0_i32 : i32, i32
  }
  func.func @transform_1(%arg0: i32) -> (i32, i32) {
    %c0_i32 = arith.constant 0 : i32
    %c0_i32_0 = arith.constant 0 : i32
    return %arg0, %c0_i32 : i32, i32
  }
  func.func @transform_2(%arg0: i32) -> (i32, i32) {
    %c0_i32 = arith.constant 0 : i32
    %c0_i32_0 = arith.constant 0 : i32
    %c0_i32_1 = arith.constant 0 : i32
    return %c0_i32, %c0_i32_0 : i32, i32
  }
  func.func @transform_3(%arg0: i32) -> (i32, i32) {
    %c0_i32 = arith.constant 0 : i32
    %c0_i32_0 = arith.constant 0 : i32
    %c0_i32_1 = arith.constant 0 : i32
    return %c0_i32, %c0_i32_0 : i32, i32
  }
  func.func @transform_4(%arg0: i32) -> (i32, i32) {
    %c0_i32 = arith.constant 0 : i32
    %c0_i32_0 = arith.constant 0 : i32
    return %arg0, %c0_i32 : i32, i32
  }
}

module attributes {stable_mosaic.version = 11 : i64} {
  func.func @filter_kernel(%arg0: i32, %arg1: memref<64x2xf32, #tpu.memory_space<vmem>>, %arg2: memref<64x128xbf16, #tpu.memory_space<vmem>>, %arg3: memref<2x64x128xbf16, #tpu.memory_space<vmem>>, %arg4: memref<128x96xf32, #tpu.memory_space<vmem>>, %arg5: memref<96x2xf32, #tpu.memory_space<vmem>>, %arg6: memref<1x96xf32, #tpu.memory_space<vmem>>, %arg7: memref<3x16x2xf32, #tpu.memory_space<vmem>>, %arg8: memref<3x16xf32, #tpu.memory_space<vmem>>, %arg9: memref<3x16xf32, #tpu.memory_space<vmem>>, %arg10: memref<2x16xf32, #tpu.memory_space<vmem>>, %arg11: memref<64x4xf32, #tpu.memory_space<vmem>>) attributes {dimension_semantics = [#tpu.dimension_semantics<parallel>], iteration_bounds = array<i64: 2>, scalar_prefetch = 0 : i64, scratch_operands = 0 : i64, tpu.core_type = #tpu.core_type<tc>, window_params = [{transform_indices = @transform_0, window_bounds = array<i64: 64, 2>}, {transform_indices = @transform_1, window_bounds = array<i64: 64, 128>}, {transform_indices = @transform_2, window_bounds = array<i64: 2, 64, 128>}, {pipeline_mode = #tpu.pipeline_mode<synchronous>, transform_indices = @transform_3, window_bounds = array<i64: 128, 96>}, {pipeline_mode = #tpu.pipeline_mode<synchronous>, transform_indices = @transform_4, window_bounds = array<i64: 96, 2>}, {pipeline_mode = #tpu.pipeline_mode<synchronous>, transform_indices = @transform_5, window_bounds = array<i64: 1, 96>}, {pipeline_mode = #tpu.pipeline_mode<synchronous>, transform_indices = @transform_6, window_bounds = array<i64: 3, 16, 2>}, {pipeline_mode = #tpu.pipeline_mode<synchronous>, transform_indices = @transform_7, window_bounds = array<i64: 3, 16>}, {pipeline_mode = #tpu.pipeline_mode<synchronous>, transform_indices = @transform_8, window_bounds = array<i64: 3, 16>}, {pipeline_mode = #tpu.pipeline_mode<synchronous>, transform_indices = @transform_9, window_bounds = array<i64: 2, 16>}, {transform_indices = @transform_10, window_bounds = array<i64: 64, 4>}]} {
    %c0 = arith.constant 0 : index
    %c0_0 = arith.constant 0 : index
    %0 = vector.load %arg1[%c0, %c0_0] : memref<64x2xf32, #tpu.memory_space<vmem>>, vector<64x2xf32>
    %c0_1 = arith.constant 0 : index
    %c0_2 = arith.constant 0 : index
    %1 = vector.load %arg2[%c0_1, %c0_2] : memref<64x128xbf16, #tpu.memory_space<vmem>>, vector<64x128xbf16>
    %2 = arith.extf %1 : vector<64x128xbf16> to vector<64x128xf32>
    %c0_3 = arith.constant 0 : index
    %c0_4 = arith.constant 0 : index
    %c0_5 = arith.constant 0 : index
    %3 = vector.load %arg3[%c0_3, %c0_4, %c0_5] : memref<2x64x128xbf16, #tpu.memory_space<vmem>>, vector<1x64x128xbf16>
    %4 = vector.shape_cast %3 : vector<1x64x128xbf16> to vector<64x128xbf16>
    %5 = arith.extf %4 : vector<64x128xbf16> to vector<64x128xf32>
    %c1 = arith.constant 1 : index
    %c0_6 = arith.constant 0 : index
    %c0_7 = arith.constant 0 : index
    %6 = vector.load %arg3[%c1, %c0_6, %c0_7] : memref<2x64x128xbf16, #tpu.memory_space<vmem>>, vector<1x64x128xbf16>
    %7 = vector.shape_cast %6 : vector<1x64x128xbf16> to vector<64x128xbf16>
    %8 = arith.extf %7 : vector<64x128xbf16> to vector<64x128xf32>
    %c0_8 = arith.constant 0 : index
    %c0_9 = arith.constant 0 : index
    %9 = vector.load %arg4[%c0_8, %c0_9] : memref<128x96xf32, #tpu.memory_space<vmem>>, vector<128x96xf32>
    %c0_10 = arith.constant 0 : index
    %c0_11 = arith.constant 0 : index
    %10 = vector.load %arg8[%c0_10, %c0_11] : memref<3x16xf32, #tpu.memory_space<vmem>>, vector<3x16xf32>
    %c0_12 = arith.constant 0 : index
    %c0_13 = arith.constant 0 : index
    %11 = vector.load %arg9[%c0_12, %c0_13] : memref<3x16xf32, #tpu.memory_space<vmem>>, vector<3x16xf32>
    %c0_14 = arith.constant 0 : index
    %c0_15 = arith.constant 0 : index
    %12 = vector.load %arg5[%c0_14, %c0_15] : memref<96x2xf32, #tpu.memory_space<vmem>>, vector<96x2xf32>
    %cst = arith.constant dense<0.000000e+00> : vector<64x96xf32>
    %13 = tpu.matmul %0, %12, %cst {dimension_numbers = #tpu.dot_dimension_numbers<[1], [1], [0], [0], [0, 0, 1, 0], [], []>} : vector<64x2xf32>, vector<96x2xf32>, vector<64x96xf32> -> vector<64x96xf32>
    %c0_16 = arith.constant 0 : index
    %c0_17 = arith.constant 0 : index
    %14 = vector.load %arg6[%c0_16, %c0_17] : memref<1x96xf32, #tpu.memory_space<vmem>>, vector<1x96xf32>
    %15 = vector.broadcast %14 : vector<1x96xf32> to vector<64x96xf32>
    %16 = arith.addf %13, %15 : vector<64x96xf32>
    %cst_18 = arith.constant 1.000000e+00 : f32
    %17 = vector.broadcast %cst_18 : f32 to vector<64x128xf32>
    %18 = arith.subf %2, %17 : vector<64x128xf32>
    %cst_19 = arith.constant 1.000000e+30 : f32
    %19 = vector.broadcast %cst_19 : f32 to vector<64x128xf32>
    %20 = arith.mulf %18, %19 : vector<64x128xf32>
    %cst_20 = arith.constant 0.000000e+00 : f32
    %21 = vector.broadcast %cst_20 : f32 to vector<64x16xf32>
    %22 = vector.extract_strided_slice %16 {offsets = [0, 0], sizes = [64, 16], strides = [1, 1]} : vector<64x96xf32> to vector<64x16xf32>
    %cst_21 = arith.constant 2.500000e-01 : f32
    %23 = vector.broadcast %cst_21 : f32 to vector<64x16xf32>
    %24 = arith.mulf %22, %23 : vector<64x16xf32>
    %25 = vector.extract_strided_slice %16 {offsets = [0, 16], sizes = [64, 16], strides = [1, 1]} : vector<64x96xf32> to vector<64x16xf32>
    %26 = vector.extract_strided_slice %9 {offsets = [0, 0], sizes = [128, 16], strides = [1, 1]} : vector<128x96xf32> to vector<128x16xf32>
    %27 = vector.extract_strided_slice %9 {offsets = [0, 16], sizes = [128, 16], strides = [1, 1]} : vector<128x96xf32> to vector<128x16xf32>
    %c0_22 = arith.constant 0 : index
    %c0_23 = arith.constant 0 : index
    %c0_24 = arith.constant 0 : index
    %28 = vector.load %arg7[%c0_22, %c0_23, %c0_24] : memref<3x16x2xf32, #tpu.memory_space<vmem>>, vector<1x16x2xf32>
    %29 = vector.shape_cast %28 : vector<1x16x2xf32> to vector<16x2xf32>
    %cst_25 = arith.constant dense<0.000000e+00> : vector<64x2xf32>
    %30 = tpu.matmul %24, %29, %cst_25 {dimension_numbers = #tpu.dot_dimension_numbers<[1], [0], [0], [1], [0, 0, 1, 1], [], []>} : vector<64x16xf32>, vector<16x2xf32>, vector<64x2xf32> -> vector<64x2xf32>
    %cst_26 = arith.constant dense<0.000000e+00> : vector<64x128xf32>
    %31 = tpu.matmul %24, %26, %cst_26 {dimension_numbers = #tpu.dot_dimension_numbers<[1], [1], [0], [0], [0, 0, 1, 0], [], []>} : vector<64x16xf32>, vector<128x16xf32>, vector<64x128xf32> -> vector<64x128xf32>
    %32 = arith.addf %31, %20 : vector<64x128xf32>
    %33 = vector.extract_strided_slice %30 {offsets = [0, 0], sizes = [64, 1], strides = [1, 1]} : vector<64x2xf32> to vector<64x1xf32>
    %34 = vector.broadcast %33 : vector<64x1xf32> to vector<64x128xf32>
    %35 = arith.mulf %5, %34 : vector<64x128xf32>
    %36 = arith.addf %32, %35 : vector<64x128xf32>
    %37 = vector.extract_strided_slice %30 {offsets = [0, 1], sizes = [64, 1], strides = [1, 1]} : vector<64x2xf32> to vector<64x1xf32>
    %38 = vector.broadcast %37 : vector<64x1xf32> to vector<64x128xf32>
    %39 = arith.mulf %8, %38 : vector<64x128xf32>
    %40 = arith.addf %36, %39 : vector<64x128xf32>
    %cst_27 = arith.constant dense<0xFF800000> : vector<64xf32>
    %41 = vector.multi_reduction <maximumf>, %40, %cst_27 [1] : vector<64x128xf32> to vector<64xf32>
    %42 = vector.shape_cast %41 : vector<64xf32> to vector<64x1xf32>
    %cst_28 = arith.constant 0.000000e+00 : f32
    %43 = vector.broadcast %cst_28 : f32 to vector<64x1xf32>
    %44 = arith.maximumf %42, %43 : vector<64x1xf32>
    %45 = vector.broadcast %44 : vector<64x1xf32> to vector<64x128xf32>
    %46 = arith.subf %40, %45 : vector<64x128xf32>
    %47 = math.exp %46 : vector<64x128xf32>
    %cst_29 = arith.constant dense<0.000000e+00> : vector<64xf32>
    %48 = vector.multi_reduction <add>, %47, %cst_29 [1] : vector<64x128xf32> to vector<64xf32>
    %49 = vector.shape_cast %48 : vector<64xf32> to vector<64x1xf32>
    %cst_30 = arith.constant 1.000000e-30 : f32
    %50 = vector.broadcast %cst_30 : f32 to vector<64x1xf32>
    %51 = arith.maximumf %49, %50 : vector<64x1xf32>
    %52 = tpu.reciprocal %51 {approx = true} : vector<64x1xf32> -> vector<64x1xf32>
    %cst_31 = arith.constant dense<0.000000e+00> : vector<64x16xf32>
    %53 = tpu.matmul %47, %27, %cst_31 {dimension_numbers = #tpu.dot_dimension_numbers<[1], [0], [0], [1], [0, 0, 1, 1], [], []>} : vector<64x128xf32>, vector<128x16xf32>, vector<64x16xf32> -> vector<64x16xf32>
    %54 = vector.broadcast %52 : vector<64x1xf32> to vector<64x16xf32>
    %55 = arith.mulf %53, %54 : vector<64x16xf32>
    %56 = arith.mulf %47, %5 : vector<64x128xf32>
    %cst_32 = arith.constant dense<0.000000e+00> : vector<64xf32>
    %57 = vector.multi_reduction <add>, %56, %cst_32 [1] : vector<64x128xf32> to vector<64xf32>
    %58 = vector.shape_cast %57 : vector<64xf32> to vector<64x1xf32>
    %59 = arith.mulf %47, %8 : vector<64x128xf32>
    %cst_33 = arith.constant dense<0.000000e+00> : vector<64xf32>
    %60 = vector.multi_reduction <add>, %59, %cst_33 [1] : vector<64x128xf32> to vector<64xf32>
    %61 = vector.shape_cast %60 : vector<64xf32> to vector<64x1xf32>
    %62 = tpu.concatenate %58, %61 in 1 : vector<64x1xf32>, vector<64x1xf32> -> vector<64x2xf32>
    %63 = vector.broadcast %52 : vector<64x1xf32> to vector<64x2xf32>
    %64 = arith.mulf %62, %63 : vector<64x2xf32>
    %cst_34 = arith.constant dense<0.000000e+00> : vector<64x16xf32>
    %65 = tpu.matmul %64, %29, %cst_34 {dimension_numbers = #tpu.dot_dimension_numbers<[1], [1], [0], [0], [0, 0, 1, 0], [], []>} : vector<64x2xf32>, vector<16x2xf32>, vector<64x16xf32> -> vector<64x16xf32>
    %66 = arith.addf %55, %65 : vector<64x16xf32>
    %67 = arith.addf %21, %66 : vector<64x16xf32>
    %68 = arith.addf %67, %25 : vector<64x16xf32>
    %cst_35 = arith.constant dense<0.000000e+00> : vector<64xf32>
    %69 = vector.multi_reduction <add>, %68, %cst_35 [1] : vector<64x16xf32> to vector<64xf32>
    %70 = vector.shape_cast %69 : vector<64xf32> to vector<64x1xf32>
    %cst_36 = arith.constant 1.600000e+01 : f32
    %71 = vector.broadcast %cst_36 : f32 to vector<64x1xf32>
    %72 = arith.divf %70, %71 : vector<64x1xf32>
    %73 = vector.broadcast %72 : vector<64x1xf32> to vector<64x16xf32>
    %74 = arith.subf %68, %73 : vector<64x16xf32>
    %75 = vector.broadcast %72 : vector<64x1xf32> to vector<64x16xf32>
    %76 = arith.subf %68, %75 : vector<64x16xf32>
    %77 = arith.mulf %74, %76 : vector<64x16xf32>
    %cst_37 = arith.constant dense<0.000000e+00> : vector<64xf32>
    %78 = vector.multi_reduction <add>, %77, %cst_37 [1] : vector<64x16xf32> to vector<64xf32>
    %79 = vector.shape_cast %78 : vector<64xf32> to vector<64x1xf32>
    %cst_38 = arith.constant 1.600000e+01 : f32
    %80 = vector.broadcast %cst_38 : f32 to vector<64x1xf32>
    %81 = arith.divf %79, %80 : vector<64x1xf32>
    %82 = vector.broadcast %72 : vector<64x1xf32> to vector<64x16xf32>
    %83 = arith.subf %68, %82 : vector<64x16xf32>
    %cst_39 = arith.constant 9.99999974E-6 : f32
    %84 = vector.broadcast %cst_39 : f32 to vector<64x1xf32>
    %85 = arith.addf %81, %84 : vector<64x1xf32>
    %86 = math.rsqrt %85 : vector<64x1xf32>
    %87 = vector.broadcast %86 : vector<64x1xf32> to vector<64x16xf32>
    %88 = arith.mulf %83, %87 : vector<64x16xf32>
    %89 = vector.extract_strided_slice %10 {offsets = [0, 0], sizes = [1, 16], strides = [1, 1]} : vector<3x16xf32> to vector<1x16xf32>
    %90 = vector.broadcast %89 : vector<1x16xf32> to vector<64x16xf32>
    %91 = arith.mulf %88, %90 : vector<64x16xf32>
    %92 = vector.extract_strided_slice %11 {offsets = [0, 0], sizes = [1, 16], strides = [1, 1]} : vector<3x16xf32> to vector<1x16xf32>
    %93 = vector.broadcast %92 : vector<1x16xf32> to vector<64x16xf32>
    %94 = arith.addf %91, %93 : vector<64x16xf32>
    %95 = vector.extract_strided_slice %16 {offsets = [0, 32], sizes = [64, 16], strides = [1, 1]} : vector<64x96xf32> to vector<64x16xf32>
    %cst_40 = arith.constant 2.500000e-01 : f32
    %96 = vector.broadcast %cst_40 : f32 to vector<64x16xf32>
    %97 = arith.mulf %95, %96 : vector<64x16xf32>
    %98 = vector.extract_strided_slice %16 {offsets = [0, 48], sizes = [64, 16], strides = [1, 1]} : vector<64x96xf32> to vector<64x16xf32>
    %99 = vector.extract_strided_slice %9 {offsets = [0, 32], sizes = [128, 16], strides = [1, 1]} : vector<128x96xf32> to vector<128x16xf32>
    %100 = vector.extract_strided_slice %9 {offsets = [0, 48], sizes = [128, 16], strides = [1, 1]} : vector<128x96xf32> to vector<128x16xf32>
    %c1_41 = arith.constant 1 : index
    %c0_42 = arith.constant 0 : index
    %c0_43 = arith.constant 0 : index
    %101 = vector.load %arg7[%c1_41, %c0_42, %c0_43] : memref<3x16x2xf32, #tpu.memory_space<vmem>>, vector<1x16x2xf32>
    %102 = vector.shape_cast %101 : vector<1x16x2xf32> to vector<16x2xf32>
    %cst_44 = arith.constant dense<0.000000e+00> : vector<64x2xf32>
    %103 = tpu.matmul %97, %102, %cst_44 {dimension_numbers = #tpu.dot_dimension_numbers<[1], [0], [0], [1], [0, 0, 1, 1], [], []>} : vector<64x16xf32>, vector<16x2xf32>, vector<64x2xf32> -> vector<64x2xf32>
    %cst_45 = arith.constant dense<0.000000e+00> : vector<64x128xf32>
    %104 = tpu.matmul %97, %99, %cst_45 {dimension_numbers = #tpu.dot_dimension_numbers<[1], [1], [0], [0], [0, 0, 1, 0], [], []>} : vector<64x16xf32>, vector<128x16xf32>, vector<64x128xf32> -> vector<64x128xf32>
    %105 = arith.addf %104, %20 : vector<64x128xf32>
    %106 = vector.extract_strided_slice %103 {offsets = [0, 0], sizes = [64, 1], strides = [1, 1]} : vector<64x2xf32> to vector<64x1xf32>
    %107 = vector.broadcast %106 : vector<64x1xf32> to vector<64x128xf32>
    %108 = arith.mulf %5, %107 : vector<64x128xf32>
    %109 = arith.addf %105, %108 : vector<64x128xf32>
    %110 = vector.extract_strided_slice %103 {offsets = [0, 1], sizes = [64, 1], strides = [1, 1]} : vector<64x2xf32> to vector<64x1xf32>
    %111 = vector.broadcast %110 : vector<64x1xf32> to vector<64x128xf32>
    %112 = arith.mulf %8, %111 : vector<64x128xf32>
    %113 = arith.addf %109, %112 : vector<64x128xf32>
    %cst_46 = arith.constant dense<0xFF800000> : vector<64xf32>
    %114 = vector.multi_reduction <maximumf>, %113, %cst_46 [1] : vector<64x128xf32> to vector<64xf32>
    %115 = vector.shape_cast %114 : vector<64xf32> to vector<64x1xf32>
    %cst_47 = arith.constant 0.000000e+00 : f32
    %116 = vector.broadcast %cst_47 : f32 to vector<64x1xf32>
    %117 = arith.maximumf %115, %116 : vector<64x1xf32>
    %118 = vector.broadcast %117 : vector<64x1xf32> to vector<64x128xf32>
    %119 = arith.subf %113, %118 : vector<64x128xf32>
    %120 = math.exp %119 : vector<64x128xf32>
    %cst_48 = arith.constant dense<0.000000e+00> : vector<64xf32>
    %121 = vector.multi_reduction <add>, %120, %cst_48 [1] : vector<64x128xf32> to vector<64xf32>
    %122 = vector.shape_cast %121 : vector<64xf32> to vector<64x1xf32>
    %cst_49 = arith.constant 1.000000e-30 : f32
    %123 = vector.broadcast %cst_49 : f32 to vector<64x1xf32>
    %124 = arith.maximumf %122, %123 : vector<64x1xf32>
    %125 = tpu.reciprocal %124 {approx = true} : vector<64x1xf32> -> vector<64x1xf32>
    %cst_50 = arith.constant dense<0.000000e+00> : vector<64x16xf32>
    %126 = tpu.matmul %120, %100, %cst_50 {dimension_numbers = #tpu.dot_dimension_numbers<[1], [0], [0], [1], [0, 0, 1, 1], [], []>} : vector<64x128xf32>, vector<128x16xf32>, vector<64x16xf32> -> vector<64x16xf32>
    %127 = vector.broadcast %125 : vector<64x1xf32> to vector<64x16xf32>
    %128 = arith.mulf %126, %127 : vector<64x16xf32>
    %129 = arith.mulf %120, %5 : vector<64x128xf32>
    %cst_51 = arith.constant dense<0.000000e+00> : vector<64xf32>
    %130 = vector.multi_reduction <add>, %129, %cst_51 [1] : vector<64x128xf32> to vector<64xf32>
    %131 = vector.shape_cast %130 : vector<64xf32> to vector<64x1xf32>
    %132 = arith.mulf %120, %8 : vector<64x128xf32>
    %cst_52 = arith.constant dense<0.000000e+00> : vector<64xf32>
    %133 = vector.multi_reduction <add>, %132, %cst_52 [1] : vector<64x128xf32> to vector<64xf32>
    %134 = vector.shape_cast %133 : vector<64xf32> to vector<64x1xf32>
    %135 = tpu.concatenate %131, %134 in 1 : vector<64x1xf32>, vector<64x1xf32> -> vector<64x2xf32>
    %136 = vector.broadcast %125 : vector<64x1xf32> to vector<64x2xf32>
    %137 = arith.mulf %135, %136 : vector<64x2xf32>
    %cst_53 = arith.constant dense<0.000000e+00> : vector<64x16xf32>
    %138 = tpu.matmul %137, %102, %cst_53 {dimension_numbers = #tpu.dot_dimension_numbers<[1], [1], [0], [0], [0, 0, 1, 0], [], []>} : vector<64x2xf32>, vector<16x2xf32>, vector<64x16xf32> -> vector<64x16xf32>
    %139 = arith.addf %128, %138 : vector<64x16xf32>
    %140 = arith.addf %94, %139 : vector<64x16xf32>
    %141 = arith.addf %140, %98 : vector<64x16xf32>
    %cst_54 = arith.constant dense<0.000000e+00> : vector<64xf32>
    %142 = vector.multi_reduction <add>, %141, %cst_54 [1] : vector<64x16xf32> to vector<64xf32>
    %143 = vector.shape_cast %142 : vector<64xf32> to vector<64x1xf32>
    %cst_55 = arith.constant 1.600000e+01 : f32
    %144 = vector.broadcast %cst_55 : f32 to vector<64x1xf32>
    %145 = arith.divf %143, %144 : vector<64x1xf32>
    %146 = vector.broadcast %145 : vector<64x1xf32> to vector<64x16xf32>
    %147 = arith.subf %141, %146 : vector<64x16xf32>
    %148 = vector.broadcast %145 : vector<64x1xf32> to vector<64x16xf32>
    %149 = arith.subf %141, %148 : vector<64x16xf32>
    %150 = arith.mulf %147, %149 : vector<64x16xf32>
    %cst_56 = arith.constant dense<0.000000e+00> : vector<64xf32>
    %151 = vector.multi_reduction <add>, %150, %cst_56 [1] : vector<64x16xf32> to vector<64xf32>
    %152 = vector.shape_cast %151 : vector<64xf32> to vector<64x1xf32>
    %cst_57 = arith.constant 1.600000e+01 : f32
    %153 = vector.broadcast %cst_57 : f32 to vector<64x1xf32>
    %154 = arith.divf %152, %153 : vector<64x1xf32>
    %155 = vector.broadcast %145 : vector<64x1xf32> to vector<64x16xf32>
    %156 = arith.subf %141, %155 : vector<64x16xf32>
    %cst_58 = arith.constant 9.99999974E-6 : f32
    %157 = vector.broadcast %cst_58 : f32 to vector<64x1xf32>
    %158 = arith.addf %154, %157 : vector<64x1xf32>
    %159 = math.rsqrt %158 : vector<64x1xf32>
    %160 = vector.broadcast %159 : vector<64x1xf32> to vector<64x16xf32>
    %161 = arith.mulf %156, %160 : vector<64x16xf32>
    %162 = vector.extract_strided_slice %10 {offsets = [1, 0], sizes = [1, 16], strides = [1, 1]} : vector<3x16xf32> to vector<1x16xf32>
    %163 = vector.broadcast %162 : vector<1x16xf32> to vector<64x16xf32>
    %164 = arith.mulf %161, %163 : vector<64x16xf32>
    %165 = vector.extract_strided_slice %11 {offsets = [1, 0], sizes = [1, 16], strides = [1, 1]} : vector<3x16xf32> to vector<1x16xf32>
    %166 = vector.broadcast %165 : vector<1x16xf32> to vector<64x16xf32>
    %167 = arith.addf %164, %166 : vector<64x16xf32>
    %168 = vector.extract_strided_slice %16 {offsets = [0, 64], sizes = [64, 16], strides = [1, 1]} : vector<64x96xf32> to vector<64x16xf32>
    %cst_59 = arith.constant 2.500000e-01 : f32
    %169 = vector.broadcast %cst_59 : f32 to vector<64x16xf32>
    %170 = arith.mulf %168, %169 : vector<64x16xf32>
    %171 = vector.extract_strided_slice %16 {offsets = [0, 80], sizes = [64, 16], strides = [1, 1]} : vector<64x96xf32> to vector<64x16xf32>
    %172 = vector.extract_strided_slice %9 {offsets = [0, 64], sizes = [128, 16], strides = [1, 1]} : vector<128x96xf32> to vector<128x16xf32>
    %173 = vector.extract_strided_slice %9 {offsets = [0, 80], sizes = [128, 16], strides = [1, 1]} : vector<128x96xf32> to vector<128x16xf32>
    %c2 = arith.constant 2 : index
    %c0_60 = arith.constant 0 : index
    %c0_61 = arith.constant 0 : index
    %174 = vector.load %arg7[%c2, %c0_60, %c0_61] : memref<3x16x2xf32, #tpu.memory_space<vmem>>, vector<1x16x2xf32>
    %175 = vector.shape_cast %174 : vector<1x16x2xf32> to vector<16x2xf32>
    %cst_62 = arith.constant dense<0.000000e+00> : vector<64x2xf32>
    %176 = tpu.matmul %170, %175, %cst_62 {dimension_numbers = #tpu.dot_dimension_numbers<[1], [0], [0], [1], [0, 0, 1, 1], [], []>} : vector<64x16xf32>, vector<16x2xf32>, vector<64x2xf32> -> vector<64x2xf32>
    %cst_63 = arith.constant dense<0.000000e+00> : vector<64x128xf32>
    %177 = tpu.matmul %170, %172, %cst_63 {dimension_numbers = #tpu.dot_dimension_numbers<[1], [1], [0], [0], [0, 0, 1, 0], [], []>} : vector<64x16xf32>, vector<128x16xf32>, vector<64x128xf32> -> vector<64x128xf32>
    %178 = arith.addf %177, %20 : vector<64x128xf32>
    %179 = vector.extract_strided_slice %176 {offsets = [0, 0], sizes = [64, 1], strides = [1, 1]} : vector<64x2xf32> to vector<64x1xf32>
    %180 = vector.broadcast %179 : vector<64x1xf32> to vector<64x128xf32>
    %181 = arith.mulf %5, %180 : vector<64x128xf32>
    %182 = arith.addf %178, %181 : vector<64x128xf32>
    %183 = vector.extract_strided_slice %176 {offsets = [0, 1], sizes = [64, 1], strides = [1, 1]} : vector<64x2xf32> to vector<64x1xf32>
    %184 = vector.broadcast %183 : vector<64x1xf32> to vector<64x128xf32>
    %185 = arith.mulf %8, %184 : vector<64x128xf32>
    %186 = arith.addf %182, %185 : vector<64x128xf32>
    %cst_64 = arith.constant dense<0xFF800000> : vector<64xf32>
    %187 = vector.multi_reduction <maximumf>, %186, %cst_64 [1] : vector<64x128xf32> to vector<64xf32>
    %188 = vector.shape_cast %187 : vector<64xf32> to vector<64x1xf32>
    %cst_65 = arith.constant 0.000000e+00 : f32
    %189 = vector.broadcast %cst_65 : f32 to vector<64x1xf32>
    %190 = arith.maximumf %188, %189 : vector<64x1xf32>
    %191 = vector.broadcast %190 : vector<64x1xf32> to vector<64x128xf32>
    %192 = arith.subf %186, %191 : vector<64x128xf32>
    %193 = math.exp %192 : vector<64x128xf32>
    %cst_66 = arith.constant dense<0.000000e+00> : vector<64xf32>
    %194 = vector.multi_reduction <add>, %193, %cst_66 [1] : vector<64x128xf32> to vector<64xf32>
    %195 = vector.shape_cast %194 : vector<64xf32> to vector<64x1xf32>
    %cst_67 = arith.constant 1.000000e-30 : f32
    %196 = vector.broadcast %cst_67 : f32 to vector<64x1xf32>
    %197 = arith.maximumf %195, %196 : vector<64x1xf32>
    %198 = tpu.reciprocal %197 {approx = true} : vector<64x1xf32> -> vector<64x1xf32>
    %cst_68 = arith.constant dense<0.000000e+00> : vector<64x16xf32>
    %199 = tpu.matmul %193, %173, %cst_68 {dimension_numbers = #tpu.dot_dimension_numbers<[1], [0], [0], [1], [0, 0, 1, 1], [], []>} : vector<64x128xf32>, vector<128x16xf32>, vector<64x16xf32> -> vector<64x16xf32>
    %200 = vector.broadcast %198 : vector<64x1xf32> to vector<64x16xf32>
    %201 = arith.mulf %199, %200 : vector<64x16xf32>
    %202 = arith.mulf %193, %5 : vector<64x128xf32>
    %cst_69 = arith.constant dense<0.000000e+00> : vector<64xf32>
    %203 = vector.multi_reduction <add>, %202, %cst_69 [1] : vector<64x128xf32> to vector<64xf32>
    %204 = vector.shape_cast %203 : vector<64xf32> to vector<64x1xf32>
    %205 = arith.mulf %193, %8 : vector<64x128xf32>
    %cst_70 = arith.constant dense<0.000000e+00> : vector<64xf32>
    %206 = vector.multi_reduction <add>, %205, %cst_70 [1] : vector<64x128xf32> to vector<64xf32>
    %207 = vector.shape_cast %206 : vector<64xf32> to vector<64x1xf32>
    %208 = tpu.concatenate %204, %207 in 1 : vector<64x1xf32>, vector<64x1xf32> -> vector<64x2xf32>
    %209 = vector.broadcast %198 : vector<64x1xf32> to vector<64x2xf32>
    %210 = arith.mulf %208, %209 : vector<64x2xf32>
    %cst_71 = arith.constant dense<0.000000e+00> : vector<64x16xf32>
    %211 = tpu.matmul %210, %175, %cst_71 {dimension_numbers = #tpu.dot_dimension_numbers<[1], [1], [0], [0], [0, 0, 1, 0], [], []>} : vector<64x2xf32>, vector<16x2xf32>, vector<64x16xf32> -> vector<64x16xf32>
    %212 = arith.addf %201, %211 : vector<64x16xf32>
    %213 = arith.addf %167, %212 : vector<64x16xf32>
    %214 = arith.addf %213, %171 : vector<64x16xf32>
    %cst_72 = arith.constant dense<0.000000e+00> : vector<64xf32>
    %215 = vector.multi_reduction <add>, %214, %cst_72 [1] : vector<64x16xf32> to vector<64xf32>
    %216 = vector.shape_cast %215 : vector<64xf32> to vector<64x1xf32>
    %cst_73 = arith.constant 1.600000e+01 : f32
    %217 = vector.broadcast %cst_73 : f32 to vector<64x1xf32>
    %218 = arith.divf %216, %217 : vector<64x1xf32>
    %219 = vector.broadcast %218 : vector<64x1xf32> to vector<64x16xf32>
    %220 = arith.subf %214, %219 : vector<64x16xf32>
    %221 = vector.broadcast %218 : vector<64x1xf32> to vector<64x16xf32>
    %222 = arith.subf %214, %221 : vector<64x16xf32>
    %223 = arith.mulf %220, %222 : vector<64x16xf32>
    %cst_74 = arith.constant dense<0.000000e+00> : vector<64xf32>
    %224 = vector.multi_reduction <add>, %223, %cst_74 [1] : vector<64x16xf32> to vector<64xf32>
    %225 = vector.shape_cast %224 : vector<64xf32> to vector<64x1xf32>
    %cst_75 = arith.constant 1.600000e+01 : f32
    %226 = vector.broadcast %cst_75 : f32 to vector<64x1xf32>
    %227 = arith.divf %225, %226 : vector<64x1xf32>
    %228 = vector.broadcast %218 : vector<64x1xf32> to vector<64x16xf32>
    %229 = arith.subf %214, %228 : vector<64x16xf32>
    %cst_76 = arith.constant 9.99999974E-6 : f32
    %230 = vector.broadcast %cst_76 : f32 to vector<64x1xf32>
    %231 = arith.addf %227, %230 : vector<64x1xf32>
    %232 = math.rsqrt %231 : vector<64x1xf32>
    %233 = vector.broadcast %232 : vector<64x1xf32> to vector<64x16xf32>
    %234 = arith.mulf %229, %233 : vector<64x16xf32>
    %235 = vector.extract_strided_slice %10 {offsets = [2, 0], sizes = [1, 16], strides = [1, 1]} : vector<3x16xf32> to vector<1x16xf32>
    %236 = vector.broadcast %235 : vector<1x16xf32> to vector<64x16xf32>
    %237 = arith.mulf %234, %236 : vector<64x16xf32>
    %238 = vector.extract_strided_slice %11 {offsets = [2, 0], sizes = [1, 16], strides = [1, 1]} : vector<3x16xf32> to vector<1x16xf32>
    %239 = vector.broadcast %238 : vector<1x16xf32> to vector<64x16xf32>
    %240 = arith.addf %237, %239 : vector<64x16xf32>
    %cst_77 = arith.constant 0.000000e+00 : f32
    %241 = vector.broadcast %cst_77 : f32 to vector<64x16xf32>
    %242 = arith.maximumf %240, %241 : vector<64x16xf32>
    %cst_78 = arith.constant dense<0.000000e+00> : vector<64xf32>
    %243 = vector.multi_reduction <add>, %2, %cst_78 [1] : vector<64x128xf32> to vector<64xf32>
    %244 = vector.shape_cast %243 : vector<64xf32> to vector<64x1xf32>
    %cst_79 = arith.constant 1.000000e+00 : f32
    %245 = vector.broadcast %cst_79 : f32 to vector<64x1xf32>
    %246 = arith.addf %244, %245 : vector<64x1xf32>
    %247 = math.rsqrt %246 : vector<64x1xf32>
    %c0_80 = arith.constant 0 : index
    %c0_81 = arith.constant 0 : index
    %248 = vector.load %arg10[%c0_80, %c0_81] : memref<2x16xf32, #tpu.memory_space<vmem>>, vector<2x16xf32>
    %cst_82 = arith.constant dense<0.000000e+00> : vector<64x2xf32>
    %249 = tpu.matmul %242, %248, %cst_82 {dimension_numbers = #tpu.dot_dimension_numbers<[1], [1], [0], [0], [0, 0, 1, 0], [], []>} : vector<64x16xf32>, vector<2x16xf32>, vector<64x2xf32> -> vector<64x2xf32>
    %250 = vector.broadcast %247 : vector<64x1xf32> to vector<64x2xf32>
    %251 = arith.mulf %250, %249 : vector<64x2xf32>
    %cst_83 = arith.constant 0.000000e+00 : f32
    %252 = vector.broadcast %cst_83 : f32 to vector<64x1xf32>
    %253 = tpu.concatenate %251, %247, %252 in 1 : vector<64x2xf32>, vector<64x1xf32>, vector<64x1xf32> -> vector<64x4xf32>
    %c0_84 = arith.constant 0 : index
    %c0_85 = arith.constant 0 : index
    %254 = vector.load %arg11[%c0_84, %c0_85] : memref<64x4xf32, #tpu.memory_space<vmem>>, vector<64x4xf32>
    tpu.vector_store %arg11[%c0_84, %c0_85], %253 {strides = array<i32>} : memref<64x4xf32, #tpu.memory_space<vmem>>, vector<64x4xf32>,
    return
  }
  func.func @transform_0(%arg0: i32) -> (i32, i32) {
    %c0_i32 = arith.constant 0 : i32
    %c0_i32_0 = arith.constant 0 : i32
    return %arg0, %c0_i32 : i32, i32
  }
  func.func @transform_1(%arg0: i32) -> (i32, i32) {
    %c0_i32 = arith.constant 0 : i32
    %c0_i32_0 = arith.constant 0 : i32
    return %arg0, %c0_i32 : i32, i32
  }
  func.func @transform_2(%arg0: i32) -> (i32, i32, i32) {
    %c0_i32 = arith.constant 0 : i32
    %c0_i32_0 = arith.constant 0 : i32
    %c0_i32_1 = arith.constant 0 : i32
    return %c0_i32, %arg0, %c0_i32_0 : i32, i32, i32
  }
  func.func @transform_3(%arg0: i32) -> (i32, i32) {
    %c0_i32 = arith.constant 0 : i32
    %c0_i32_0 = arith.constant 0 : i32
    %c0_i32_1 = arith.constant 0 : i32
    return %c0_i32, %c0_i32_0 : i32, i32
  }
  func.func @transform_4(%arg0: i32) -> (i32, i32) {
    %c0_i32 = arith.constant 0 : i32
    %c0_i32_0 = arith.constant 0 : i32
    %c0_i32_1 = arith.constant 0 : i32
    return %c0_i32, %c0_i32_0 : i32, i32
  }
  func.func @transform_5(%arg0: i32) -> (i32, i32) {
    %c0_i32 = arith.constant 0 : i32
    %c0_i32_0 = arith.constant 0 : i32
    %c0_i32_1 = arith.constant 0 : i32
    return %c0_i32, %c0_i32_0 : i32, i32
  }
  func.func @transform_6(%arg0: i32) -> (i32, i32, i32) {
    %c0_i32 = arith.constant 0 : i32
    %c0_i32_0 = arith.constant 0 : i32
    %c0_i32_1 = arith.constant 0 : i32
    %c0_i32_2 = arith.constant 0 : i32
    return %c0_i32, %c0_i32_0, %c0_i32_1 : i32, i32, i32
  }
  func.func @transform_7(%arg0: i32) -> (i32, i32) {
    %c0_i32 = arith.constant 0 : i32
    %c0_i32_0 = arith.constant 0 : i32
    %c0_i32_1 = arith.constant 0 : i32
    return %c0_i32, %c0_i32_0 : i32, i32
  }
  func.func @transform_8(%arg0: i32) -> (i32, i32) {
    %c0_i32 = arith.constant 0 : i32
    %c0_i32_0 = arith.constant 0 : i32
    %c0_i32_1 = arith.constant 0 : i32
    return %c0_i32, %c0_i32_0 : i32, i32
  }
  func.func @transform_9(%arg0: i32) -> (i32, i32) {
    %c0_i32 = arith.constant 0 : i32
    %c0_i32_0 = arith.constant 0 : i32
    %c0_i32_1 = arith.constant 0 : i32
    return %c0_i32, %c0_i32_0 : i32, i32
  }
  func.func @transform_10(%arg0: i32) -> (i32, i32) {
    %c0_i32 = arith.constant 0 : i32
    %c0_i32_0 = arith.constant 0 : i32
    return %arg0, %c0_i32 : i32, i32
  }
}

</mosaic_0001>

<bundles_post_ra>
// kernel: powergrid_gnn.3
= control target key start
LH: loop header
LB: loop body
LE: loop exit
PB: predicated region body
PF: predicated region fallthrough
CT: control target
= control target key end

     0   :  { %s1715_s0 = inlined_call_operand.hbm [shape: f32[128,2], index: 0, kind: input, shape index: {}]   ;;  %s1716_s1 = inlined_call_operand.hbm [shape: bf16[128,128], index: 1, kind: input, shape index: {}]   ;;  %s1717_s2 = inlined_call_operand.hbm [shape: f32[128,4], index: 2, kind: input, shape index: {}]   ;;  %s1718_s3 = inlined_call_operand.hbm [shape: f32[1,2], index: 3, kind: input, shape index: {}]   ;;  %s1719_s4 = inlined_call_operand.hbm [shape: f32[128,2], index: 4, kind: output, shape index: {}]  }
   0x1   :  { %1723 = sst [smem:[#allocation16_spill]] %s1715_s0 }
   0x2   :  { %1724 = sst [smem:[#allocation17_spill]] %s1717_s2 }
   0x3   :  { %9 = vsyncpa [#allocation3], 0 }
   0x4   :  { %11 = vsyncpa [#allocation3 + $0x1], 0 }
   0x5   :  { %12 = vsyncpa [#allocation6], 0 }
   0x6   :  { %14 = vsyncpa [#allocation6 + $0x1], 0 }
   0x7   :  { %15 = vsyncpa [#allocation9], 0 }
   0x8   :  { %16 = vsyncpa [#allocation4], 0 }
   0x9   :  { %18 = vsyncpa [#allocation4 + $0x1], 0  ;;  %s1275_s15 = smov 0   ;;  %s1277_s16 = smov 0  }
   0xa   :  { %s1279_s17 = smov 0   ;;  %s1281_s18 = smov 0  }
   0xb LB: > { %s1296_s19 = sadd.s32 4294967295, %s1235_s18   ;;  %s765_s20 = sadd.s32 4294967294, %s1235_s18   ;;  %s1235_s18 = sphi %s1281_s18, %s1746_s18   ;;  %s1231_s17 = sphi %s1279_s17, %s1745_s17   ;;  %s1227_s16 = sphi %s1277_s16, %s1744_s16   ;;  %s1223_s15 = sphi %s1275_s15, %s1743_s15  }
   0xc   : > { %p44_p0 = scmp.ne.s32.totalorder %s1227_s16, %s1223_s15  ;;  %p1720_p1 = scmp.eq.s32.totalorder %s1296_s19, 0 }
   0xd   : > { %p142_p3 = scmp.eq.s32.totalorder %s765_s20, 1  ;;  %p766_p5 = scmp.ge.s32.totalorder %s1235_s18, 1 }
   0xe   : > { %p1305_p4 = por %p1720_p1, %p44_p0  ;;  %p149_p7 = scmp.lt.s32.totalorder %s1235_s18, 3 }
   0xf   : > { %p1310_p6 = por %p142_p3, %p44_p0  ;;  %s1237_s24 = smov [#allocation7]  }
  0x10   : > { %s1725_s21 = scalar_select %p1305_p4, 1, 0 }
  0x11   : > { %s1726_s22 = scalar_select %p1310_p6, 1, 0 }
  0x12   : > { %p1315_p8 = pnand %p766_p5, %p149_p7  ;;  %s161_s25 = sshll.u32 %s1237_s24, 4  ;;  %s1319_s25 = int_to_ptr.vmem [resolvable:$true] %s161_s25 }
  0x13   : > { %s1238_s27 = smov [#allocation8]   ;;  %s1729_s2 = sld [smem:[#allocation17_spill]] }
  0x14   : > { %p941_p9 = pneg %p1315_p8  ;;  %s175_s28 = sshll.u32 %s1238_s27, 4  ;;  %s1330_s28 = int_to_ptr.vmem [resolvable:$true] %s175_s28 }
  0x16   : > { %p1326_p11 = pnand %p941_p9, %p1720_p1 }
  0x18   : > { %p1043_p13 = pneg %p1326_p11 }
  0x19   : > { %s1041_s5 = scalar_lea.hbm %s1729_s2, 2048 }
  0x1a   : > { %p1042_p12 = scmp.ne.s32.totalorder %s1729_s2, %s1041_s5  ;;  %p1048_p5 = scmp.lt.u32.totalorder %s1041_s5, %s1729_s2 }
  0x1c   : > { %p1044_p0 = pnand %p1043_p13, %p1042_p12 }
  0x1e   : > { %p1045_p3 = pneg %p1044_p0 }
  0x20   : > { %p1050_p7 = pnand %p1048_p5, %p1045_p3 }
  0x22   : > { %1053 = shalt.err (!%p1050_p7)
}
  0x23   : > { %s1054_s10 = scalar_lea.vmem %s1319_s25, 2048  ;;  %p1062_p2 = scmp.lt.s32.totalorder %s1319_s25, %s1319_s25 }
  0x24   : > { %p1055_p9 = scmp.ne.s32.totalorder %s1319_s25, %s1054_s10  ;;  %p1063_p12 = scmp.lt.s32.totalorder %s1054_s10, %s1054_s10 }
  0x26   : > { %p1057_p10 = pnand %p1055_p9, %p1043_p13  ;;  %p1064_p0 = por %p1063_p12, %p1062_p2 }
  0x28   : > { %p1058_p1 = pneg %p1057_p10 }
  0x2a   : > { %p1065_p6 = pnand %p1064_p0, %p1058_p1 }
  0x2c   : > { %1068 = shalt.err (!%p1065_p6)
}
  0x2d   : > { %s1239_s11 = smov 128   ;;  %s1240_s12 = smov 8  }
  0x2e   : > { %944 = dma.hbm_to_vmem [thread:$0]  (!%p1326_p11), %s1729_s2, 2048, %s1319_s25, [#allocation6], %s1239_s11, %s1239_s11, %s1240_s12  }
  0x2f   : > { %s1069_s27 = scalar_lea.hbm %s1718_s3, 16 }
  0x30   : > { %p1070_p1 = scmp.ne.s32.totalorder %s1718_s3, %s1069_s27  ;;  %p1076_p10 = scmp.lt.u32.totalorder %s1069_s27, %s1718_s3 }
  0x32   : > { %p1072_p2 = pnand %p1070_p1, %p1043_p13 }
  0x34   : > { %p1073_p6 = pneg %p1072_p2 }
  0x36   : > { %p1078_p3 = pnand %p1076_p10, %p1073_p6 }
  0x38   : > { %1081 = shalt.err (!%p1078_p3)
}
  0x39   : > { %s1082_s25 = scalar_lea.vmem %s1330_s28, 16  ;;  %s1089_s7 = scalar_lea.vmem %s1330_s28, 32 }
  0x3a   : > { %p1083_p5 = scmp.ne.s32.totalorder %s1330_s28, %s1082_s25  ;;  %p1090_p12 = scmp.lt.s32.totalorder %s1330_s28, %s1330_s28 }
  0x3b   : > { %p1091_p0 = scmp.lt.s32.totalorder %s1089_s7, %s1082_s25 }
  0x3c   : > { %p1085_p7 = pnand %p1083_p5, %p1043_p13 }
  0x3d   : > { %p1092_p1 = por %p1091_p0, %p1090_p12 }
  0x3e   : > { %p1086_p9 = pneg %p1085_p7 }
  0x40   : > { %p1093_p2 = pnand %p1092_p1, %p1086_p9 }
  0x42   : > { %1096 = shalt.err (!%p1093_p2)
}
  0x43   : > { %947 = dma.hbm_to_vmem [thread:$0]  (!%p1326_p11), %s1718_s3, 16, %s1330_s28, [#allocation9]  }
  0x44   : > { %s1389_s10 = sadd.s32 1, %s1235_s18   ;;  %s31_s26 = sadd.s32 1, %s1231_s17 }
  0x45   : > { %s28_s13 = ssub.s32 %s1235_s18, %s1389_s10  ;;  %p38_p13 = scmp.ne.s32.totalorder %s1231_s17, %s1227_s16 }
  0x46   : > { %p29_p6 = scmp.eq.s32.totalorder %s28_s13, 0  ;;  %p39_p10 = scmp.eq.s32.totalorder %s1235_s18, 0 }
  0x47   : > { %p1730_p3 = scmp.eq.s32.totalorder %s1296_s19, 1  ;;  %p961_p7 = scmp.lt.s32.totalorder %s1235_s18, 2 }
  0x48   : > { %s1405_s20 = scalar_select %p29_p6, %s1231_s17, %s31_s26  }
  0x49   : > { %p1399_p5 = por %p1730_p3, %p38_p13  ;;  %p40_p9 = por %p39_p10, %p38_p13 }
  0x4a   : > { %s1408_s24 = sand.u32 1, %s1231_s17   ;;  %s789_s27 = sshll.u32 %s1235_s18, 10 }
  0x4b   : > { %s1731_s14 = scalar_select %p1399_p5, 1, 0 }
  0x4c   : > { %s770_s28 = sshll.u32 %s1408_s24, 6  ;;  %s1732_s0 = sld [smem:[#allocation16_spill]] }
  0x4d   : > { %s190_s6 = scalar_lea.vmem [#allocation2], %s770_s28  ;;  %p1419_p11 = pnand %p961_p7, %p40_p9 }
  0x4e   : > { %s197_s25 = sshll.u32 %s190_s6, 4  ;;  %s773_s9 = sshll.u32 %s1408_s24, 5  ;;  %s1417_s25 = int_to_ptr.vmem [resolvable:$true] %s197_s25 }
  0x4f   : > { %s187_s26 = scalar_lea.sflag [#allocation3], %s1408_s24  ;;  %p1099_p0 = pneg %p1419_p11 }
  0x52   : > { %s1415_s5 = scalar_lea.hbm %s1732_s0, %s789_s27  ;;  %s1102_s29 = scalar_lea.hbm %s1732_s0, 2048 }
  0x53   : > { %s1097_s13 = scalar_lea.hbm %s1415_s5, 1024  ;;  %p1103_p13 = scmp.lt.u32.totalorder %s1415_s5, %s1732_s0 }
  0x54   : > { %p1098_p12 = scmp.ne.s32.totalorder %s1415_s5, %s1097_s13  ;;  %p1104_p6 = scmp.lt.u32.totalorder %s1102_s29, %s1097_s13 }
  0x55   : > { %p1106_p3 = scmp.lt.u32.totalorder %s1097_s13, %s1415_s5 }
  0x56   : > { %p1100_p1 = pnand %p1099_p0, %p1098_p12  ;;  %p1105_p10 = por %p1104_p6, %p1103_p13 }
  0x58   : > { %p1101_p2 = pneg %p1100_p1  ;;  %p1107_p7 = por %p1106_p3, %p1105_p10 }
  0x5a   : > { %p1108_p9 = pnand %p1107_p7, %p1101_p2 }
  0x5c   : > { %1111 = shalt.err (!%p1108_p9)
}
  0x5d   : > { %s1112_s8 = scalar_lea.vmem %s1417_s25, 1024  ;;  %s1241_s28 = smov [#allocation2]  }
  0x5e   : > { %p1113_p12 = scmp.ne.s32.totalorder %s1417_s25, %s1112_s8  ;;  %s1117_s27 = sshll.u32 %s1241_s28, 4  ;;  %s1118_s27 = int_to_ptr.vmem [resolvable:$false] %s1117_s27 }
  0x5f   : > { %s1119_s30 = scalar_lea.vmem %s1118_s27, 2048  ;;  %p1120_p4 = scmp.lt.s32.totalorder %s1417_s25, %s1118_s27 }
  0x60   : > { %p1115_p1 = pnand %p1113_p12, %p1099_p0  ;;  %p1121_p13 = scmp.lt.s32.totalorder %s1119_s30, %s1112_s8 }
  0x62   : > { %p1116_p5 = pneg %p1115_p1  ;;  %p1122_p6 = por %p1121_p13, %p1120_p4 }
  0x64   : > { %p1123_p10 = pnand %p1122_p6, %p1116_p5 }
  0x66   : > { %1126 = shalt.err (!%p1123_p10)
}
  0x67   : > { %951 = dma.hbm_to_vmem [thread:$0]  (!%p1419_p11), %s1415_s5, 1024, %s1417_s25, %s187_s26, %s1239_s11, %s1239_s11, %s1240_s12  }
  0x68   : > { %s790_s13 = sshll.u32 %s1235_s18, 9  ;;  %s211_s28 = scalar_lea.vmem [#allocation5], %s773_s9 }
  0x69   : > { %s1460_s6 = scalar_lea.hbm %s1716_s1, %s790_s13  ;;  %s218_s27 = sshll.u32 %s211_s28, 4  ;;  %s1464_s27 = int_to_ptr.vmem [resolvable:$true] %s218_s27 }
  0x6a   : > { %s1734_s30 = sand.u32 1, %s1235_s18   ;;  %s1127_s2 = scalar_lea.hbm %s1460_s6, 512 }
  0x6b   : > { %s1468_s0 = scalar_lea.sflag [#allocation6], %s1734_s30  ;;  %p1128_p4 = scmp.ne.s32.totalorder %s1460_s6, %s1127_s2 }
  0x6c   : > { %s1132_s24 = scalar_lea.hbm %s1716_s1, 1024  ;;  %p1133_p3 = scmp.lt.u32.totalorder %s1460_s6, %s1716_s1 }
  0x6d   : > { %p1130_p5 = pnand %p1128_p4, %p1099_p0  ;;  %p1134_p7 = scmp.lt.u32.totalorder %s1132_s24, %s1127_s2 }
  0x6e   : > { %p1136_p12 = scmp.lt.u32.totalorder %s1127_s2, %s1460_s6 }
  0x6f   : > { %p1131_p2 = pneg %p1130_p5  ;;  %p1135_p9 = por %p1134_p7, %p1133_p3 }
  0x71   : > { %p1137_p1 = por %p1136_p12, %p1135_p9 }
  0x73   : > { %p1138_p13 = pnand %p1137_p1, %p1131_p2 }
  0x75   : > { %1141 = shalt.err (!%p1138_p13)
}
  0x76   : > { %s1142_s9 = scalar_lea.vmem %s1464_s27, 512  ;;  %s1242_s26 = smov [#allocation5]  }
  0x77   : > { %p1143_p6 = scmp.ne.s32.totalorder %s1464_s27, %s1142_s9  ;;  %s1147_s13 = sshll.u32 %s1242_s26, 4  ;;  %s1148_s13 = int_to_ptr.vmem [resolvable:$false] %s1147_s13 }
  0x78   : > { %s1149_s29 = scalar_lea.vmem %s1148_s13, 1024  ;;  %p1150_p5 = scmp.lt.s32.totalorder %s1464_s27, %s1148_s13 }
  0x79   : > { %p1145_p10 = pnand %p1143_p6, %p1099_p0  ;;  %p1151_p3 = scmp.lt.s32.totalorder %s1149_s29, %s1142_s9 }
  0x7b   : > { %p1146_p4 = pneg %p1145_p10  ;;  %p1152_p7 = por %p1151_p3, %p1150_p5 }
  0x7d   : > { %p1153_p9 = pnand %p1152_p7, %p1146_p4 }
  0x7f   : > { %1156 = shalt.err (!%p1153_p9)
}
  0x80   : > { %s1243_s2 = smov 64   ;;  %s1244_s8 = smov 4  }
  0x81   : > { %954 = dma.hbm_to_vmem [thread:$0]  (!%p1419_p11), %s1460_s6, 512, %s1464_s27, %s1468_s0, %s1243_s2, %s1243_s2, %s1244_s8  }
  0x82   : > { %230 = sbr.rel (%p1315_p8) target bundleno = 455 (0x1c7), region = 36  ;;  %s1497_s28 = sand.u32 (!%p1315_p8), 1, %s1227_s16  }
  0x83   : > { %s777_s30 = sshll.u32 (!%p1315_p8), %s1497_s28, 6  ;;  %s233_s11 = scalar_lea.sflag (!%p1315_p8), [#allocation3], %s1497_s28 }
  0x84   : > { %s1503_s12 = scalar_lea.vmem (!%p1315_p8), [#allocation2], %s777_s30  ;;  %p1735_p0 = scmp.ne.s32.totalorder (!%p1315_p8), %s1725_s21, 0 }
  0x89   : > { %1202 = dma.done.wait (%p1735_p0), %s233_s11, 1024  }
  0x8a   : > { %1204 = vsyncadd (%p1735_p0), %s233_s11, 4294966272  ;;  %s241_s0 = sand.u32 1, %s1296_s19   ;;  %s778_s23 = sshll.u32 %s1497_s28, 5 }
  0x8b   : > { %s242_s7 = scalar_lea.sflag [#allocation6], %s241_s0  ;;  %s1511_s6 = scalar_lea.vmem [#allocation5], %s778_s23 }
  0x8c   : > { %1206 = dma.done.wait (%p1735_p0), %s242_s7, 512  }
  0x8d   : > { %1208 = vsyncadd (%p1735_p0), %s242_s7, 4294966784  ;;  %p1736_p8 = scmp.eq.s32.totalorder %s1296_s19, 0 }
  0x8f   : > { %1210 = dma.done.wait (%p1736_p8), [#allocation6], 2048   ;;  %p1737_p11 = pmov %p1736_p8 }
  0x90   : > { %p1738_p2 = pmov %p1736_p8 }
  0x91   : > { %1212 = vsyncadd (%p1737_p11), [#allocation6], 4294965248 }
  0x92   : > { %1214 = dma.done.wait (%p1738_p2), [#allocation9], 16   ;;  %p1739_p12 = pmov %p1738_p2 }
  0x93   : > { %v1245_v0 = vmov 2   ;;  %v302_v1 = vld [vmem:[#allocation7] sm:$0xff]  ;;  %v303_v2 = vld [vmem:[#allocation7 + $0x8] sm:$0xff]  ;;  %v304_v3 = vld [vmem:[#allocation7 + $0x10] sm:$0xff]  ;;  %s782_s21 = sshll.u32 %s1296_s19, 6  ;;  %s1246_s24 = smov 127  }
  0x94   : > { %1216 = vsyncadd (%p1739_p12), [#allocation9], 4294967280  ;;  %1008 = vset.pattern.permute.xlu1 %v1245_v0  ;;  %1007 = vset.pattern.permute.xlu0 %v1245_v0  ;;  %v879_v4 = vpack.c.bf16 %v303_v2, %v302_v1  ;;  %v305_v5 = vld [vmem:[#allocation7 + $0x18] sm:$0xff]  ;;  %v306_v7 = vld [vmem:[#allocation7 + $0x20] sm:$0xff]  ;;  %s1534_s27 = scalar_lea.vmem [#allocation7], %s782_s21  ;;  %vm616_vm0 = vcmask 7168  }
  0x95   : > { %v883_v6 = vpack.c.bf16 %v305_v5, %v304_v3  ;;  %v307_v8 = vld [vmem:[#allocation7 + $0x28] sm:$0xff]  ;;  %v1527_v10 = vld [vmem:[%s1511_s6] sm:$0xff]   ;;  %v1530_v11 = vld [vmem:[%s1511_s6 + $0x10] sm:$0xff]   ;;  %vm625_vm1 = vcmask 15360   ;;  %s1637_s5 = scalar_lea.vmem [#allocation10], %s777_s30  ;;  %s791_s25 = sshll.u32 %s1296_s19, 10 }
  0x96   : > { %880 = vmatprep.subr.bf16.mxu0 %v879_v4  ;;  %911 = vmatprep.subr.bf16.mxu1 %v879_v4  ;;  %v887_v9 = vpack.c.bf16 %v307_v8, %v306_v7  ;;  %v308_v12 = vld [vmem:[#allocation7 + $0x30] sm:$0xff]  ;;  %v309_v13 = vld [vmem:[#allocation7 + $0x38] sm:$0xff]  ;;  %v794_v14 = vunpack.c.l.bf16 %v1527_v10  ;;  %v802_v15 = vunpack.c.l.bf16 %v1530_v11  ;;  %v1541_v17 = vld [vmem:[%s1534_s27] sm:$0xff]  ;;  %v795_v44 = vunpack.c.h.bf16 %v1527_v10  ;;  %s648_s9 = sshll.u32 %s1637_s5, 4  ;;  %s1661_s13 = scalar_lea.hbm %s1719_s4, %s791_s25  ;;  %s1663_s9 = int_to_ptr.vmem [resolvable:$true] %s648_s9 }
  0x97   : > { %882 = vmatpush3.bf16.msra.mxu0 %v879_v4  ;;  %919 = vmatpush3.bf16.msra.mxu1 %v879_v4  ;;  %v1537_v16 = vld [vmem:[%s1534_s27 + $0x10] sm:$0xff]  ;;  %v1544_v18 = vld [vmem:[%s1534_s27 + $0x18] sm:$0xff]  ;;  %v891_v19 = vpack.c.bf16 %v309_v13, %v308_v12  ;;  %v310_v20 = vld [vmem:[#allocation7 + $0x40] sm:$0xff]  ;;  %v803_v45 = vunpack.c.h.bf16 %v1530_v11  ;;  %s635_s29 = scalar_lea.sflag [#allocation4], %s1497_s28  ;;  %s1157_s2 = scalar_lea.vmem %s1663_s9, 1024 }
  0x98   : > { %884 = vmatprep.subr.bf16.mxu0 %v883_v6  ;;  %912 = vmatprep.subr.bf16.mxu1 %v883_v6  ;;  %v311_v21 = vld [vmem:[#allocation7 + $0x48] sm:$0xff]  ;;  %v312_v25 = vld [vmem:[#allocation7 + $0x50] sm:$0xff]  ;;  %v313_v26 = vld [vmem:[#allocation7 + $0x58] sm:$0xff]  ;;  %p1158_p1 = scmp.ne.s32.totalorder %s1663_s9, %s1157_s2  ;;  %p1740_p13 = scmp.ne.s32.totalorder %s1731_s14, 0 }
  0x99   : > { %445 = vperm.xlu1 %1008, %v1537_v16   ;;  %867 = vmatprep.mubr.f32.mxu0 %v794_v14  ;;  %v1549_v22 = vld [vmem:[%s1534_s27 + $0x8] sm:$0xff]  ;;  %v895_v24 = vpack.c.bf16 %v311_v21, %v310_v20  ;;  %v1557_v27 = vld [vmem:[%s1534_s27 + $0x20] sm:$0xff]  ;;  %v1560_v28 = vld [vmem:[%s1534_s27 + $0x38] sm:$0xff]  ;;  %v899_v29 = vpack.c.bf16 %v313_v26, %v312_v25  ;;  %s1247_s8 = smov [#allocation10]  }
  0x9a   : > { %873 = vmatprep.mubr.f32.mxu1 %v802_v15  ;;  %435 = vperm.xlu0 %1007, %v1541_v17   ;;  %v1552_v23 = vld [vmem:[%s1534_s27 + $0x28] sm:$0xff]  ;;  %v314_v30 = vld [vmem:[#allocation7 + $0x60] sm:$0xff]  ;;  %v1565_v32 = vld [vmem:[%s1534_s27 + $0x30] sm:$0xff]  ;;  %p1159_p6 = pnand %p1158_p1, %p1740_p13  ;;  %s1161_s30 = sshll.u32 %s1247_s8, 4  ;;  %s1162_s30 = int_to_ptr.vmem [resolvable:$false] %s1161_s30 }
  0x9b   : > { %886 = vmatpush3.bf16.msra.mxu0 %v883_v6  ;;  %920 = vmatpush3.bf16.msra.mxu1 %v883_v6  ;;  %v315_v31 = vld [vmem:[#allocation7 + $0x68] sm:$0xff]  ;;  %v316_v35 = vld [vmem:[#allocation7 + $0x70] sm:$0xff]  ;;  %v317_v36 = vld [vmem:[#allocation7 + $0x78] sm:$0xff]  ;;  %s1163_s11 = scalar_lea.vmem %s1162_s30, 2048  ;;  %p1164_p4 = scmp.lt.s32.totalorder %s1663_s9, %s1162_s30 }
  0x9c   : > { %888 = vmatprep.subr.bf16.mxu0 %v887_v9  ;;  %913 = vmatprep.subr.bf16.mxu1 %v887_v9  ;;  %v1568_v33 = vld [vmem:[%s1503_s12 + $0x8] sm:$0xff]  ;;  %v903_v34 = vpack.c.bf16 %v315_v31, %v314_v30  ;;  %v1574_v37 = vld [vmem:[%s1503_s12] sm:$0xff]  ;;  %v1577_v38 = vld [vmem:[%s1503_s12 + $0x18] sm:$0xff]  ;;  %v907_v39 = vpack.c.bf16 %v317_v36, %v316_v35  ;;  %p1160_p10 = pneg %p1159_p6  ;;  %p1165_p5 = scmp.lt.s32.totalorder %s1163_s11, %s1157_s2 }
  0x9d   : > { %450 = vperm.xlu1 %1008, %v1544_v18   ;;  %v1584_v40 = vld [vmem:[%s1503_s12 + $0x10] sm:$0xff]  ;;  %v1587_v41 = vld [vmem:[%s1503_s12 + $0x28] sm:$0xff]  ;;  %v810_v43 = vld [vmem:[%s1511_s6 + $0x18] sm:$0xff]  }
  0x9e   : > { %440 = vperm.xlu0 %1007, %v1549_v22   ;;  %v808_v42 = vld [vmem:[%s1511_s6 + $0x8] sm:$0xff]   ;;  %v806_v47 = vunpack.c.l.bf16 %v810_v43  ;;  %v1598_v48 = vld [vmem:[%s1503_s12 + $0x20] sm:$0xff]  ;;  %v1601_v49 = vld [vmem:[%s1503_s12 + $0x38] sm:$0xff]  ;;  %v807_v51 = vunpack.c.h.bf16 %v810_v43  ;;  %p1166_p3 = por %p1165_p5, %p1164_p4 }
  0x9f   : > { %890 = vmatpush3.bf16.msra.mxu0 %v887_v9  ;;  %921 = vmatpush3.bf16.msra.mxu1 %v887_v9  ;;  %v798_v46 = vunpack.c.l.bf16 %v808_v42  ;;  %v799_v50 = vunpack.c.h.bf16 %v808_v42  ;;  %v1608_v52 = vld [vmem:[%s1503_s12 + $0x30] sm:$0xff]  ;;  %v783_v1 = vld [vmem:[#allocation8] ss:$0 sm:$0xff] }
  0xa0   : > { %892 = vmatprep.subr.bf16.mxu0 %v891_v19  ;;  %914 = vmatprep.subr.bf16.mxu1 %v891_v19  ;;  %p1167_p7 = pnand %p1166_p3, %p1160_p10 }
  0xa1   : > { %460 = vperm.xlu1 %1008, %v1552_v23  }
  0xa2   : > { %455 = vperm.xlu0 %1007, %v1557_v27  }
  0xa3   : > { %894 = vmatpush3.bf16.msra.mxu0 %v891_v19  ;;  %922 = vmatpush3.bf16.msra.mxu1 %v891_v19 }
  0xa4   : > { %896 = vmatprep.subr.bf16.mxu0 %v895_v24  ;;  %915 = vmatprep.subr.bf16.mxu1 %v895_v24 }
  0xa5   : > { %470 = vperm.xlu1 %1008, %v1560_v28  }
  0xa6   : > { %465 = vperm.xlu0 %1007, %v1565_v32  }
  0xa7   : > { %898 = vmatpush3.bf16.msra.mxu0 %v895_v24  ;;  %923 = vmatpush3.bf16.msra.mxu1 %v895_v24 }
  0xa8   : > { %900 = vmatprep.subr.bf16.mxu0 %v899_v29  ;;  %916 = vmatprep.subr.bf16.mxu1 %v899_v29 }
  0xa9   : > { %514 = vrot.lane.b32.xlu1 %v1568_v33, %s1246_s24 }
  0xaa   : > { %512 = vrot.lane.b32.xlu0 %v1574_v37, %s1246_s24 }
  0xab   : > { %902 = vmatpush3.bf16.msra.mxu0 %v899_v29  ;;  %924 = vmatpush3.bf16.msra.mxu1 %v899_v29 }
  0xac   : > { %904 = vmatprep.subr.bf16.mxu0 %v903_v34  ;;  %917 = vmatprep.subr.bf16.mxu1 %v903_v34 }
  0xad   : > { %518 = vrot.lane.b32.xlu1 %v1577_v38, %s1246_s24 }
  0xae   : > { %516 = vrot.lane.b32.xlu0 %v1584_v40, %s1246_s24 }
  0xaf   : > { %906 = vmatpush3.bf16.msra.mxu0 %v903_v34  ;;  %925 = vmatpush3.bf16.msra.mxu1 %v903_v34 }
  0xb0   : > { %908 = vmatprep.subr.bf16.mxu0 %v907_v39  ;;  %918 = vmatprep.subr.bf16.mxu1 %v907_v39 }
  0xb1   : > { %522 = vrot.lane.b32.xlu1 %v1587_v41, %s1246_s24 }
  0xb2   : > { %520 = vrot.lane.b32.xlu0 %v1598_v48, %s1246_s24 }
  0xb3   : > { %910 = vmatpush3.bf16.msra.mxu0 %v907_v39  ;;  %926 = vmatpush3.bf16.msra.mxu1 %v907_v39 }
  0xb5   : > { %526 = vrot.lane.b32.xlu1 %v1601_v49, %s1246_s24 }
  0xb6   : > { %868 = vmatmul.mubr.f32.vlgmr.msra.gmra.mrb[0].mxu0 %v795_v44  ;;  %874 = vmatmul.mubr.f32.vlgmr.msra.gmra.mrb[0].mxu1 %v803_v45 }
  0xb7   : > { %870 = vmatprep.mubr.f32.mxu0 %v798_v46  ;;  %876 = vmatprep.mubr.f32.mxu1 %v806_v47 }
  0xb8   : > { %524 = vrot.lane.b32.xlu0 %v1608_v52, %s1246_s24 }
  0xba   : > { %871 = vmatmul.mubr.f32.gmra.mrb[2].mxu0 %v799_v50  ;;  %877 = vmatmul.mubr.f32.gmra.mrb[2].mxu1 %v807_v51 }
 0x118   : > { %v446_v53 = vpop.permute.xlu1 %445 }
 0x119   : > { %v436_v54 = vpop.permute.xlu0 %435 }
 0x11c   : > { %v451_v55 = vpop.permute.xlu1 %450 }
 0x11d   : > { %v441_v56 = vpop.permute.xlu0 %440 }
 0x120   : > { %v461_v57 = vpop.permute.xlu1 %460 }
 0x121   : > { %v456_v58 = vpop.permute.xlu0 %455 }
 0x124   : > { %v471_v19 = vpop.permute.xlu1 %470 }
 0x189   : > { %v869_v59 = vpop.f32.mrb[0].mxu0  ;;  %v875_v60 = vpop.f32.mrb[0].mxu1 }
 0x18a   : > { %v400_v61 = vadd.f32 %v869_v59, %v1549_v22  ;;  %v420_v62 = vadd.f32 %v875_v60, %v1552_v23  ;;  %v394_v63 = vpop.f32.mrb[1].mxu0  ;;  %v414_v0 = vpop.f32.mrb[1].mxu1 }
 0x18b   : > { %v395_v2 = vadd.f32 %v394_v63, %v1541_v17  ;;  %v415_v3 = vadd.f32 %v414_v0, %v1557_v27  ;;  %v466_v23 = vpop.permute.xlu0 %465 }
 0x18c   : > { %v474_v4 = vmul.f32 %v441_v56, %v400_v61  ;;  %v478_v5 = vmul.f32 %v461_v57, %v420_v62 }
 0x18d   : > { %v473_v6 = vmul.f32 %v436_v54, %v395_v2  ;;  %v477_v7 = vmul.f32 %v456_v58, %v415_v3  ;;  %v872_v8 = vpop.f32.mrb[2].mxu0  ;;  %v878_v9 = vpop.f32.mrb[2].mxu1 }
 0x18e   : > { %v489_v10 = vadd.f32 %v783_v1, %v474_v4  ;;  %v493_v11 = vadd.f32 %v783_v1, %v478_v5  ;;  %v410_v12 = vadd.f32 %v872_v8, %v1544_v18  ;;  %v430_v13 = vadd.f32 %v878_v9, %v1560_v28  ;;  %v404_v14 = vpop.f32.mrb[3].mxu0  ;;  %v424_v15 = vpop.f32.mrb[3].mxu1 }
 0x18f   : > { %v488_v20 = vadd.f32 %v783_v1, %v473_v6  ;;  %v492_v21 = vadd.f32 %v783_v1, %v477_v7  ;;  %v405_v17 = vadd.f32 %v404_v14, %v1537_v16  ;;  %v425_v22 = vadd.f32 %v424_v15, %v1565_v32  ;;  %v515_v54 = vpop.permute.xlu1 %514 }
 0x190   : > { %v545_v24 = vsub.f32 0.0, %v489_v10  ;;  %v549_v25 = vsub.f32 0.0, %v493_v11  ;;  %v476_v26 = vmul.f32 %v451_v55, %v410_v12  ;;  %v480_v27 = vmul.f32 %v471_v19, %v430_v13  ;;  %v513_v55 = vpop.permute.xlu0 %512 }
 0x191   : > { %v544_v29 = vsub.f32 0.0, %v488_v20  ;;  %v548_v30 = vsub.f32 0.0, %v492_v21  ;;  %v475_v31 = vmul.f32 %v446_v53, %v405_v17  ;;  %v479_v18 = vmul.f32 %v466_v23, %v425_v22 }
 0x192   : > { %v554_v34 = vmul.f32 1.442695, %v545_v24  ;;  %v562_v28 = vmul.f32 1.442695, %v549_v25  ;;  %v491_v35 = vadd.f32 %v783_v1, %v476_v26  ;;  %v495_v36 = vadd.f32 %v783_v1, %v480_v27 }
 0x193   : > { %v552_v39 = vmul.f32 1.442695, %v544_v29  ;;  %v560_v42 = vmul.f32 1.442695, %v548_v30  ;;  %v490_v43 = vadd.f32 %v783_v1, %v475_v31  ;;  %v494_v44 = vadd.f32 %v783_v1, %v479_v18  ;;  %v1620_v57 = vpop.permute.xlu1 %518 }
 0x194   : > { %1009 = vpow2.f32 %v554_v34  ;;  %v547_v16 = vsub.f32 0.0, %v491_v35  ;;  %v551_v32 = vsub.f32 0.0, %v495_v36  ;;  %v1622_v62 = vpop.permute.xlu0 %516  ;;  %v537_v13 = vsub.f32 %v1568_v33, %v515_v54 }
 0x195   : > { %1011 = vpow2.f32 %v562_v28  ;;  %v546_v45 = vsub.f32 0.0, %v490_v43  ;;  %v550_v46 = vsub.f32 0.0, %v494_v44  ;;  %v536_v17 = vsub.f32 %v1574_v37, %v513_v55 }
 0x196   : > { %1013 = vpow2.f32 %v552_v39  ;;  %v558_v47 = vmul.f32 1.442695, %v547_v16  ;;  %v566_v50 = vmul.f32 1.442695, %v551_v32  ;;  %v539_v24 = vsub.f32 %v1577_v38, %v1620_v57 }
 0x197   : > { %1015 = vpow2.f32 %v560_v42  ;;  %v556_v51 = vmul.f32 1.442695, %v546_v45  ;;  %v564_v53 = vmul.f32 1.442695, %v550_v46  ;;  %v523_v7 = vpop.permute.xlu1 %522 }
 0x198   : > { %1017 = vpow2.f32 %v558_v47  ;;  %v521_v11 = vpop.permute.xlu0 %520  ;;  %v541_v12 = vsub.f32 %v1587_v41, %v523_v7 }
 0x199   : > { %1019 = vpow2.f32 %v566_v50  ;;  %v540_v19 = vsub.f32 %v1598_v48, %v521_v11  ;;  %v538_v48 = vsub.f32 %v1584_v40, %v1622_v62 }
 0x19a   : > { %1021 = vpow2.f32 %v556_v51 }
 0x19b   : > { %1023 = vpow2.f32 %v564_v53  ;;  %v527_v14 = vpop.permute.xlu1 %526 }
 0x19c   : > { %v525_v22 = vpop.permute.xlu0 %524  ;;  %v543_v41 = vsub.f32 %v1601_v49, %v527_v14 }
 0x19d   : > { %v542_v34 = vsub.f32 %v1608_v52, %v525_v22 }
 0x19e   : > { %v1010_v56 = vpop.eup %1009 }
 0x19f   : > { %v1012_v58 = vpop.eup %1011  ;;  %v569_v59 = vadd.f32 1.0, %v1010_v56 }
 0x1a0   : > { %v1014_v60 = vpop.eup %1013  ;;  %v573_v61 = vadd.f32 1.0, %v1012_v58 }
 0x1a1   : > { %v1016_v63 = vpop.eup %1015  ;;  %1025 = vrcp.f32 %v569_v59  ;;  %v568_v0 = vadd.f32 1.0, %v1014_v60 }
 0x1a2   : > { %v1018_v1 = vpop.eup %1017  ;;  %1027 = vrcp.f32 %v573_v61  ;;  %v572_v2 = vadd.f32 1.0, %v1016_v63 }
 0x1a3   : > { %v1020_v3 = vpop.eup %1019  ;;  %1029 = vrcp.f32 %v568_v0  ;;  %v571_v4 = vadd.f32 1.0, %v1018_v1 }
 0x1a4   : > { %v1022_v5 = vpop.eup %1021  ;;  %1031 = vrcp.f32 %v572_v2  ;;  %v575_v6 = vadd.f32 1.0, %v1020_v3 }
 0x1a5   : > { %v1024_v8 = vpop.eup %1023  ;;  %1033 = vrcp.f32 %v571_v4  ;;  %v570_v9 = vadd.f32 1.0, %v1022_v5 }
 0x1a6   : > { %1035 = vrcp.f32 %v575_v6  ;;  %v574_v10 = vadd.f32 1.0, %v1024_v8 }
 0x1a7   : > { %1037 = vrcp.f32 %v570_v9 }
 0x1a8   : > { %1039 = vrcp.f32 %v574_v10 }
 0x1ab   : > { %v1026_v15 = vpop.eup %1025 }
 0x1ac   : > { %v1028_v20 = vpop.eup %1027  ;;  %v593_v21 = vmul.f32 %v1026_v15, %v537_v13  ;;  %v609_v27 = vmul.f32 30.0, %v1026_v15 }
 0x1ad   : > { %v1030_v23 = vpop.eup %1029  ;;  %v597_v25 = vmul.f32 %v1028_v20, %v541_v12  ;;  %v613_v37 = vmul.f32 30.0, %v1028_v20 }
 0x1ae   : > { %v1032_v26 = vpop.eup %1031  ;;  %v601_v33 = vadd.f32 %v593_v21, %v515_v54  ;;  %v592_v29 = vmul.f32 %v1030_v23, %v536_v17  ;;  %v608_v49 = vmul.f32 30.0, %v1030_v23 }
 0x1af   : > { %v1034_v30 = vpop.eup %1033  ;;  %v605_v31 = vadd.f32 %v597_v25, %v523_v7  ;;  %v596_v18 = vmul.f32 %v1032_v26, %v540_v19  ;;  %v612_v42 = vmul.f32 30.0, %v1032_v26 }
 0x1b0   : > { %v1036_v28 = vpop.eup %1035  ;;  %v618_v38 = vsel %vm616_vm0, %v601_v33, %v609_v27  ;;  %v600_v35 = vadd.f32 %v592_v29, %v513_v55  ;;  %v595_v36 = vmul.f32 %v1034_v30, %v539_v24  ;;  %v611_v45 = vmul.f32 30.0, %v1034_v30 }
 0x1b1   : > { %v1038_v39 = vpop.eup %1037  ;;  %627 = vst.msk [vmem:[%s1637_s5 + $0x8] sm:$0xff] %vm625_vm1, %v618_v38  ;;  %v622_v40 = vsel %vm616_vm0, %v605_v31, %v613_v37  ;;  %v604_v52 = vadd.f32 %v596_v18, %v521_v11  ;;  %v599_v43 = vmul.f32 %v1036_v28, %v543_v41  ;;  %v615_v51 = vmul.f32 30.0, %v1036_v28 }
 0x1b2   : > { %v1040_v44 = vpop.eup %1039  ;;  %v617_v16 = vsel %vm616_vm0, %v600_v35, %v608_v49  ;;  %v603_v32 = vadd.f32 %v595_v36, %v1620_v57  ;;  %v594_v46 = vmul.f32 %v1038_v39, %v538_v48  ;;  %631 = vst.msk [vmem:[%s1637_s5 + $0x28] sm:$0xff] %vm625_vm1, %v622_v40  ;;  %v610_v56 = vmul.f32 30.0, %v1038_v39 }
 0x1b3   : > { %626 = vst.msk [vmem:[%s1637_s5] sm:$0xff] %vm625_vm1, %v617_v16  ;;  %v621_v47 = vsel %vm616_vm0, %v604_v52, %v612_v42  ;;  %v607_v50 = vadd.f32 %v599_v43, %v527_v14  ;;  %v598_v53 = vmul.f32 %v1040_v44, %v542_v34  ;;  %v614_v59 = vmul.f32 30.0, %v1040_v44 }
 0x1b4   : > { %v620_v54 = vsel %vm616_vm0, %v603_v32, %v611_v45  ;;  %v602_v55 = vadd.f32 %v594_v46, %v1622_v62  ;;  %630 = vst.msk [vmem:[%s1637_s5 + $0x20] sm:$0xff] %vm625_vm1, %v621_v47 }
 0x1b5   : > { %629 = vst.msk [vmem:[%s1637_s5 + $0x18] sm:$0xff] %vm625_vm1, %v620_v54  ;;  %v624_v57 = vsel %vm616_vm0, %v607_v50, %v615_v51  ;;  %v606_v58 = vadd.f32 %v598_v53, %v525_v22 }
 0x1b6   : > { %v619_v60 = vsel %vm616_vm0, %v602_v55, %v610_v56  ;;  %633 = vst.msk [vmem:[%s1637_s5 + $0x38] sm:$0xff] %vm625_vm1, %v624_v57 }
 0x1b7   : > { %628 = vst.msk [vmem:[%s1637_s5 + $0x10] sm:$0xff] %vm625_vm1, %v619_v60  ;;  %v623_v61 = vsel %vm616_vm0, %v606_v58, %v614_v59 }
 0x1b8   : > { %632 = vst.msk [vmem:[%s1637_s5 + $0x30] sm:$0xff] %vm625_vm1, %v623_v61 }
 0x1b9   : > { %1170 = shalt.err (!%p1167_p7)
}
 0x1ba   : > { %s1171_s12 = scalar_lea.hbm %s1661_s13, 1024  ;;  %s1175_s7 = scalar_lea.hbm %s1719_s4, 2048 }
 0x1bb   : > { %p1172_p9 = scmp.ne.s32.totalorder %s1661_s13, %s1171_s12  ;;  %p1176_p11 = scmp.lt.u32.totalorder %s1661_s13, %s1719_s4 }
 0x1bc   : > { %p1177_p2 = scmp.lt.u32.totalorder %s1175_s7, %s1171_s12  ;;  %p1179_p1 = scmp.lt.u32.totalorder %s1171_s12, %s1661_s13 }
 0x1bd   : > { %p1173_p0 = pnand %p1172_p9, %p1740_p13 }
 0x1be   : > { %p1178_p12 = por %p1177_p2, %p1176_p11 }
 0x1bf   : > { %p1174_p8 = pneg %p1173_p0 }
 0x1c0   : > { %p1180_p6 = por %p1179_p1, %p1178_p12 }
 0x1c2   : > { %p1181_p10 = pnand %p1180_p6, %p1174_p8 }
 0x1c4   : > { %1184 = shalt.err (!%p1181_p10)
}
 0x1c5   : > { %s1248_s27 = smov 128   ;;  %s1249_s24 = smov 8  }
 0x1c6   : > { %939 = dma.vmem_to_hbm [thread:$0]  (%p1740_p13), %s1663_s9, 1024, %s1661_s13, %s635_s29, %s1248_s27, %s1248_s27, %s1249_s24  }
 0x1c7 PF: > { %s663_s5 = sand.u32 1, %s1223_s15   ;;  %p1741_p4 = scmp.ne.s32.totalorder %s1726_s22, 0 }
 0x1c8   : > { %p1742_p5 = scmp.ge.s32.totalorder %s1235_s18, 2  ;;  %s664_s25 = scalar_lea.sflag [#allocation4], %s663_s5 }
 0x1ca   : > { %p956_p3 = pnand %p1742_p5, %p1741_p4 }
 0x1cc   : > { %1218 = dma.done.wait (!%p956_p3), %s664_s25, 1024  }
 0x1cd   : > { %1220 = vsyncadd (!%p956_p3), %s664_s25, 4294966272  ;;  %p21_p7 = scmp.ge.s32.totalorder %s1389_s10, 4   ;;  %s1743_s15 = smov %s1227_s16 }
 0x1ce   : > { %s1744_s16 = smov %s1231_s17  ;;  %s1745_s17 = smov %s1405_s20 }
 0x1cf   : > { %s1746_s18 = smov %s1389_s10  ;;  %23 = sbr.rel (!%p21_p7) target bundleno = 11 (0xb), region = 103 }
 0x1d6   :  { %669 = vsyncpa [#allocation3], 1 }
 0x1d7   :  { %671 = vsyncpa [#allocation3 + $0x1], 1 }
 0x1d8   :  { %672 = vsyncpa [#allocation6], 1 }
 0x1d9   :  { %674 = vsyncpa [#allocation6 + $0x1], 1 }
 0x1da   :  { %675 = vsyncpa [#allocation9], 1 }
 0x1db   :  { %676 = vsyncpa [#allocation4], 1 }
 0x1dc   :  { %678 = vsyncpa [#allocation4 + $0x1], 1 }

// kernel: powergrid_gnn.2
= control target key start
LH: loop header
LB: loop body
LE: loop exit
PB: predicated region body
PF: predicated region fallthrough
CT: control target
= control target key end

     0   :  { %s8534_s0 = inlined_call_operand.hbm [shape: f32[128,2], index: 0, kind: input, shape index: {}]   ;;  %s8535_s1 = inlined_call_operand.hbm [shape: bf16[128,128], index: 1, kind: input, shape index: {}]   ;;  %s8536_s2 = inlined_call_operand.hbm [shape: bf16[2,128,128], index: 2, kind: input, shape index: {}]   ;;  %s8537_s3 = inlined_call_operand.hbm [shape: f32[128,96], index: 3, kind: input, shape index: {}]   ;;  %s8538_s4 = inlined_call_operand.hbm [shape: f32[96,2], index: 4, kind: input, shape index: {}]   ;;  %s8539_s5 = inlined_call_operand.hbm [shape: f32[1,96], index: 5, kind: input, shape index: {}]   ;;  %s8540_s6 = inlined_call_operand.hbm [shape: f32[3,16,2], index: 6, kind: input, shape index: {}]   ;;  %s8541_s7 = inlined_call_operand.hbm [shape: f32[3,16], index: 7, kind: input, shape index: {}]   ;;  %s8542_s8 = inlined_call_operand.hbm [shape: f32[3,16], index: 8, kind: input, shape index: {}]   ;;  %s8543_s9 = inlined_call_operand.hbm [shape: f32[2,16], index: 9, kind: input, shape index: {}]   ;;  %s8544_s10 = inlined_call_operand.hbm [shape: f32[128,4], index: 10, kind: output, shape index: {}]  }
   0x1   :  { %8636 = sst [smem:[#allocation71_spill]] %s8537_s3 }
   0x2   :  { %8637 = sst [smem:[#allocation72_spill]] %s8539_s5 }
   0x3   :  { %8638 = sst [smem:[#allocation73_spill]] %s8544_s10 }
   0x4   :  { %15 = vsyncpa [#allocation3], 0 }
   0x5   :  { %17 = vsyncpa [#allocation3 + $0x1], 0 }
   0x6   :  { %18 = vsyncpa [#allocation6], 0 }
   0x7   :  { %20 = vsyncpa [#allocation6 + $0x1], 0 }
   0x8   :  { %21 = vsyncpa [#allocation9], 0 }
   0x9   :  { %22 = vsyncpa [#allocation12], 0 }
   0xa   :  { %23 = vsyncpa [#allocation15], 0 }
   0xb   :  { %24 = vsyncpa [#allocation18], 0 }
   0xc   :  { %25 = vsyncpa [#allocation4], 0 }
   0xd   :  { %27 = vsyncpa [#allocation4 + $0x1], 0  ;;  %s6543_s13 = smov 0   ;;  %s6545_s14 = smov 0  }
   0xe   :  { %s6547_s15 = smov 0   ;;  %s6549_s16 = smov 0  }
   0xf LB: > { %8639 = sst [smem:[#allocation30_spill]] %s6443_s13  ;;  %s6564_s17 = sadd.s32 4294967295, %s6455_s16   ;;  %s6455_s16 = sphi %s6549_s16, %s8785_s16   ;;  %s6451_s15 = sphi %s6547_s15, %s8789_s15   ;;  %s6447_s14 = sphi %s6545_s14, %s8788_s14   ;;  %s6443_s13 = sphi %s6543_s13, %s8787_s13  }
  0x10   : > { %8640 = sst [smem:[#allocation31_spill]] %s6564_s17  ;;  %s4339_s18 = sadd.s32 4294967294, %s6455_s16  }
  0x11   : > { %s6568_s19 = sadd.s32 1, %s6455_s16   ;;  %s40_s20 = sadd.s32 1, %s6451_s15 }
  0x12   : > { %8641 = sst [smem:[#allocation32_spill]] %s6568_s19  ;;  %s37_s21 = ssub.s32 %s6455_s16, %s6568_s19 }
  0x13   : > { %p47_p0 = scmp.ne.s32.totalorder %s6451_s15, %s6447_s14  ;;  %p38_p1 = scmp.eq.s32.totalorder %s37_s21, 0 }
  0x14   : > { %p48_p2 = scmp.eq.s32.totalorder %s6455_s16, 0  ;;  %p53_p3 = scmp.ne.s32.totalorder %s6447_s14, %s6443_s13 }
  0x15   : > { %p8548_p4 = scmp.eq.s32.totalorder %s6564_s17, 0  ;;  %p276_p7 = scmp.eq.s32.totalorder %s6564_s17, 1 }
  0x16   : > { %s6580_s22 = scalar_select %p38_p1, %s6451_s15, %s40_s20  }
  0x17   : > { %p6582_p5 = por %p48_p2, %p47_p0  ;;  %p6588_p6 = por %p8548_p4, %p53_p3 }
  0x18   : > { %8642 = sst [smem:[#allocation33_spill]] %s6580_s22  ;;  %p282_p8 = scmp.eq.s32.totalorder %s4339_s18, 1 }
  0x19   : > { %s8643_s23 = scalar_select %p6582_p5, 1, 0 }
  0x1a   : > { %s8644_s24 = scalar_select %p6588_p6, 1, 0 }
  0x1b   : > { %p4340_p9 = scmp.ge.s32.totalorder %s6455_s16, 1  ;;  %p289_p10 = scmp.lt.s32.totalorder %s6455_s16, 3 }
  0x1c   : > { %p6595_p11 = por %p276_p7, %p47_p0  ;;  %p6599_p12 = por %p282_p8, %p53_p3 }
  0x1d   : > { %p6603_p13 = pnand %p4340_p9, %p289_p10  ;;  %s6457_s28 = smov [#allocation8]  }
  0x1e   : > { %s8645_s25 = scalar_select %p6595_p11, 1, 0 }
  0x1f   : > { %s8647_s26 = scalar_select %p6599_p12, 1, 0 }
  0x20   : > { %8646 = sst [smem:[#allocation34_spill]] %s8645_s25  ;;  %p5605_p1 = pneg %p6603_p13 }
  0x21   : > { %8648 = sst [smem:[#allocation35_spill]] %s8647_s26  ;;  %s301_s29 = sshll.u32 %s6457_s28, 4  ;;  %s302_s29 = int_to_ptr.vmem [resolvable:$true] %s301_s29 }
  0x22   : > { %s8649_s27 = scalar_select %p6603_p13, 1, 0 }
  0x23   : > { %p6611_p2 = pnand %p5605_p1, %p8548_p4  ;;  %s6458_s11 = smov [#allocation11]  }
  0x24   : > { %s328_s12 = sshll.u32 %s6458_s11, 4  ;;  %s8651_s3 = sld [smem:[#allocation71_spill]]  ;;  %s6615_s12 = int_to_ptr.vmem [resolvable:$true] %s328_s12 }
  0x25   : > { %p6625_p3 = pneg %p6611_p2 }
  0x2a   : > { %s6117_s21 = scalar_lea.hbm %s8651_s3, 2048 }
  0x2b   : > { %p6118_p0 = scmp.ne.s32.totalorder %s8651_s3, %s6117_s21  ;;  %p6124_p9 = scmp.lt.u32.totalorder %s6117_s21, %s8651_s3 }
  0x2d   : > { %p6120_p7 = pnand %p6625_p3, %p6118_p0 }
  0x2f   : > { %p6121_p8 = pneg %p6120_p7 }
  0x31   : > { %p6126_p10 = pnand %p6124_p9, %p6121_p8 }
  0x33   : > { %6129 = shalt.err (!%p6126_p10)
}
  0x34   : > { %s6130_s18 = scalar_lea.vmem %s302_s29, 2048  ;;  %p6138_p11 = scmp.lt.s32.totalorder %s302_s29, %s302_s29 }
  0x35   : > { %p6131_p1 = scmp.ne.s32.totalorder %s302_s29, %s6130_s18  ;;  %p6139_p6 = scmp.lt.s32.totalorder %s6130_s18, %s6130_s18 }
  0x37   : > { %p6133_p4 = pnand %p6131_p1, %p6625_p3  ;;  %p6140_p13 = por %p6139_p6, %p6138_p11 }
  0x39   : > { %p6134_p12 = pneg %p6133_p4 }
  0x3b   : > { %p6141_p5 = pnand %p6140_p13, %p6134_p12 }
  0x3d   : > { %6144 = shalt.err (!%p6141_p5)
}
  0x3e   : > { %s8559_s19 = smov 128   ;;  %s8561_s22 = smov 8  }
  0x3f   : > { %5608 = dma.hbm_to_vmem [thread:$0]  (!%p6611_p2), %s8651_s3, 2048, %s302_s29, [#allocation9], %s8559_s19, %s8559_s19, %s8561_s22  }
  0x40   : > { %s8653_s5 = sld [smem:[#allocation72_spill]] }
  0x46   : > { %s6145_s13 = scalar_lea.hbm %s8653_s5, 16 }
  0x47   : > { %p6146_p4 = scmp.ne.s32.totalorder %s8653_s5, %s6145_s13  ;;  %p6152_p11 = scmp.lt.u32.totalorder %s6145_s13, %s8653_s5 }
  0x49   : > { %p6148_p5 = pnand %p6146_p4, %p6625_p3 }
  0x4b   : > { %p6149_p6 = pneg %p6148_p5 }
  0x4d   : > { %p6154_p12 = pnand %p6152_p11, %p6149_p6 }
  0x4f   : > { %6157 = shalt.err (!%p6154_p12)
}
  0x50   : > { %s6158_s29 = scalar_lea.vmem %s6615_s12, 16  ;;  %s6165_s10 = scalar_lea.vmem %s6615_s12, 32 }
  0x51   : > { %p6159_p13 = scmp.ne.s32.totalorder %s6615_s12, %s6158_s29  ;;  %p6166_p8 = scmp.lt.s32.totalorder %s6615_s12, %s6615_s12 }
  0x52   : > { %p6167_p9 = scmp.lt.s32.totalorder %s6165_s10, %s6158_s29 }
  0x53   : > { %p6161_p0 = pnand %p6159_p13, %p6625_p3 }
  0x54   : > { %p6168_p10 = por %p6167_p9, %p6166_p8 }
  0x55   : > { %p6162_p7 = pneg %p6161_p0 }
  0x57   : > { %p6169_p1 = pnand %p6168_p10, %p6162_p7 }
  0x59   : > { %6172 = shalt.err (!%p6169_p1)
}
  0x5a   : > { %5614 = dma.hbm_to_vmem [thread:$0]  (!%p6611_p2), %s8653_s5, 16, %s6615_s12, [#allocation12]  }
  0x5b   : > { %s6461_s25 = smov [#allocation14]   ;;  %s6462_s20 = smov [#allocation10]  }
  0x5c   : > { %s352_s26 = sshll.u32 %s6461_s25, 4  ;;  %s314_s21 = sshll.u32 %s6462_s20, 4  ;;  %s353_s26 = int_to_ptr.vmem [resolvable:$true] %s352_s26  ;;  %s315_s21 = int_to_ptr.vmem [resolvable:$true] %s314_s21 }
  0x5d   : > { %s6173_s29 = scalar_lea.hbm %s8541_s7, 64 }
  0x5e   : > { %p6174_p4 = scmp.ne.s32.totalorder %s8541_s7, %s6173_s29  ;;  %p6180_p11 = scmp.lt.u32.totalorder %s6173_s29, %s8541_s7 }
  0x60   : > { %p6176_p5 = pnand %p6174_p4, %p6625_p3 }
  0x62   : > { %p6177_p6 = pneg %p6176_p5 }
  0x64   : > { %p6182_p12 = pnand %p6180_p11, %p6177_p6 }
  0x66   : > { %6185 = shalt.err (!%p6182_p12)
}
  0x67   : > { %s6186_s12 = scalar_lea.vmem %s353_s26, 64  ;;  %p6194_p8 = scmp.lt.s32.totalorder %s353_s26, %s353_s26 }
  0x68   : > { %p6187_p13 = scmp.ne.s32.totalorder %s353_s26, %s6186_s12  ;;  %p6195_p9 = scmp.lt.s32.totalorder %s6186_s12, %s6186_s12 }
  0x6a   : > { %p6189_p0 = pnand %p6187_p13, %p6625_p3  ;;  %p6196_p10 = por %p6195_p9, %p6194_p8 }
  0x6c   : > { %p6190_p7 = pneg %p6189_p0 }
  0x6e   : > { %p6197_p1 = pnand %p6196_p10, %p6190_p7 }
  0x70   : > { %6200 = shalt.err (!%p6197_p1)
}
  0x71   : > { %5620 = dma.hbm_to_vmem [thread:$0]  (!%p6611_p2), %s8541_s7, 64, %s353_s26, [#allocation15]  }
  0x72   : > { %s6201_s20 = scalar_lea.hbm %s8538_s4, 1536 }
  0x73   : > { %p6202_p4 = scmp.ne.s32.totalorder %s8538_s4, %s6201_s20  ;;  %p6208_p11 = scmp.lt.u32.totalorder %s6201_s20, %s8538_s4 }
  0x75   : > { %p6204_p5 = pnand %p6202_p4, %p6625_p3 }
  0x77   : > { %p6205_p6 = pneg %p6204_p5 }
  0x79   : > { %p6210_p12 = pnand %p6208_p11, %p6205_p6 }
  0x7b   : > { %6213 = shalt.err (!%p6210_p12)
}
  0x7c   : > { %s6214_s13 = scalar_lea.vmem %s315_s21, 1536  ;;  %p6222_p8 = scmp.lt.s32.totalorder %s315_s21, %s315_s21 }
  0x7d   : > { %p6215_p13 = scmp.ne.s32.totalorder %s315_s21, %s6214_s13  ;;  %p6223_p9 = scmp.lt.s32.totalorder %s6214_s13, %s6214_s13 }
  0x7f   : > { %p6217_p0 = pnand %p6215_p13, %p6625_p3  ;;  %p6224_p10 = por %p6223_p9, %p6222_p8 }
  0x81   : > { %p6218_p7 = pneg %p6217_p0 }
  0x83   : > { %p6225_p1 = pnand %p6224_p10, %p6218_p7 }
  0x85   : > { %6228 = shalt.err (!%p6225_p1)
}
  0x86   : > { %s8654_s26 = smov 8   ;;  %s8655_s12 = smov 128  }
  0x87   : > { %5611 = dma.hbm_to_vmem [thread:$0]  (!%p6611_p2), %s8538_s4, 1536, %s315_s21, [#allocation9], %s8655_s12, %s8655_s12, %s8654_s26  }
  0x88   : > { %s6463_s22 = smov [#allocation13]   ;;  %s6464_s20 = smov [#allocation16]  }
  0x89   : > { %s338_s25 = sshll.u32 %s6463_s22, 4  ;;  %s363_s11 = sshll.u32 %s6464_s20, 4  ;;  %s339_s25 = int_to_ptr.vmem [resolvable:$true] %s338_s25  ;;  %s364_s11 = int_to_ptr.vmem [resolvable:$true] %s363_s11 }
  0x8a   : > { %s6229_s10 = scalar_lea.hbm %s8540_s6, 768 }
  0x8b   : > { %p6230_p4 = scmp.ne.s32.totalorder %s8540_s6, %s6229_s10  ;;  %p6236_p11 = scmp.lt.u32.totalorder %s6229_s10, %s8540_s6 }
  0x8d   : > { %p6232_p5 = pnand %p6230_p4, %p6625_p3 }
  0x8f   : > { %p6233_p6 = pneg %p6232_p5 }
  0x91   : > { %p6238_p12 = pnand %p6236_p11, %p6233_p6 }
  0x93   : > { %6241 = shalt.err (!%p6238_p12)
}
  0x94   : > { %s6242_s21 = scalar_lea.vmem %s339_s25, 768  ;;  %p6250_p8 = scmp.lt.s32.totalorder %s339_s25, %s339_s25 }
  0x95   : > { %p6243_p13 = scmp.ne.s32.totalorder %s339_s25, %s6242_s21  ;;  %p6251_p9 = scmp.lt.s32.totalorder %s6242_s21, %s6242_s21 }
  0x97   : > { %p6245_p0 = pnand %p6243_p13, %p6625_p3  ;;  %p6252_p10 = por %p6251_p9, %p6250_p8 }
  0x99   : > { %p6246_p7 = pneg %p6245_p0 }
  0x9b   : > { %p6253_p1 = pnand %p6252_p10, %p6246_p7 }
  0x9d   : > { %6256 = shalt.err (!%p6253_p1)
}
  0x9e   : > { %5617 = dma.hbm_to_vmem [thread:$0]  (!%p6611_p2), %s8540_s6, 768, %s339_s25, [#allocation12], %s8655_s12, %s8655_s12, %s8654_s26  }
  0x9f   : > { %s6257_s20 = scalar_lea.hbm %s8542_s8, 64 }
  0xa0   : > { %p6258_p4 = scmp.ne.s32.totalorder %s8542_s8, %s6257_s20  ;;  %p6264_p11 = scmp.lt.u32.totalorder %s6257_s20, %s8542_s8 }
  0xa2   : > { %p6260_p5 = pnand %p6258_p4, %p6625_p3 }
  0xa4   : > { %p6261_p6 = pneg %p6260_p5 }
  0xa6   : > { %p6266_p12 = pnand %p6264_p11, %p6261_p6 }
  0xa8   : > { %6269 = shalt.err (!%p6266_p12)
}
  0xa9   : > { %s6270_s19 = scalar_lea.vmem %s364_s11, 64  ;;  %p6278_p8 = scmp.lt.s32.totalorder %s364_s11, %s364_s11 }
  0xaa   : > { %p6271_p13 = scmp.ne.s32.totalorder %s364_s11, %s6270_s19  ;;  %p6279_p9 = scmp.lt.s32.totalorder %s6270_s19, %s6270_s19 }
  0xac   : > { %p6273_p0 = pnand %p6271_p13, %p6625_p3  ;;  %p6280_p10 = por %p6279_p9, %p6278_p8 }
  0xae   : > { %p6274_p7 = pneg %p6273_p0 }
  0xb0   : > { %p6281_p1 = pnand %p6280_p10, %p6274_p7 }
  0xb2   : > { %6284 = shalt.err (!%p6281_p1)
}
  0xb3   : > { %5623 = dma.hbm_to_vmem [thread:$0]  (!%p6611_p2), %s8542_s8, 64, %s364_s11, [#allocation15]  }
  0xb4   : > { %s6465_s25 = smov [#allocation17]   ;;  %s6285_s17 = scalar_lea.hbm %s8543_s9, 32 }
  0xb5   : > { %s374_s21 = sshll.u32 %s6465_s25, 4  ;;  %p6286_p4 = scmp.ne.s32.totalorder %s8543_s9, %s6285_s17  ;;  %s375_s21 = int_to_ptr.vmem [resolvable:$true] %s374_s21 }
  0xb6   : > { %p6292_p11 = scmp.lt.u32.totalorder %s6285_s17, %s8543_s9 }
  0xb7   : > { %p6288_p5 = pnand %p6286_p4, %p6625_p3 }
  0xb9   : > { %p6289_p6 = pneg %p6288_p5 }
  0xbb   : > { %p6294_p12 = pnand %p6292_p11, %p6289_p6 }
  0xbd   : > { %6297 = shalt.err (!%p6294_p12)
}
  0xbe   : > { %s6298_s11 = scalar_lea.vmem %s375_s21, 32  ;;  %p6306_p8 = scmp.lt.s32.totalorder %s375_s21, %s375_s21 }
  0xbf   : > { %p6299_p13 = scmp.ne.s32.totalorder %s375_s21, %s6298_s11  ;;  %p6307_p9 = scmp.lt.s32.totalorder %s6298_s11, %s6298_s11 }
  0xc1   : > { %p6301_p0 = pnand %p6299_p13, %p6625_p3  ;;  %p6308_p10 = por %p6307_p9, %p6306_p8 }
  0xc3   : > { %p6302_p7 = pneg %p6301_p0 }
  0xc5   : > { %p6309_p1 = pnand %p6308_p10, %p6302_p7 }
  0xc7   : > { %6312 = shalt.err (!%p6309_p1)
}
  0xc8   : > { %5626 = dma.hbm_to_vmem [thread:$0]  (!%p6611_p2), %s8543_s9, 32, %s375_s21, [#allocation18]  }
  0xc9   : > { %p4348_p4 = scmp.ge.s32.totalorder %s6455_s16, 2 }
  0xca   : > { %s6768_s28 = sand.u32 (!%p4348_p4), 1, %s6451_s15   ;;  %s4549_s19 = sshll.u32 (!%p4348_p4), %s6455_s16, 10 }
  0xcb   : > { %381 = sbr.rel (%p4348_p4) target bundleno = 267 (0x10b), region = 44  ;;  %s4349_s26 = sshll.u32 (!%p4348_p4), %s6768_s28, 6 }
  0xcc   : > { %s6775_s25 = scalar_lea.hbm (!%p4348_p4), %s8534_s0, %s4549_s19  ;;  %s389_s21 = scalar_lea.vmem (!%p4348_p4), [#allocation2], %s4349_s26 }
  0xcd   : > { %s396_s3 = sshll.u32 (!%p4348_p4), %s389_s21, 4  ;;  %s386_s5 = scalar_lea.sflag (!%p4348_p4), [#allocation3], %s6768_s28  ;;  %s6779_s3 = int_to_ptr.vmem [resolvable:$true] %s396_s3 }
  0xce   : > { %s6313_s17 = scalar_lea.hbm (!%p4348_p4), %s6775_s25, 1024  ;;  %p8656_p3 = scmp.ne.s32.totalorder (!%p4348_p4), %s8643_s23, 0 }
  0xcf   : > { %p6314_p2 = scmp.ne.s32.totalorder (!%p4348_p4), %s6775_s25, %s6313_s17  ;;  %s6317_s18 = scalar_lea.hbm (!%p4348_p4), %s8534_s0, 2048 }
  0xd0   : > { %p6318_p11 = scmp.lt.u32.totalorder (!%p4348_p4), %s6775_s25, %s8534_s0  ;;  %p6319_p12 = scmp.lt.u32.totalorder (!%p4348_p4), %s6317_s18, %s6313_s17 }
  0xd1   : > { %p6315_p5 = pnand (!%p4348_p4), %p6314_p2, %p8656_p3  ;;  %p6321_p0 = scmp.lt.u32.totalorder (!%p4348_p4), %s6313_s17, %s6775_s25 }
  0xd2   : > { %p6320_p13 = por %p6319_p12, %p6318_p11 }
  0xd3   : > { %p6316_p6 = pneg %p6315_p5 }
  0xd4   : > { %p6322_p7 = por %p6321_p0, %p6320_p13 }
  0xd6   : > { %p6323_p8 = pnand %p6322_p7, %p6316_p6 }
  0xd8   : > { %6326 = shalt.err (!%p6323_p8)
}
  0xd9   : > { %s6327_s10 = scalar_lea.vmem %s6779_s3, 1024  ;;  %s6466_s13 = smov [#allocation2]  }
  0xda   : > { %p6328_p9 = scmp.ne.s32.totalorder %s6779_s3, %s6327_s10  ;;  %s6331_s19 = sshll.u32 %s6466_s13, 4  ;;  %s6332_s19 = int_to_ptr.vmem [resolvable:$false] %s6331_s19 }
  0xdb   : > { %s6333_s30 = scalar_lea.vmem %s6332_s19, 2048  ;;  %p6334_p2 = scmp.lt.s32.totalorder %s6779_s3, %s6332_s19 }
  0xdc   : > { %p6329_p10 = pnand %p6328_p9, %p8656_p3  ;;  %p6335_p5 = scmp.lt.s32.totalorder %s6333_s30, %s6327_s10 }
  0xde   : > { %p6330_p1 = pneg %p6329_p10  ;;  %p6336_p11 = por %p6335_p5, %p6334_p2 }
  0xe0   : > { %p6337_p12 = pnand %p6336_p11, %p6330_p1 }
  0xe2   : > { %6340 = shalt.err (!%p6337_p12)
}
  0xe3   : > { %s6467_s12 = smov 128   ;;  %s6468_s21 = smov 8  }
  0xe4   : > { %5576 = dma.hbm_to_vmem [thread:$0]  (%p8656_p3), %s6775_s25, 1024, %s6779_s3, %s386_s5, %s6467_s12, %s6467_s12, %s6468_s21  }
  0xe5   : > { %s406_s17 = sand.u32 1, %s6455_s16   ;;  %s4352_s22 = sshll.u32 %s6768_s28, 5 }
  0xe6   : > { %s4550_s20 = sshll.u32 %s6455_s16, 9  ;;  %s410_s18 = scalar_lea.vmem [#allocation5], %s4352_s22 }
  0xe7   : > { %s417_s29 = sshll.u32 %s410_s18, 4  ;;  %s6813_s13 = scalar_lea.hbm %s8535_s1, %s4550_s20  ;;  %s6815_s29 = int_to_ptr.vmem [resolvable:$true] %s417_s29 }
  0xe8   : > { %s6817_s19 = scalar_lea.sflag [#allocation6], %s406_s17  ;;  %s6341_s25 = scalar_lea.hbm %s6813_s13, 512 }
  0xe9   : > { %p6342_p6 = scmp.ne.s32.totalorder %s6813_s13, %s6341_s25  ;;  %s6345_s30 = scalar_lea.hbm %s8535_s1, 1024 }
  0xea   : > { %p6346_p7 = scmp.lt.u32.totalorder %s6813_s13, %s8535_s1  ;;  %p6347_p8 = scmp.lt.u32.totalorder %s6345_s30, %s6341_s25 }
  0xeb   : > { %p6343_p13 = pnand %p6342_p6, %p8656_p3  ;;  %p6349_p10 = scmp.lt.u32.totalorder %s6341_s25, %s6813_s13 }
  0xec   : > { %p6348_p9 = por %p6347_p8, %p6346_p7 }
  0xed   : > { %p6344_p0 = pneg %p6343_p13 }
  0xee   : > { %p6350_p1 = por %p6349_p10, %p6348_p9 }
  0xf0   : > { %p6351_p2 = pnand %p6350_p1, %p6344_p0 }
  0xf2   : > { %6354 = shalt.err (!%p6351_p2)
}
  0xf3   : > { %s6355_s17 = scalar_lea.vmem %s6815_s29, 512  ;;  %s6469_s22 = smov [#allocation5]  }
  0xf4   : > { %p6356_p5 = scmp.ne.s32.totalorder %s6815_s29, %s6355_s17  ;;  %s6359_s18 = sshll.u32 %s6469_s22, 4  ;;  %s6360_s18 = int_to_ptr.vmem [resolvable:$false] %s6359_s18 }
  0xf5   : > { %s6361_s11 = scalar_lea.vmem %s6360_s18, 1024  ;;  %p6362_p6 = scmp.lt.s32.totalorder %s6815_s29, %s6360_s18 }
  0xf6   : > { %p6357_p11 = pnand %p6356_p5, %p8656_p3  ;;  %p6363_p13 = scmp.lt.s32.totalorder %s6361_s11, %s6355_s17 }
  0xf8   : > { %p6358_p12 = pneg %p6357_p11  ;;  %p6364_p7 = por %p6363_p13, %p6362_p6 }
  0xfa   : > { %p6365_p8 = pnand %p6364_p7, %p6358_p12 }
  0xfc   : > { %6368 = shalt.err (!%p6365_p8)
}
  0xfd   : > { %s6470_s10 = smov 64   ;;  %s6471_s25 = smov 4  }
  0xfe   : > { %5577 = dma.hbm_to_vmem [thread:$0]  (%p8656_p3), %s6813_s13, 512, %s6815_s29, %s6817_s19, %s6470_s10, %s6470_s10, %s6471_s25  }
  0xff   : > { %s437_s30 = scalar_lea.hbm %s8536_s2, %s4550_s20  ;;  %s431_s21 = scalar_lea.vmem [#allocation7], %s4349_s26 }
 0x100   : > { %s5578_s12 = scalar_select %p8656_p3, [#allocation0], [#allocation22] }
 0x101   : > { %s450_s17 = sshll.u32 %s431_s21, 4  ;;  %s6472_s13 = smov 1024   ;;  %s451_s17 = int_to_ptr.vmem [resolvable:$true] %s450_s17 }
 0x102   : > { %s442_s29 = sld [smem:[%s5578_s12]]   ;;  %s6473_s22 = smov 512  }
 0x103   : > { %5579 = sst [smem:[#allocation21]] (%p8656_p3), %s6472_s13  ;;  %s6474_s18 = smov 8  }
 0x104   : > { %5580 = sst [smem:[#allocation21 + $0x1]] (%p8656_p3), %s6473_s22  ;;  %s6475_s20 = smov 64  }
 0x105   : > { %5581 = sst [smem:[#allocation21 + $0x2]] (%p8656_p3), %s6474_s18  ;;  %s6476_s26 = smov 4  }
 0x106   : > { %5582 = sst [smem:[#allocation21 + $0x3]] (%p8656_p3), %s6475_s20  ;;  %s6477_s10 = smov [#allocation20]  }
 0x107   : > { %5583 = sst [smem:[#allocation21 + $0x4]] (%p8656_p3), %s6475_s20 }
 0x108   : > { %s4358_s28 = sshll.u32 %s442_s29, 26  ;;  %5584 = sst [smem:[#allocation21 + $0x5]] (%p8656_p3), %s6476_s26 }
 0x109   : > { %s4359_s11 = sadd.s32 134217728, %s4358_s28 }
 0x10a   : > { %5585 = dma.general (%p8656_p3), %s437_s30, 1024, %s451_s17, %s6817_s19, %s6477_s10, [#allocation21], %s4359_s11, 0  }
 0x10b PF: > { %p8657_p0 = scmp.ne.s32.totalorder %s8649_s27, 0 }
 0x10d   : > { %475 = sbr.rel (%p8657_p0) target bundleno = 3577 (0xdf9), region = 60 }
 0x114   : > { %s6868_s25 = sand.u32 1, %s6447_s14   ;;  %p8658_p9 = scmp.ne.s32.totalorder %s8644_s24, 0 }
 0x115   : > { %s6871_s3 = sshll.u32 %s6868_s25, 6  ;;  %s478_s5 = scalar_lea.sflag [#allocation3], %s6868_s25 }
 0x116   : > { %s6875_s12 = scalar_lea.vmem [#allocation2], %s6871_s3 }
 0x117   : > { %6414 = dma.done.wait (%p8658_p9), %s478_s5, 1024  }
 0x118   : > { %6416 = vsyncadd (%p8658_p9), %s478_s5, 4294966272  ;;  %s8659_s23 = sld [smem:[#allocation31_spill]]  ;;  %s4362_s19 = sshll.u32 %s6868_s25, 5 }
 0x119   : > { %s6883_s21 = scalar_lea.vmem [#allocation5], %s4362_s19 }
 0x11e   : > { %s486_s27 = sand.u32 1, %s8659_s23  }
 0x11f   : > { %s487_s30 = scalar_lea.sflag [#allocation6], %s486_s27 }
 0x120   : > { %6418 = dma.done.wait (%p8658_p9), %s487_s30, 1536  }
 0x121   : > { %6420 = vsyncadd (%p8658_p9), %s487_s30, 4294965760  ;;  %s6890_s17 = scalar_lea.vmem [#allocation7], %s6871_s3  ;;  %p8660_p3 = scmp.eq.s32.totalorder %s8659_s23, 0 }
 0x123   : > { %6422 = dma.done.wait (%p8660_p3), [#allocation9], 3584   ;;  %p8661_p10 = pmov %p8660_p3 }
 0x124   : > { %p8662_p1 = pmov %p8660_p3 }
 0x125   : > { %6424 = vsyncadd (%p8661_p10), [#allocation9], 4294963712 }
 0x126   : > { %6426 = dma.done.wait (%p8662_p1), [#allocation12], 784   ;;  %p8663_p2 = pmov %p8662_p1 }
 0x127   : > { %p8664_p5 = pmov %p8662_p1 }
 0x128   : > { %6428 = vsyncadd (%p8663_p2), [#allocation12], 4294966512 }
 0x129   : > { %6430 = dma.done.wait (%p8664_p5), [#allocation15], 128   ;;  %p8665_p11 = pmov %p8662_p1 }
 0x12a   : > { %p8666_p12 = pmov %p8662_p1 }
 0x12b   : > { %6432 = vsyncadd (%p8665_p11), [#allocation15], 4294967168 }
 0x12c   : > { %6434 = dma.done.wait (%p8666_p12), [#allocation18], 32   ;;  %p8667_p6 = pmov %p8662_p1 }
 0x12d   : > { %vm672_vm0 = vcmask 15360   ;;  %v8668_v0 = vmov 0  ;;  %v653_v1 = vld [vmem:[#allocation10] sm:$0xff]  ;;  %v654_v2 = vld [vmem:[#allocation10 + $0x8] sm:$0xff]  ;;  %v655_v3 = vld [vmem:[#allocation10 + $0x10] sm:$0xff]  ;;  %s6478_s24 = smov 112  }
 0x12e   : > { %6436 = vsyncadd (%p8667_p6), [#allocation18], 4294967264  ;;  %v5254_v4 = vpack.c.bf16 %v654_v2, %v653_v1  ;;  %v656_v5 = vld [vmem:[#allocation10 + $0x18] sm:$0xff]  ;;  %v578_v7 = vld [vmem:[%s6875_s12] sm:$0xff]  ;;  %s6479_s29 = smov 96   ;;  %vm864_vm2 = vcmask 130048  }
 0x12f   : > { %vm6910_vm1 = vmpackc.low %vm672_vm0, %vm672_vm0  ;;  %v5260_v6 = vpack.c.bf16 %v656_v5, %v655_v3  ;;  %4868 = vmatprep.mubr.msk.f32.mxu0 %vm672_vm0, %v578_v7  ;;  %v657_v8 = vld [vmem:[#allocation10 + $0x20] sm:$0xff]  ;;  %v658_v9 = vld [vmem:[#allocation10 + $0x28] sm:$0xff]  ;;  %v8671_v55 = vmov 0  ;;  %s6482_s13 = smov 80   ;;  %s6483_s22 = smov 64   ;;  %vm1540_vm4 = vcmask 7168  }
 0x130   : > { %v8669_v0 = vsel %vm6910_vm1, 4294967295, %v8668_v0  ;;  %5256 = vmatprep.subr.msk.bf16.mxu0 %vm6910_vm1, %v5254_v4  ;;  %v6922_v10 = vld [vmem:[#allocation8 + $0x10] sm:$0xff]  ;;  %v6924_v11 = vld [vmem:[#allocation8 + $0x18] sm:$0xff]  ;;  %v6926_v12 = vld [vmem:[#allocation8 + $0x20] sm:$0xff]  ;;  %v5266_v16 = vpack.c.bf16 %v658_v9, %v657_v8  ;;  %v8567_v9 = vmov 0   ;;  %s6484_s18 = smov 48  }
 0x131   : > { %8670 = vst [vmem:[#allocation36_spill] sm:$0xff] %v8669_v0  ;;  %5259 = vmatpush3.bf16.xpose.msk.msra.mxu0 %vm6910_vm1, %v5254_v4  ;;  %v6928_v13 = vld [vmem:[#allocation8 + $0x28] sm:$0xff]  ;;  %v6932_v14 = vpack.i.bf16 %v6924_v11, %v6922_v10  ;;  %v6934_v15 = vld [vmem:[#allocation8] sm:$0xff]  ;;  %v6948_v20 = vld [vmem:[#allocation8 + $0x30] sm:$0xff]  ;;  %v5300_v3 = vpack.c.bf16 %v6924_v11, %v6922_v10  ;;  %5756 = vset.pattern.permute.xlu0 %v8567_v9  ;;  %vm4124_vm5 = vcmask 23552   ;;  %vm4133_vm6 = vcmask 31744  }
 0x132   : > { %5262 = vmatprep.subr.msk.bf16.mxu0 %vm6910_vm1, %v5260_v6  ;;  %v6936_v17 = vld [vmem:[#allocation8 + $0x8] sm:$0xff]  ;;  %v6942_v18 = vpack.i.bf16 %v6928_v13, %v6926_v12  ;;  %v6950_v21 = vld [vmem:[#allocation8 + $0x38] sm:$0xff]  ;;  %v6952_v23 = vld [vmem:[#allocation8 + $0x40] sm:$0xff]  ;;  %s8452_s20 = scalar_lea.vmem [#allocation19], %s6871_s3  ;;  %s4552_s28 = sshll.u32 %s8659_s23, 10 }
 0x133   : > { %5712 = vrot.lane.b32.xlu1 %v6932_v14, %s6478_s24  ;;  %v6946_v19 = vpack.i.bf16 %v6936_v17, %v6934_v15  ;;  %v862_v22 = vld [vmem:[#allocation13] sm:$0xff]  ;;  %v863_v25 = vld [vmem:[#allocation13 + $0x8] sm:$0xff]  ;;  %v6962_v26 = vpack.i.bf16 %v6950_v21, %v6948_v20  ;;  %v6970_v29 = vld [vmem:[#allocation8 + $0x58] sm:$0xff]  ;;  %v5294_v54 = vpack.c.bf16 %v6936_v17, %v6934_v15  ;;  %s4156_s26 = sshll.u32 %s8452_s20, 4  ;;  %s8779_s11 = sld [smem:[#allocation34_spill]]  ;;  %s8483_s26 = int_to_ptr.vmem [resolvable:$true] %s4156_s26 }
 0x134   : > { %v6954_v24 = vld [vmem:[#allocation8 + $0x48] sm:$0xff]  ;;  %v6964_v27 = vpack.c.bf16 %v863_v25, %v862_v22  ;;  %v6968_v28 = vld [vmem:[#allocation8 + $0x50] sm:$0xff]  ;;  %v660_v31 = vld [vmem:[#allocation10 + $0x38] sm:$0xff]  ;;  %s8780_s5 = sld [smem:[#allocation73_spill]]  ;;  %s4143_s23 = scalar_lea.sflag [#allocation4], %s6868_s25 }
 0x135   : > { %5707 = vrot.lane.b32.xlu0 %v6946_v19, %s6478_s24  ;;  %v659_v30 = vld [vmem:[#allocation10 + $0x30] sm:$0xff]  ;;  %v6976_v32 = vpack.i.bf16 %v6954_v24, %v6952_v23  ;;  %v6981_v34 = vld [vmem:[#allocation8 + $0x78] sm:$0xff]  ;;  %v6988_v35 = vpack.i.bf16 %v6970_v29, %v6968_v28  ;;  %v661_v38 = vld [vmem:[#allocation10 + $0x40] sm:$0xff]  ;;  %s6369_s27 = scalar_lea.vmem %s8483_s26, 1024  ;;  %s6485_s19 = smov [#allocation19]  }
 0x136   : > { %5291 = vmatprep.subr.bf16.mxu1 %v6964_v27  ;;  %v6979_v33 = vld [vmem:[#allocation8 + $0x70] sm:$0xff]  ;;  %v5272_v36 = vpack.c.bf16 %v660_v31, %v659_v30  ;;  %v662_v39 = vld [vmem:[#allocation10 + $0x48] sm:$0xff]  ;;  %v664_v42 = vld [vmem:[#allocation10 + $0x58] sm:$0xff]  ;;  %v5306_v31 = vpack.c.bf16 %v6928_v13, %v6926_v12  ;;  %v5312_v12 = vpack.c.bf16 %v6950_v21, %v6948_v20  ;;  %v5318_v13 = vpack.c.bf16 %v6954_v24, %v6952_v23  ;;  %p6370_p13 = scmp.ne.s32.totalorder %s8483_s26, %s6369_s27  ;;  %s6373_s30 = sshll.u32 %s6485_s19, 4  ;;  %s6374_s30 = int_to_ptr.vmem [resolvable:$false] %s6373_s30 }
 0x137   : > { %5717 = vrot.lane.b32.xlu1 %v6942_v18, %s6478_s24  ;;  %5293 = vmatpush3.bf16.msra.mxu1 %v6964_v27  ;;  %v6994_v37 = vpack.i.bf16 %v6981_v34, %v6979_v33  ;;  %v5278_v40 = vpack.c.bf16 %v662_v39, %v661_v38  ;;  %v663_v41 = vld [vmem:[#allocation10 + $0x50] sm:$0xff]  ;;  %v579_v44 = vld [vmem:[%s6875_s12 + $0x8] sm:$0xff]  ;;  %v581_v46 = vld [vmem:[%s6875_s12 + $0x18] sm:$0xff]  ;;  %p6376_p9 = scmp.lt.s32.totalorder %s8483_s26, %s6374_s30 }
 0x138   : > { %v5284_v43 = vpack.c.bf16 %v664_v42, %v663_v41  ;;  %v580_v45 = vld [vmem:[%s6875_s12 + $0x10] sm:$0xff]  ;;  %v582_v47 = vld [vmem:[%s6875_s12 + $0x20] sm:$0xff]  ;;  %v583_v48 = vld [vmem:[%s6875_s12 + $0x28] sm:$0xff] }
 0x139   : > { %5265 = vmatpush3.bf16.xpose.msk.msra.mxu0 %vm6910_vm1, %v5260_v6  ;;  %5722 = vrot.lane.b32.xlu0 %v6962_v26, %s6478_s24  ;;  %v584_v49 = vld [vmem:[%s6875_s12 + $0x30] sm:$0xff]  ;;  %v585_v50 = vld [vmem:[%s6875_s12 + $0x38] sm:$0xff]  ;;  %v7030_v51 = vld [vmem:[#allocation8 + $0x60] sm:$0xff]  ;;  %v8565_v6 = vmov 1   ;;  %p8781_p7 = scmp.ne.s32.totalorder %s8779_s11, 0 }
 0x13a   : > { %5268 = vmatprep.subr.msk.bf16.mxu0 %vm6910_vm1, %v5266_v16  ;;  %v7032_v52 = vld [vmem:[#allocation8 + $0x68] sm:$0xff]  ;;  %vm7046_vm3 = vmpackc.low %vm864_vm2, %vm864_vm2  ;;  %v4380_v56 = vld [vmem:[#allocation11] ss:$0 sm:$0xff]  ;;  %5757 = vset.pattern.permute.xlu1 %v8565_v6  ;;  %s8481_s12 = scalar_lea.hbm %s8780_s5, %s4552_s28 }
 0x13b   : > { %5727 = vrot.lane.b32.xlu1 %v6976_v32, %s6478_s24  ;;  %v7036_v53 = vpack.i.bf16 %v7032_v52, %v7030_v51  ;;  %v8672_v55 = vsel %vm7046_vm3, 4294967295, %v8671_v55  ;;  %5296 = vmatprep.subr.msk.bf16.mxu1 %vm7046_vm3, %v5294_v54  ;;  %v5330_v21 = vpack.c.bf16 %v7032_v52, %v7030_v51  ;;  %p6371_p8 = pnand %p6370_p13, %p8781_p7 }
 0x13c   : > { %8673 = vst [vmem:[#allocation37_spill] sm:$0xff] %v8672_v55 }
 0x13d   : > { %5732 = vrot.lane.b32.xlu0 %v6988_v35, %s6478_s24  ;;  %p6372_p0 = pneg %p6371_p8 }
 0x13f   : > { %5742 = vrot.lane.b32.xlu1 %v6994_v37, %s6478_s24 }
 0x141   : > { %5271 = vmatpush3.bf16.xpose.msk.msra.mxu0 %vm6910_vm1, %v5266_v16  ;;  %5737 = vrot.lane.b32.xlu0 %v7036_v53, %s6478_s24 }
 0x142   : > { %5274 = vmatprep.subr.msk.bf16.mxu0 %vm6910_vm1, %v5272_v36 }
 0x143   : > { %5747 = vrot.lane.b32.xlu1 %v6946_v19, %s6479_s29 }
 0x147   : > { %5752 = vrot.lane.b32.xlu1 %v6932_v14, %s6479_s29 }
 0x149   : > { %5277 = vmatpush3.bf16.xpose.msk.msra.mxu0 %vm6910_vm1, %v5272_v36 }
 0x14a   : > { %5280 = vmatprep.subr.msk.bf16.mxu0 %vm6910_vm1, %v5278_v40 }
 0x151   : > { %5283 = vmatpush3.bf16.xpose.msk.msra.mxu0 %vm6910_vm1, %v5278_v40  ;;  %v5324_v40 = vpack.c.bf16 %v6970_v29, %v6968_v28  ;;  %v5336_v28 = vpack.c.bf16 %v6981_v34, %v6979_v33 }
 0x152   : > { %5286 = vmatprep.subr.msk.bf16.mxu0 %vm6910_vm1, %v5284_v43 }
 0x159   : > { %5289 = vmatpush3.bf16.xpose.msk.msra.mxu0 %vm6910_vm1, %v5284_v43 }
 0x160   : > { %4869 = vmatmul.mubr.msk.f32.vlgmr.msra.gmra.mrb[0].mxu0 %vm672_vm0, %v579_v44 }
 0x161   : > { %4871 = vmatprep.mubr.msk.f32.mxu0 %vm672_vm0, %v580_v45 }
 0x164   : > { %4872 = vmatmul.mubr.msk.f32.gmra.mrb[2].mxu0 %vm672_vm0, %v581_v46 }
 0x165   : > { %4874 = vmatprep.mubr.msk.f32.mxu0 %vm672_vm0, %v582_v47 }
 0x168   : > { %4875 = vmatmul.mubr.msk.f32.gmra.mrb[4].mxu0 %vm672_vm0, %v583_v48 }
 0x169   : > { %4877 = vmatprep.mubr.msk.f32.mxu0 %vm672_vm0, %v584_v49 }
 0x16c   : > { %4878 = vmatmul.mubr.msk.f32.gmra.mrb[6].mxu0 %vm672_vm0, %v585_v50 }
 0x1a5   : > { %v5713_v20 = vpop.permute.xlu1 %5712 }
 0x1a6   : > { %v5715_v45 = vunpack.i.h.bf16 %v5713_v20  ;;  %v5714_v46 = vunpack.i.l.bf16 %v5713_v20 }
 0x1a9   : > { %v5718_v23 = vpop.permute.xlu1 %5717 }
 0x1aa   : > { %v5720_v48 = vunpack.i.h.bf16 %v5718_v23  ;;  %v5719_v49 = vunpack.i.l.bf16 %v5718_v23 }
 0x1ad   : > { %v5728_v24 = vpop.permute.xlu1 %5727 }
 0x1b1   : > { %v5743_v29 = vpop.permute.xlu1 %5742 }
 0x1b5   : > { %v5748_v41 = vpop.permute.xlu1 %5747 }
 0x1b6   : > { %v5750_v42 = vunpack.i.h.bf16 %v5748_v41  ;;  %v5749_v43 = vunpack.i.l.bf16 %v5748_v41 }
 0x1b8   : > { %v7173_v44 = vpack.c.bf16 %v5750_v42, %v5749_v43 }
 0x1ba   : > { %8689 = vst [vmem:[#allocation53_spill] sm:$0xff] %v7173_v44 }
 0x233   : > { %v4870_v57 = vpop.f32.mrb[0].mxu0 }
 0x234   : > { %v7052_v58 = vadd.f32 %v4870_v57, %v4380_v56  ;;  %v799_v59 = vpop.f32.mrb[1].mxu0  ;;  %v5730_v57 = vunpack.i.h.bf16 %v5728_v24 }
 0x235   : > { %v7054_v60 = vadd.f32 %v4380_v56, %v799_v59  ;;  %v5729_v59 = vunpack.i.l.bf16 %v5728_v24 }
 0x236   : > { %8674 = vst [vmem:[#allocation38_spill] sm:$0xff] %v7052_v58  ;;  %v7057_v61 = vmul.f32 0.25, %v7052_v58 }
 0x237   : > { %8675 = vst [vmem:[#allocation39_spill] sm:$0xff] %v7054_v60  ;;  %v4873_v62 = vpop.f32.mrb[2].mxu0  ;;  %v7060_v63 = vmul.f32 0.25, %v7054_v60 }
 0x238   : > { %8676 = vst [vmem:[#allocation40_spill] sm:$0xff] %v7057_v61  ;;  %v7062_v1 = vadd.f32 %v4873_v62, %v4380_v56  ;;  %1882 = vrot.lane.b32.xlu1 %v7057_v61, %s6479_s29  ;;  %v809_v2 = vpop.f32.mrb[3].mxu0 }
 0x239   : > { %v7068_v4 = vadd.f32 %v4380_v56, %v809_v2  ;;  %1880 = vrot.lane.b32.xlu0 %v7060_v63, %s6479_s29  ;;  %4884 = vmatprep.mubr.msk.f32.mxu1 %vm864_vm2, %v7060_v63 }
 0x23a   : > { %8677 = vst [vmem:[#allocation41_spill] sm:$0xff] %v7062_v1  ;;  %4885 = vmatmul.mubr.msk.f32.vlgmr.msra.gmra.mrb[0].mxu1 %vm864_vm2, %v7057_v61  ;;  %v7077_v5 = vmul.f32 0.25, %v7062_v1 }
 0x23b   : > { %8678 = vst [vmem:[#allocation42_spill] sm:$0xff] %v7068_v4  ;;  %5299 = vmatpush3.bf16.xpose.msk.msra.mxu1 %vm7046_vm3, %v5294_v54  ;;  %v4876_v7 = vpop.f32.mrb[4].mxu0  ;;  %v7083_v8 = vmul.f32 0.25, %v7068_v4  ;;  %v5346_v54 = vpack.c.bf16 %v5715_v45, %v5714_v46 }
 0x23c   : > { %8679 = vst [vmem:[#allocation43_spill] sm:$0xff] %v7077_v5  ;;  %v7086_v10 = vadd.f32 %v4876_v7, %v4380_v56  ;;  %v819_v11 = vpop.f32.mrb[5].mxu0  ;;  %5302 = vmatprep.subr.msk.bf16.mxu1 %vm7046_vm3, %v5300_v3  ;;  %1886 = vrot.lane.b32.xlu1 %v7077_v5, %s6479_s29 }
 0x23d   : > { %8680 = vst [vmem:[#allocation44_spill] sm:$0xff] %v7083_v8  ;;  %v7092_v15 = vadd.f32 %v4380_v56, %v819_v11  ;;  %4887 = vmatprep.mubr.msk.f32.mxu1 %vm864_vm2, %v7083_v8  ;;  %1884 = vrot.lane.b32.xlu0 %v7083_v8, %s6479_s29  ;;  %v5358_v11 = vpack.c.bf16 %v5730_v57, %v5729_v59 }
 0x23e   : > { %8681 = vst [vmem:[#allocation45_spill] sm:$0xff] %v7086_v10  ;;  %4888 = vmatmul.mubr.msk.f32.gmra.mrb[2].mxu1 %vm864_vm2, %v7077_v5  ;;  %v7101_v16 = vmul.f32 0.25, %v7086_v10 }
 0x23f   : > { %8682 = vst [vmem:[#allocation46_spill] sm:$0xff] %v7092_v15  ;;  %v4879_v17 = vpop.f32.mrb[6].mxu0  ;;  %v7104_v22 = vmul.f32 0.25, %v7092_v15 }
 0x240   : > { %8683 = vst [vmem:[#allocation47_spill] sm:$0xff] %v7101_v16  ;;  %v7106_v25 = vadd.f32 %v4879_v17, %v4380_v56  ;;  %v829_v30 = vpop.f32.mrb[7].mxu0 }
 0x241   : > { %8684 = vst [vmem:[#allocation48_spill] sm:$0xff] %v7104_v22  ;;  %v7110_v36 = vadd.f32 %v4380_v56, %v829_v30  ;;  %4890 = vmatprep.mubr.msk.f32.mxu1 %vm864_vm2, %v7104_v22  ;;  %1890 = vrot.lane.b32.xlu0 %v7101_v16, %s6479_s29  ;;  %v5350_v56 = vpack.c.bf16 %v5720_v48, %v5719_v49 }
 0x242   : > { %8685 = vst [vmem:[#allocation49_spill] sm:$0xff] %v7106_v25  ;;  %4891 = vmatmul.mubr.msk.f32.gmra.mrb[4].mxu1 %vm864_vm2, %v7101_v16  ;;  %v7119_v38 = vmul.f32 0.25, %v7106_v25 }
 0x243   : > { %8686 = vst [vmem:[#allocation50_spill] sm:$0xff] %v7110_v36  ;;  %5305 = vmatpush3.bf16.xpose.msk.msra.mxu1 %vm7046_vm3, %v5300_v3  ;;  %v7124_v39 = vmul.f32 0.25, %v7110_v36  ;;  %v4608_v36 = vld [vmem:[%s6890_s17 + $0x28] sm:$0xff]  }
 0x244   : > { %8687 = vst [vmem:[#allocation51_spill] sm:$0xff] %v7119_v38  ;;  %5308 = vmatprep.subr.msk.bf16.mxu1 %vm7046_vm3, %v5306_v31  ;;  %v7302_v58 = vunpack.c.l.bf16 %v4608_v36 }
 0x245   : > { %8688 = vst [vmem:[#allocation52_spill] sm:$0xff] %v7124_v39  ;;  %4893 = vmatprep.mubr.msk.f32.mxu1 %vm864_vm2, %v7124_v39  ;;  %1888 = vrot.lane.b32.xlu0 %v7104_v22, %s6479_s29 }
 0x246   : > { %4894 = vmatmul.mubr.msk.f32.gmra.mrb[6].mxu1 %vm864_vm2, %v7119_v38  ;;  %1892 = vrot.lane.b32.xlu1 %v7124_v39, %s6479_s29 }
 0x247   : > { %4928 = vmatprep.mubr.msk.f32.mxu1 %vm864_vm2, %v7060_v63 }
 0x24b   : > { %5311 = vmatpush3.bf16.xpose.msk.msra.mxu1 %vm7046_vm3, %v5306_v31 }
 0x24c   : > { %5314 = vmatprep.subr.msk.bf16.mxu1 %vm7046_vm3, %v5312_v12 }
 0x253   : > { %5317 = vmatpush3.bf16.xpose.msk.msra.mxu1 %vm7046_vm3, %v5312_v12 }
 0x254   : > { %5320 = vmatprep.subr.msk.bf16.mxu1 %vm7046_vm3, %v5318_v13 }
 0x25b   : > { %5323 = vmatpush3.bf16.xpose.msk.msra.mxu1 %vm7046_vm3, %v5318_v13  ;;  %v5745_v13 = vunpack.i.h.bf16 %v5743_v29 }
 0x25c   : > { %5326 = vmatprep.subr.msk.bf16.mxu1 %vm7046_vm3, %v5324_v40 }
 0x263   : > { %5329 = vmatpush3.bf16.xpose.msk.msra.mxu1 %vm7046_vm3, %v5324_v40  ;;  %v5744_v40 = vunpack.i.l.bf16 %v5743_v29 }
 0x264   : > { %5332 = vmatprep.subr.msk.bf16.mxu1 %vm7046_vm3, %v5330_v21 }
 0x26b   : > { %5335 = vmatpush3.bf16.xpose.msk.msra.mxu1 %vm7046_vm3, %v5330_v21  ;;  %v5370_v21 = vpack.c.bf16 %v5745_v13, %v5744_v40 }
 0x26c   : > { %5338 = vmatprep.subr.msk.bf16.mxu1 %vm7046_vm3, %v5336_v28 }
 0x273   : > { %5341 = vmatpush3.bf16.xpose.msk.msra.mxu1 %vm7046_vm3, %v5336_v28 }
 0x274   : > { %5376 = vmatprep.subr.msk.bf16.mxu1 %vm6910_vm1, %v6964_v27 }
 0x27a   : > { %4929 = vmatmul.mubr.msk.f32.vlgmr.msra.gmra.mrb[8].mxu1 %vm864_vm2, %v7057_v61 }
 0x27b   : > { %4931 = vmatprep.mubr.msk.f32.mxu1 %vm864_vm2, %v7083_v8  ;;  %5379 = vmatpush3.bf16.xpose.msk.msra.mxu1 %vm6910_vm1, %v6964_v27  ;;  %v5708_v27 = vpop.permute.xlu0 %5707 }
 0x27c   : > { %5386 = vmatprep.subr.msk.bf16.mxu1 %vm7046_vm3, %v7173_v44  ;;  %v5710_v33 = vunpack.i.h.bf16 %v5708_v27  ;;  %v5709_v34 = vunpack.i.l.bf16 %v5708_v27 }
 0x27e   : > { %4932 = vmatmul.mubr.msk.f32.gmra.mrb[10].mxu1 %vm864_vm2, %v7077_v5  ;;  %v5342_v47 = vpack.c.bf16 %v5710_v33, %v5709_v34 }
 0x27f   : > { %4934 = vmatprep.mubr.msk.f32.mxu1 %vm864_vm2, %v7104_v22  ;;  %v5723_v50 = vpop.permute.xlu0 %5722 }
 0x280   : > { %5343 = vmatprep.subr.bf16.mxu0 %v5342_v47  ;;  %v5725_v51 = vunpack.i.h.bf16 %v5723_v50  ;;  %v5724_v52 = vunpack.i.l.bf16 %v5723_v50 }
 0x281   : > { %5345 = vmatpush3.bf16.msra.mxu0 %v5342_v47 }
 0x282   : > { %4935 = vmatmul.mubr.msk.f32.gmra.mrb[12].mxu1 %vm864_vm2, %v7101_v16  ;;  %5347 = vmatprep.subr.bf16.mxu0 %v5346_v54  ;;  %v5354_v62 = vpack.c.bf16 %v5725_v51, %v5724_v52  ;;  %v7221_v52 = vpop.permute.xlu1 %5752 }
 0x283   : > { %4937 = vmatprep.mubr.msk.f32.mxu1 %vm864_vm2, %v7124_v39  ;;  %v5733_v2 = vpop.permute.xlu0 %5732  ;;  %8690 = vst [vmem:[#allocation54_spill] sm:$0xff] %v7221_v52  ;;  %v4606_v39 = vld [vmem:[%s6890_s17 + $0x18] sm:$0xff]  }
 0x284   : > { %v5735_v3 = vunpack.i.h.bf16 %v5733_v2  ;;  %v5734_v7 = vunpack.i.l.bf16 %v5733_v2  ;;  %v7338_v55 = vunpack.c.l.bf16 %v4606_v39 }
 0x285   : > { %5349 = vmatpush3.bf16.msra.mxu0 %v5346_v54 }
 0x286   : > { %4938 = vmatmul.mubr.msk.f32.gmra.mrb[14].mxu1 %vm864_vm2, %v7119_v38  ;;  %5351 = vmatprep.subr.bf16.mxu0 %v5350_v56  ;;  %v5362_v12 = vpack.c.bf16 %v5735_v3, %v5734_v7  ;;  %8705 = vst [vmem:[#allocation66_spill] sm:$0xff] %v7338_v55 }
 0x287   : > { %v5738_v17 = vpop.permute.xlu0 %5737 }
 0x288   : > { %v5740_v30 = vunpack.i.h.bf16 %v5738_v17  ;;  %v5739_v31 = vunpack.i.l.bf16 %v5738_v17 }
 0x289   : > { %5353 = vmatpush3.bf16.msra.mxu0 %v5350_v56  ;;  %v7226_v56 = vld [vmem:[%s6883_s21] sm:$0xff]  }
 0x28a   : > { %5355 = vmatprep.subr.bf16.mxu0 %v5354_v62  ;;  %v5366_v20 = vpack.c.bf16 %v5740_v30, %v5739_v31  ;;  %8691 = vst [vmem:[#allocation55_spill] sm:$0xff] %v7226_v56  ;;  %v8563_v59 = vunpack.c.h.bf16 %v7226_v56  ;;  %v8564_v7 = vunpack.c.l.bf16 %v7226_v56  ;;  %v4607_v31 = vld [vmem:[%s6890_s17 + $0x20] sm:$0xff]  }
 0x28c   : > { %v4402_v3 = vadd.f32 -1.0, %v8563_v59  ;;  %v4401_v13 = vadd.f32 -1.0, %v8564_v7 }
 0x28d   : > { %5357 = vmatpush3.bf16.msra.mxu0 %v5354_v62 }
 0x28e   : > { %5359 = vmatprep.subr.bf16.mxu0 %v5358_v11 }
 0x291   : > { %5361 = vmatpush3.bf16.msra.mxu0 %v5358_v11  ;;  %v4570_v11 = vld [vmem:[%s6890_s17] sm:$0xff]  }
 0x292   : > { %5363 = vmatprep.subr.bf16.mxu0 %v5362_v12  ;;  %v7248_v40 = vunpack.c.h.bf16 %v4570_v11 }
 0x295   : > { %5365 = vmatpush3.bf16.msra.mxu0 %v5362_v12  ;;  %v7244_v12 = vmul.f32 1e+30, %v4402_v3 }
 0x296   : > { %5367 = vmatprep.subr.bf16.mxu0 %v5366_v20 }
 0x297   : > { %8692 = vst [vmem:[#allocation56_spill] sm:$0xff] %v7244_v12 }
 0x299   : > { %5369 = vmatpush3.bf16.msra.mxu0 %v5366_v20  ;;  %v7250_v20 = vunpack.c.h.bf16 %v4607_v31 }
 0x29a   : > { %5371 = vmatprep.subr.bf16.mxu0 %v5370_v21 }
 0x29d   : > { %5373 = vmatpush3.bf16.msra.mxu0 %v5370_v21 }
 0x2aa   : > { %v7228_v57 = vpop.permute.xlu1 %1882 }
 0x2ab   : > { %v7219_v51 = vpop.permute.xlu0 %1880 }
 0x2ae   : > { %v7233_v2 = vpop.permute.xlu1 %1886 }
 0x2af   : > { %v7223_v54 = vpop.permute.xlu0 %1884 }
 0x2b3   : > { %v7231_v62 = vpop.permute.xlu0 %1890 }
 0x2b7   : > { %v7239_v17 = vpop.permute.xlu0 %1888 }
 0x2b8   : > { %v7241_v30 = vpop.permute.xlu1 %1892 }
 0x30d   : > { %v4886_v23 = vpop.f32.mrb[0].mxu1 }
 0x30e   : > { %1208 = vperm.xlu1 %5757, %v4886_v23   ;;  %1154 = vperm.xlu0 %5756, %v4886_v23   ;;  %v955_v24 = vpop.f32.mrb[1].mxu1 }
 0x311   : > { %v4889_v28 = vpop.f32.mrb[2].mxu1 }
 0x312   : > { %1204 = vperm.xlu1 %5757, %v955_v24   ;;  %1149 = vperm.xlu0 %5756, %v955_v24   ;;  %v965_v41 = vpop.f32.mrb[3].mxu1 }
 0x315   : > { %v4892_v42 = vpop.f32.mrb[4].mxu1 }
 0x316   : > { %5758 = vset.pattern.permute.xlu1 %v8567_v9  ;;  %1159 = vperm.xlu0 %5756, %v965_v41   ;;  %v975_v29 = vpop.f32.mrb[5].mxu1 }
 0x317   : > { %1164 = vperm.xlu1 %5758, %v4889_v28  }
 0x319   : > { %v4895_v43 = vpop.f32.mrb[6].mxu1 }
 0x31a   : > { %5760 = vset.pattern.permute.xlu0 %v8565_v6  ;;  %v985_v27 = vpop.f32.mrb[7].mxu1 }
 0x31b   : > { %5759 = vset.pattern.permute.xlu1 %v8565_v6  ;;  %1212 = vperm.xlu0 %5760, %v965_v41  }
 0x31c   : > { %1216 = vperm.xlu1 %5759, %v4889_v28   ;;  %v7253_v28 = vmul.f32 1e+30, %v4401_v13 }
 0x31e   : > { %8693 = vst [vmem:[#allocation57_spill] sm:$0xff] %v7253_v28 }
 0x31f   : > { %5761 = vset.pattern.permute.xlu0 %v8567_v9 }
 0x320   : > { %1224 = vperm.xlu1 %5759, %v4892_v42   ;;  %1174 = vperm.xlu0 %5761, %v4892_v42   ;;  %v7256_v42 = vunpack.c.l.bf16 %v4570_v11 }
 0x324   : > { %5762 = vset.pattern.permute.xlu1 %v8567_v9  ;;  %1179 = vperm.xlu0 %5761, %v985_v27  }
 0x325   : > { %1169 = vperm.xlu1 %5762, %v975_v29  }
 0x328   : > { %5766 = vset.pattern.permute.xlu0 %v8565_v6 }
 0x329   : > { %5763 = vset.pattern.permute.xlu1 %v8565_v6  ;;  %1228 = vperm.xlu0 %5766, %v985_v27  }
 0x32a   : > { %1220 = vperm.xlu1 %5763, %v975_v29  }
 0x32e   : > { %5764 = vset.pattern.permute.xlu1 %v8567_v9 }
 0x32f   : > { %1184 = vperm.xlu1 %5764, %v4895_v43  }
 0x333   : > { %5765 = vset.pattern.permute.xlu1 %v8565_v6 }
 0x334   : > { %1232 = vperm.xlu1 %5765, %v4895_v43   ;;  %v7259_v43 = vunpack.c.l.bf16 %v4607_v31 }
 0x338   : > { %5768 = vrot.lane.b32.xlu1 %v6942_v18, %s6479_s29 }
 0x339   : > { %5837 = vset.pattern.permute.xlu1 %v8567_v9 }
 0x34d   : > { %v4930_v33 = vpop.f32.mrb[8].mxu1 }
 0x34e   : > { %v1108_v34 = vpop.f32.mrb[9].mxu1  ;;  %v1114_v24 = vadd.f32 %v4930_v33, %v7244_v12 }
 0x34f   : > { %v1109_v7 = vadd.f32 %v1108_v34, %v7253_v28 }
 0x351   : > { %v7207_v45 = vpop.f32.mrb[10].mxu1 }
 0x352   : > { %v7209_v46 = vpop.f32.mrb[11].mxu1 }
 0x355   : > { %v7211_v47 = vpop.f32.mrb[12].mxu1 }
 0x356   : > { %v7213_v48 = vpop.f32.mrb[13].mxu1 }
 0x359   : > { %v7215_v49 = vpop.f32.mrb[14].mxu1 }
 0x35a   : > { %v7217_v50 = vpop.f32.mrb[15].mxu1 }
 0x38d   : > { %v1209_v21 = vpop.permute.xlu1 %1208  ;;  %v1155_v23 = vpop.permute.xlu0 %1154 }
 0x38e   : > { %v1188_v41 = vmul.f32 %v7248_v40, %v1155_v23  ;;  %v1236_v29 = vmul.f32 %v7250_v20, %v1209_v21  ;;  %v7275_v23 = vld [vmem:[%s6883_s21 + $0x8] sm:$0xff]  }
 0x38f   : > { %8694 = vst [vmem:[#allocation58_spill] sm:$0xff] %v7275_v23 }
 0x390   : > { %v1196_v27 = vadd.f32 %v1188_v41, %v1114_v24  ;;  %v7281_v41 = vld [vmem:[%s6883_s21 + $0x10] sm:$0xff]  }
 0x391   : > { %v1205_v3 = vpop.permute.xlu1 %1204  ;;  %v1150_v59 = vpop.permute.xlu0 %1149  ;;  %8695 = vst [vmem:[#allocation59_spill] sm:$0xff] %v7281_v41  ;;  %v8598_v56 = vunpack.c.h.bf16 %v7281_v41  ;;  %v8697_v4 = vunpack.c.l.bf16 %v7281_v41  ;;  %v7319_v41 = vunpack.c.h.bf16 %v4608_v36 }
 0x392   : > { %v1187_v6 = vmul.f32 %v7256_v42, %v1150_v59  ;;  %v7263_v33 = vadd.f32 %v1236_v29, %v1196_v27  ;;  %v1235_v13 = vmul.f32 %v7259_v43, %v1205_v3  ;;  %v8592_v29 = vunpack.c.h.bf16 %v7275_v23  ;;  %v7286_v3 = vld [vmem:[%s6883_s21 + $0x18] sm:$0xff]   ;;  %s6375_s21 = scalar_lea.vmem %s6374_s30, 2048 }
 0x393   : > { %8696 = vst [vmem:[#allocation60_spill] sm:$0xff] %v7286_v3  ;;  %v4405_v1 = vadd.f32 -1.0, %v8697_v4  ;;  %p6377_p3 = scmp.lt.s32.totalorder %s6375_s21, %s6369_s27 }
 0x394   : > { %1253 = vmax.xlane.f32.xlu0 %v7263_v33  ;;  %v1195_v11 = vadd.f32 %v1187_v6, %v1109_v7  ;;  %v8587_v7 = vunpack.c.l.bf16 %v7275_v23  ;;  %v4404_v27 = vadd.f32 -1.0, %v8592_v29  ;;  %v8699_v29 = vunpack.c.l.bf16 %v7286_v3 }
 0x395   : > { %v1160_v59 = vpop.permute.xlu0 %1159  ;;  %v7317_v22 = vmul.f32 1e+30, %v4405_v1  ;;  %v8703_v1 = vunpack.c.h.bf16 %v7286_v3  ;;  %p6378_p10 = por %p6377_p3, %p6376_p9 }
 0x396   : > { %v7267_v31 = vadd.f32 %v1235_v13, %v1195_v11  ;;  %v1165_v21 = vpop.permute.xlu1 %1164  ;;  %v4604_v13 = vld [vmem:[%s6890_s17 + $0x8] sm:$0xff]   ;;  %v4403_v9 = vadd.f32 -1.0, %v8587_v7  ;;  %v4406_v7 = vadd.f32 -1.0, %v8598_v56  ;;  %v4407_v16 = vadd.f32 -1.0, %v8699_v29  ;;  %v4609_v56 = vld [vmem:[%s6890_s17 + $0x30] sm:$0xff]   ;;  %v4610_v29 = vld [vmem:[%s6890_s17 + $0x38] sm:$0xff]  }
 0x397   : > { %v7294_v10 = vunpack.c.l.bf16 %v4604_v13  ;;  %v7307_v15 = vunpack.c.h.bf16 %v4604_v13  ;;  %8701 = vst [vmem:[#allocation63_spill] sm:$0xff] %v7317_v22  ;;  %v7344_v44 = vunpack.c.h.bf16 %v4609_v56  ;;  %p6379_p1 = pnand %p6378_p10, %p6372_p0 }
 0x398   : > { %1251 = vmax.xlane.f32.xlu1 %v7267_v31  ;;  %v7300_v60 = vmul.f32 1e+30, %v4403_v9  ;;  %v7315_v9 = vmul.f32 1e+30, %v4404_v27  ;;  %v7331_v12 = vmul.f32 1e+30, %v4406_v7  ;;  %v7346_v7 = vunpack.c.l.bf16 %v4610_v29 }
 0x399   : > { %v1189_v5 = vmul.f32 %v7294_v10, %v1160_v59  ;;  %v7329_v59 = vunpack.c.l.bf16 %v4609_v56  ;;  %v4408_v27 = vadd.f32 -1.0, %v8703_v1  ;;  %v1190_v36 = vmul.f32 %v7307_v15, %v1165_v21  ;;  %8706 = vst [vmem:[#allocation67_spill] sm:$0xff] %v7344_v44 }
 0x39a   : > { %v1213_v6 = vpop.permute.xlu0 %1212  ;;  %8698 = vst [vmem:[#allocation61_spill] sm:$0xff] %v7300_v60  ;;  %8700 = vst [vmem:[#allocation62_spill] sm:$0xff] %v7315_v9  ;;  %v1119_v13 = vadd.f32 %v7209_v46, %v7300_v60  ;;  %v7336_v0 = vmul.f32 1e+30, %v4407_v16  ;;  %v1129_v21 = vadd.f32 %v7213_v48, %v7317_v22  ;;  %v7355_v56 = vunpack.c.h.bf16 %v4606_v39 }
 0x39b   : > { %v1217_v34 = vpop.permute.xlu1 %1216  ;;  %v1237_v61 = vmul.f32 %v7302_v58, %v1213_v6  ;;  %8702 = vst [vmem:[#allocation64_spill] sm:$0xff] %v7331_v12  ;;  %8707 = vst [vmem:[#allocation68_spill] sm:$0xff] %v7346_v7 }
 0x39c   : > { %8704 = vst [vmem:[#allocation65_spill] sm:$0xff] %v7336_v0  ;;  %v1197_v60 = vadd.f32 %v1189_v5, %v1119_v13  ;;  %v1238_v6 = vmul.f32 %v7319_v41, %v1217_v34  ;;  %v1139_v48 = vadd.f32 %v7217_v50, %v7336_v0 }
 0x39e   : > { %v1245_v52 = vadd.f32 %v1237_v61, %v1197_v60 }
 0x39f   : > { %v7277_v24 = vpop.permute.xlu1 %1224  ;;  %v1175_v25 = vpop.permute.xlu0 %1174 }
 0x3a0   : > { %v1240_v60 = vmul.f32 %v7344_v44, %v7277_v24 }
 0x3a3   : > { %v1180_v8 = vpop.permute.xlu0 %1179 }
 0x3a4   : > { %v1170_v11 = vpop.permute.xlu1 %1169  ;;  %v1193_v34 = vmul.f32 %v7338_v55, %v1180_v8 }
 0x3a9   : > { %5773 = vrot.lane.b32.xlu1 %v6962_v26, %s6479_s29  ;;  %v1221_v23 = vpop.permute.xlu1 %1220 }
 0x3aa   : > { %1894 = vrot.lane.b32.xlu0 %v7119_v38, %s6479_s29  ;;  %v4605_v38 = vld [vmem:[%s6890_s17 + $0x10] sm:$0xff]   ;;  %v1239_v1 = vmul.f32 %v7329_v59, %v1221_v23 }
 0x3ab   : > { %v7313_v4 = vunpack.c.l.bf16 %v4605_v38  ;;  %v7326_v28 = vunpack.c.h.bf16 %v4605_v38  ;;  %v1124_v38 = vadd.f32 %v7207_v45, %v7315_v9  ;;  %v1134_v45 = vadd.f32 %v7211_v47, %v7331_v12 }
 0x3ac   : > { %v7357_v9 = vmul.f32 1e+30, %v4408_v27  ;;  %v1201_v27 = vadd.f32 %v1193_v34, %v1139_v48 }
 0x3ad   : > { %v1191_v46 = vmul.f32 %v7313_v4, %v1170_v11  ;;  %v1192_v16 = vmul.f32 %v7326_v28, %v1175_v25  ;;  %v1229_v11 = vpop.permute.xlu0 %1228  ;;  %v1198_v5 = vadd.f32 %v1190_v36, %v1124_v38  ;;  %v7361_v25 = vunpack.c.h.bf16 %v4610_v29 }
 0x3ae   : > { %v1185_v3 = vpop.permute.xlu1 %1184  ;;  %8708 = vst [vmem:[#allocation69_spill] sm:$0xff] %v7357_v9  ;;  %v1241_v61 = vmul.f32 %v7346_v7, %v1229_v11 }
 0x3af   : > { %v1199_v13 = vadd.f32 %v1191_v46, %v1129_v21  ;;  %8709 = vst [vmem:[#allocation70_spill] sm:$0xff] %v7361_v25  ;;  %v1246_v23 = vadd.f32 %v1238_v6, %v1198_v5  ;;  %v1200_v36 = vadd.f32 %v1192_v16, %v1134_v45  ;;  %v1194_v39 = vmul.f32 %v7355_v56, %v1185_v3  ;;  %v1878_v21 = vld [vmem:[#allocation13 + $0x10] sm:$0xff]  ;;  %v1879_v16 = vld [vmem:[#allocation13 + $0x18] sm:$0xff] }
 0x3b0   : > { %v1144_v46 = vadd.f32 %v7215_v49, %v7357_v9  ;;  %v1249_v29 = vadd.f32 %v1241_v61, %v1201_v27 }
 0x3b1   : > { %v1247_v47 = vadd.f32 %v1239_v1, %v1199_v13  ;;  %v1248_v38 = vadd.f32 %v1240_v60, %v1200_v36  ;;  %v7370_v1 = vpack.c.bf16 %v1879_v16, %v1878_v21 }
 0x3b2   : > { %v1202_v24 = vadd.f32 %v1194_v39, %v1144_v46 }
 0x3b3   : > { %v1233_v8 = vpop.permute.xlu1 %1232  ;;  %5381 = vmatprep.subr.bf16.mxu0 %v7370_v1 }
 0x3b4   : > { %v1242_v50 = vmul.f32 %v7361_v25, %v1233_v8 }
 0x3b6   : > { %v1250_v6 = vadd.f32 %v1242_v50, %v1202_v24 }
 0x3b7   : > { %v7373_v3 = vpop.permute.xlu1 %5768 }
 0x3c9   : > { %1255 = vmax.xlane.f32.xlu0 %v1245_v52 }
 0x3cd   : > { %1259 = vmax.xlane.f32.xlu0 %v1247_v47  ;;  %1257 = vmax.xlane.f32.xlu1 %v1246_v23 }
 0x3d1   : > { %1263 = vmax.xlane.f32.xlu0 %v1249_v29  ;;  %1261 = vmax.xlane.f32.xlu1 %v1248_v38 }
 0x3d5   : > { %1265 = vmax.xlane.f32.xlu1 %v1250_v6 }
 0x421   : > { %v1254_v11 = vpop.xlane.xlu0 %1253 }
 0x422   : > { %v1268_v5 = vmax.f32 %v1254_v11, 0.0 }
 0x424   : > { %v1276_v49 = vsub.f32 %v7263_v33, %v1268_v5 }
 0x425   : > { %v1252_v45 = vpop.xlane.xlu1 %1251  ;;  %v7382_v33 = vpop.permute.xlu0 %1894 }
 0x426   : > { %v1285_v34 = vmul.f32 1.442695, %v1276_v49  ;;  %v1267_v13 = vmax.f32 %v1252_v45, 0.0 }
 0x428   : > { %5941 = vpow2.f32 %v1285_v34  ;;  %v1275_v48 = vsub.f32 %v7267_v31, %v1267_v13 }
 0x429   : > { %v7384_v8 = vpop.permute.xlu1 %5773 }
 0x42a   : > { %v1283_v60 = vmul.f32 1.442695, %v1275_v48 }
 0x42c   : > { %5943 = vpow2.f32 %v1283_v60 }
 0x432   : > { %v5942_v61 = vpop.eup %5941 }
 0x433   : > { %1301 = vadd.xlane.f32.xlu0 %v5942_v61 }
 0x436   : > { %v5944_v36 = vpop.eup %5943 }
 0x437   : > { %1299 = vadd.xlane.f32.xlu1 %v5944_v36  ;;  %4972 = vmatprep.mubr.f32.mxu0 %v5944_v36 }
 0x438   : > { %4973 = vmatmul.mubr.f32.vlgmr.msra.gmra.mrb[8].mxu0 %v5942_v61 }
 0x439   : > { %5383 = vmatpush3.bf16.msra.mxu0 %v7370_v1 }
 0x448   : > { %5778 = vrot.lane.b32.xlu1 %v6976_v32, %s6479_s29 }
 0x449   : > { %5783 = vrot.lane.b32.xlu0 %v6988_v35, %s6479_s29 }
 0x456   : > { %v1256_v31 = vpop.xlane.xlu0 %1255 }
 0x457   : > { %v1269_v39 = vmax.f32 %v1256_v31, 0.0 }
 0x459   : > { %v1277_v27 = vsub.f32 %v1245_v52, %v1269_v39 }
 0x45a   : > { %v1260_v46 = vpop.xlane.xlu0 %1259  ;;  %v1258_v50 = vpop.xlane.xlu1 %1257 }
 0x45b   : > { %v1287_v24 = vmul.f32 1.442695, %v1277_v27  ;;  %v1271_v21 = vmax.f32 %v1260_v46, 0.0  ;;  %v1270_v16 = vmax.f32 %v1258_v50, 0.0  ;;  %v1517_v50 = vmul.f32 %v5942_v61, %v7250_v20 }
 0x45d   : > { %5945 = vpow2.f32 %v1287_v24  ;;  %v1279_v11 = vsub.f32 %v1247_v47, %v1271_v21  ;;  %v1278_v5 = vsub.f32 %v1246_v23, %v1270_v16  ;;  %v1493_v47 = vmul.f32 %v5942_v61, %v7248_v40 }
 0x45e   : > { %v1264_v49 = vpop.xlane.xlu0 %1263  ;;  %v1262_v45 = vpop.xlane.xlu1 %1261 }
 0x45f   : > { %v1291_v34 = vmul.f32 1.442695, %v1279_v11  ;;  %v1289_v13 = vmul.f32 1.442695, %v1278_v5  ;;  %v1273_v48 = vmax.f32 %v1264_v49, 0.0  ;;  %v1272_v60 = vmax.f32 %v1262_v45, 0.0 }
 0x461   : > { %5947 = vpow2.f32 %v1291_v34  ;;  %v1281_v0 = vsub.f32 %v1249_v29, %v1273_v48  ;;  %v1280_v9 = vsub.f32 %v1248_v38, %v1272_v60  ;;  %v1516_v29 = vmul.f32 %v5944_v36, %v7259_v43 }
 0x462   : > { %5949 = vpow2.f32 %v1289_v13  ;;  %v1266_v31 = vpop.xlane.xlu1 %1265 }
 0x463   : > { %v1295_v52 = vmul.f32 1.442695, %v1281_v0  ;;  %v1293_v39 = vmul.f32 1.442695, %v1280_v9  ;;  %v1274_v22 = vmax.f32 %v1266_v31, 0.0  ;;  %v1492_v0 = vmul.f32 %v5944_v36, %v7256_v42 }
 0x465   : > { %5951 = vpow2.f32 %v1295_v52  ;;  %v1282_v27 = vsub.f32 %v1250_v6, %v1274_v22 }
 0x466   : > { %5953 = vpow2.f32 %v1293_v39 }
 0x467   : > { %v5946_v23 = vpop.eup %5945  ;;  %v1297_v46 = vmul.f32 1.442695, %v1282_v27 }
 0x468   : > { %1502 = vadd.xlane.f32.xlu0 %v1493_v47  ;;  %4975 = vmatprep.mubr.f32.mxu0 %v5946_v23  ;;  %v1494_v16 = vmul.f32 %v5946_v23, %v7294_v10  ;;  %v1518_v36 = vmul.f32 %v5946_v23, %v7302_v58 }
 0x469   : > { %5955 = vpow2.f32 %v1297_v46 }
 0x46b   : > { %v5948_v38 = vpop.eup %5947 }
 0x46c   : > { %v5950_v24 = vpop.eup %5949  ;;  %1526 = vadd.xlane.f32.xlu1 %v1517_v50  ;;  %1524 = vadd.xlane.f32.xlu0 %v1516_v29  ;;  %v1496_v13 = vmul.f32 %v5948_v38, %v7313_v4  ;;  %v1520_v60 = vmul.f32 %v5948_v38, %v7329_v59 }
 0x46d   : > { %4976 = vmatmul.mubr.f32.gmra.mrb[10].mxu0 %v5950_v24  ;;  %v1495_v6 = vmul.f32 %v5950_v24, %v7307_v15  ;;  %v1519_v61 = vmul.f32 %v5950_v24, %v7319_v41 }
 0x46e   : > { %4978 = vmatprep.mubr.f32.mxu0 %v5948_v38 }
 0x46f   : > { %v5952_v22 = vpop.eup %5951 }
 0x470   : > { %v5954_v9 = vpop.eup %5953  ;;  %1303 = vadd.xlane.f32.xlu0 %v5946_v23  ;;  %1500 = vadd.xlane.f32.xlu1 %v1492_v0  ;;  %v1498_v34 = vmul.f32 %v5952_v22, %v7338_v55  ;;  %v1522_v48 = vmul.f32 %v5952_v22, %v7346_v7 }
 0x471   : > { %4979 = vmatmul.mubr.f32.gmra.mrb[12].mxu0 %v5954_v9  ;;  %v1521_v11 = vmul.f32 %v5954_v9, %v7344_v44  ;;  %v1497_v45 = vmul.f32 %v5954_v9, %v7326_v28 }
 0x472   : > { %4981 = vmatprep.mubr.f32.mxu0 %v5952_v22 }
 0x473   : > { %v5956_v21 = vpop.eup %5955 }
 0x474   : > { %1305 = vadd.xlane.f32.xlu1 %v5950_v24  ;;  %1506 = vadd.xlane.f32.xlu0 %v1495_v6  ;;  %v1499_v5 = vmul.f32 %v5956_v21, %v7355_v56  ;;  %v1523_v49 = vmul.f32 %v5956_v21, %v7361_v25 }
 0x475   : > { %4982 = vmatmul.mubr.f32.gmra.mrb[14].mxu0 %v5956_v21 }
 0x476   : > { %5004 = vmatprep.mubr.msk.f32.mxu0 %vm864_vm2, %v7219_v51 }
 0x478   : > { %1530 = vadd.xlane.f32.xlu1 %v1519_v61  ;;  %1504 = vadd.xlane.f32.xlu0 %v1494_v16  ;;  %v8711_v61 = vld [vmem:[#allocation53_spill] sm:$0xff] }
 0x479   : > { %5005 = vmatmul.mubr.msk.f32.vlgmr.msra.gmra.mrb[16].mxu0 %vm864_vm2, %v7228_v57 }
 0x47a   : > { %5007 = vmatprep.mubr.msk.f32.mxu0 %vm864_vm2, %v7223_v54 }
 0x47c   : > { %1528 = vadd.xlane.f32.xlu0 %v1518_v36  ;;  %1534 = vadd.xlane.f32.xlu1 %v1521_v11 }
 0x47d   : > { %5008 = vmatmul.mubr.msk.f32.gmra.mrb[18].mxu0 %vm864_vm2, %v7233_v2 }
 0x47e   : > { %5010 = vmatprep.mubr.msk.f32.mxu0 %vm864_vm2, %v7239_v17 }
 0x480   : > { %1309 = vadd.xlane.f32.xlu0 %v5954_v9  ;;  %1514 = vadd.xlane.f32.xlu1 %v1499_v5  ;;  %v5771_v5 = vunpack.i.h.bf16 %v7373_v3 }
 0x481   : > { %5011 = vmatmul.mubr.msk.f32.gmra.mrb[20].mxu0 %vm864_vm2, %v7231_v62 }
 0x482   : > { %5013 = vmatprep.mubr.msk.f32.mxu0 %vm864_vm2, %v7241_v30 }
 0x484   : > { %1307 = vadd.xlane.f32.xlu0 %v5948_v38  ;;  %1538 = vadd.xlane.f32.xlu1 %v1523_v49  ;;  %v5770_v49 = vunpack.i.l.bf16 %v7373_v3 }
 0x485   : > { %5014 = vmatmul.mubr.msk.f32.gmra.mrb[22].mxu0 %vm864_vm2, %v7382_v33 }
 0x488   : > { %1510 = vadd.xlane.f32.xlu0 %v1497_v45  ;;  %1512 = vadd.xlane.f32.xlu1 %v1498_v34 }
 0x48c   : > { %1508 = vadd.xlane.f32.xlu0 %v1496_v13  ;;  %1536 = vadd.xlane.f32.xlu1 %v1522_v48  ;;  %v5396_v48 = vpack.c.bf16 %v5771_v5, %v5770_v49 }
 0x490   : > { %1532 = vadd.xlane.f32.xlu0 %v1520_v60 }
 0x494   : > { %1313 = vadd.xlane.f32.xlu0 %v5956_v21 }
 0x498   : > { %1311 = vadd.xlane.f32.xlu0 %v5952_v22 }
 0x49d   : > { %5788 = vrot.lane.b32.xlu1 %v7036_v53, %s6479_s29 }
 0x4a1   : > { %5798 = vrot.lane.b32.xlu1 %v6946_v19, %s6482_s13 }
 0x4a5   : > { %5808 = vrot.lane.b32.xlu1 %v6942_v18, %s6482_s13 }
 0x4a9   : > { %5813 = vrot.lane.b32.xlu1 %v6962_v26, %s6482_s13 }
 0x4ad   : > { %5833 = vrot.lane.b32.xlu1 %v6994_v37, %s6482_s13 }
 0x4ae   : > { %5793 = vrot.lane.b32.xlu0 %v6994_v37, %s6479_s29 }
 0x4b1   : > { %2909 = vrot.lane.b32.xlu1 %v7060_v63, %s6483_s22 }
 0x4b2   : > { %5803 = vrot.lane.b32.xlu0 %v6932_v14, %s6482_s13 }
 0x4b6   : > { %5818 = vrot.lane.b32.xlu0 %v6976_v32, %s6482_s13 }
 0x4ba   : > { %5823 = vrot.lane.b32.xlu0 %v6988_v35, %s6482_s13 }
 0x4be   : > { %5828 = vrot.lane.b32.xlu0 %v7036_v53, %s6482_s13  ;;  %v8710_v53 = vld [vmem:[#allocation54_spill] sm:$0xff] }
 0x4bf   : > { %v5755_v23 = vunpack.i.h.bf16 %v8710_v53  ;;  %v5754_v46 = vunpack.i.l.bf16 %v8710_v53 }
 0x4c0   : > { %v1302_v18 = vpop.xlane.xlu0 %1301 }
 0x4c1   : > { %v1316_v37 = vmax.f32 %v1302_v18, 1e-30  ;;  %v5390_v6 = vpack.c.bf16 %v5755_v23, %v5754_v46 }
 0x4c4   : > { %v1300_v19 = vpop.xlane.xlu1 %1299  ;;  %v7440_v31 = vpop.permute.xlu0 %5783 }
 0x4c5   : > { %v1315_v26 = vmax.f32 %v1300_v19, 1e-30  ;;  %v5785_v5 = vunpack.i.l.bf16 %v7440_v31 }
 0x4c7   : > { %5957 = vrcp.f32 %v1315_v26 }
 0x4c8   : > { %5959 = vrcp.f32 %v1316_v37  ;;  %v7442_v63 = vpop.permute.xlu1 %5778 }
 0x4d1   : > { %v5958_v47 = vpop.eup %5957 }
 0x4d2   : > { %v5960_v38 = vpop.eup %5959 }
 0x4f5   : > { %v1503_v14 = vpop.xlane.xlu0 %1502 }
 0x4f9   : > { %v1525_v52 = vpop.xlane.xlu0 %1524  ;;  %v1527_v39 = vpop.xlane.xlu1 %1526 }
 0x4fa   : > { %v1542_v32 = vsel %vm1540_vm4, %v1503_v14, %v1527_v39 }
 0x4fb   : > { %v1550_v0 = vmul.f32 %v5960_v38, %v1542_v32  ;;  %v5776_v32 = vunpack.i.h.bf16 %v7384_v8 }
 0x4fd   : > { %v1304_v35 = vpop.xlane.xlu0 %1303  ;;  %v1501_v27 = vpop.xlane.xlu1 %1500 }
 0x4fe   : > { %v1317_v50 = vmax.f32 %v1304_v35, 1e-30  ;;  %v1541_v29 = vsel %vm1540_vm4, %v1501_v27, %v1525_v52  ;;  %v5775_v35 = vunpack.i.l.bf16 %v7384_v8 }
 0x4ff   : > { %v1549_v24 = vmul.f32 %v5958_v47, %v1541_v29 }
 0x500   : > { %5961 = vrcp.f32 %v1317_v50  ;;  %v5402_v50 = vpack.c.bf16 %v5776_v32, %v5775_v35 }
 0x501   : > { %v1507_v22 = vpop.xlane.xlu0 %1506  ;;  %4988 = vmatprep.mubr.msk.f32.mxu1 %vm672_vm0, %v1549_v24  ;;  %v1306_v9 = vpop.xlane.xlu1 %1305  ;;  %v5780_v24 = vunpack.i.l.bf16 %v7442_v63 }
 0x502   : > { %v1318_v21 = vmax.f32 %v1306_v9, 1e-30  ;;  %4989 = vmatmul.mubr.msk.f32.vlgmr.msra.gmra.mrb[16].mxu1 %vm672_vm0, %v1550_v0 }
 0x503   : > { %5389 = vmatpush3.bf16.xpose.msk.msra.mxu1 %vm7046_vm3, %v8711_v61 }
 0x504   : > { %5963 = vrcp.f32 %v1318_v21  ;;  %5392 = vmatprep.subr.msk.bf16.mxu1 %vm7046_vm3, %v5390_v6 }
 0x505   : > { %v1505_v36 = vpop.xlane.xlu0 %1504  ;;  %v1531_v11 = vpop.xlane.xlu1 %1530 }
 0x506   : > { %v1544_v27 = vsel %vm1540_vm4, %v1507_v22, %v1531_v11  ;;  %v5786_v11 = vunpack.i.h.bf16 %v7440_v31 }
 0x509   : > { %v1529_v45 = vpop.xlane.xlu0 %1528  ;;  %v1535_v34 = vpop.xlane.xlu1 %1534 }
 0x50a   : > { %v7457_v13 = vpop.eup %5961  ;;  %v1543_v60 = vsel %vm1540_vm4, %v1505_v36, %v1529_v45 }
 0x50b   : > { %v1551_v18 = vmul.f32 %v7457_v13, %v1543_v60  ;;  %5395 = vmatpush3.bf16.xpose.msk.msra.mxu1 %vm7046_vm3, %v5390_v6  ;;  %v4974_v19 = vpop.f32.mrb[8].mxu0 }
 0x50c   : > { %v7463_v26 = vmul.f32 %v5960_v38, %v4974_v19  ;;  %5398 = vmatprep.subr.msk.bf16.mxu1 %vm7046_vm3, %v5396_v48  ;;  %v1445_v37 = vpop.f32.mrb[9].mxu0  ;;  %v5781_v38 = vunpack.i.h.bf16 %v7442_v63 }
 0x50d   : > { %v7467_v3 = vmul.f32 %v5958_v47, %v1445_v37  ;;  %v1310_v14 = vpop.xlane.xlu0 %1309  ;;  %4991 = vmatprep.mubr.msk.f32.mxu1 %vm672_vm0, %v1551_v18  ;;  %v1515_v52 = vpop.xlane.xlu1 %1514  ;;  %v5414_v18 = vpack.c.bf16 %v5786_v11, %v5785_v5 }
 0x50e   : > { %v7470_v39 = vpop.eup %5963  ;;  %v1320_v23 = vmax.f32 %v1310_v14, 1e-30  ;;  %v5408_v9 = vpack.c.bf16 %v5781_v38, %v5780_v24 }
 0x50f   : > { %v1552_v53 = vmul.f32 %v7470_v39, %v1544_v27 }
 0x510   : > { %5965 = vrcp.f32 %v1320_v23 }
 0x511   : > { %v1308_v46 = vpop.xlane.xlu0 %1307  ;;  %4992 = vmatmul.mubr.msk.f32.gmra.mrb[18].mxu1 %vm672_vm0, %v1552_v53  ;;  %v1539_v47 = vpop.xlane.xlu1 %1538 }
 0x512   : > { %v1319_v29 = vmax.f32 %v1308_v46, 1e-30  ;;  %v1548_v38 = vsel %vm1540_vm4, %v1515_v52, %v1539_v47 }
 0x513   : > { %5401 = vmatpush3.bf16.xpose.msk.msra.mxu1 %vm7046_vm3, %v5396_v48 }
 0x514   : > { %5967 = vrcp.f32 %v1319_v29  ;;  %5404 = vmatprep.subr.msk.bf16.mxu1 %vm7046_vm3, %v5402_v50 }
 0x515   : > { %v1511_v8 = vpop.xlane.xlu0 %1510  ;;  %v1513_v0 = vpop.xlane.xlu1 %1512 }
 0x516   : > { %v1546_v63 = vsel %vm1540_vm4, %v1511_v8, %v1535_v34 }
 0x519   : > { %v1509_v22 = vpop.xlane.xlu0 %1508  ;;  %v1537_v21 = vpop.xlane.xlu1 %1536 }
 0x51a   : > { %v5966_v6 = vpop.eup %5965  ;;  %v1547_v8 = vsel %vm1540_vm4, %v1513_v0, %v1537_v21 }
 0x51b   : > { %5407 = vmatpush3.bf16.xpose.msk.msra.mxu1 %vm7046_vm3, %v5402_v50  ;;  %v1554_v48 = vmul.f32 %v5966_v6, %v1546_v63 }
 0x51c   : > { %5410 = vmatprep.subr.msk.bf16.mxu1 %vm7046_vm3, %v5408_v9 }
 0x51d   : > { %v1533_v61 = vpop.xlane.xlu0 %1532  ;;  %v5789_v19 = vpop.permute.xlu1 %5788 }
 0x51e   : > { %v5968_v36 = vpop.eup %5967  ;;  %v1545_v49 = vsel %vm1540_vm4, %v1509_v22, %v1533_v61  ;;  %v5791_v14 = vunpack.i.h.bf16 %v5789_v19  ;;  %v5790_v32 = vunpack.i.l.bf16 %v5789_v19 }
 0x51f   : > { %v1553_v45 = vmul.f32 %v5968_v36, %v1545_v49 }
 0x520   : > { %v5420_v35 = vpack.c.bf16 %v5791_v14, %v5790_v32 }
 0x521   : > { %v1314_v60 = vpop.xlane.xlu0 %1313  ;;  %4994 = vmatprep.mubr.msk.f32.mxu1 %vm672_vm0, %v1553_v45 }
 0x522   : > { %4995 = vmatmul.mubr.msk.f32.gmra.mrb[20].mxu1 %vm672_vm0, %v1554_v48  ;;  %v1322_v37 = vmax.f32 %v1314_v60, 1e-30 }
 0x523   : > { %5413 = vmatpush3.bf16.xpose.msk.msra.mxu1 %vm7046_vm3, %v5408_v9  ;;  %v5799_v9 = vpop.permute.xlu1 %5798 }
 0x524   : > { %5416 = vmatprep.subr.msk.bf16.mxu1 %vm7046_vm3, %v5414_v18  ;;  %5969 = vrcp.f32 %v1322_v37  ;;  %v5801_v14 = vunpack.i.h.bf16 %v5799_v9  ;;  %v5800_v32 = vunpack.i.l.bf16 %v5799_v9 }
 0x525   : > { %v1312_v31 = vpop.xlane.xlu0 %1311 }
 0x526   : > { %v1321_v34 = vmax.f32 %v1312_v31, 1e-30 }
 0x527   : > { %v7513_v52 = vpop.permute.xlu1 %5808 }
 0x528   : > { %5971 = vrcp.f32 %v1321_v34 }
 0x529   : > { %v5794_v27 = vpop.permute.xlu0 %5793 }
 0x52a   : > { %v5796_v53 = vunpack.i.h.bf16 %v5794_v27  ;;  %v5795_v23 = vunpack.i.l.bf16 %v5794_v27  ;;  %v5811_v27 = vunpack.i.h.bf16 %v7513_v52 }
 0x52b   : > { %5419 = vmatpush3.bf16.xpose.msk.msra.mxu1 %vm7046_vm3, %v5414_v18  ;;  %v7518_v61 = vpop.permute.xlu1 %5813 }
 0x52c   : > { %5422 = vmatprep.subr.msk.bf16.mxu1 %vm7046_vm3, %v5420_v35  ;;  %v5426_v46 = vpack.c.bf16 %v5796_v53, %v5795_v23  ;;  %v5810_v53 = vunpack.i.l.bf16 %v7513_v52 }
 0x52e   : > { %v5970_v50 = vpop.eup %5969 }
 0x52f   : > { %v1556_v22 = vmul.f32 %v5970_v50, %v1548_v38 }
 0x532   : > { %v5972_v29 = vpop.eup %5971 }
 0x533   : > { %5425 = vmatpush3.bf16.xpose.msk.msra.mxu1 %vm7046_vm3, %v5420_v35  ;;  %v1555_v24 = vmul.f32 %v5972_v29, %v1547_v8  ;;  %v5432_v35 = vpack.c.bf16 %v5801_v14, %v5800_v32  ;;  %v5440_v8 = vpack.c.bf16 %v5811_v27, %v5810_v53 }
 0x534   : > { %5428 = vmatprep.subr.msk.bf16.mxu1 %vm7046_vm3, %v5426_v46 }
 0x535   : > { %4997 = vmatprep.mubr.msk.f32.mxu1 %vm672_vm0, %v1555_v24  ;;  %5433 = vmatprep.subr.bf16.mxu0 %v5432_v35 }
 0x536   : > { %4998 = vmatmul.mubr.msk.f32.gmra.mrb[22].mxu1 %vm672_vm0, %v1556_v22  ;;  %5435 = vmatpush3.bf16.msra.mxu0 %v5432_v35 }
 0x537   : > { %5048 = vmatprep.mubr.msk.f32.mxu1 %vm864_vm2, %v7219_v51 }
 0x53b   : > { %5431 = vmatpush3.bf16.xpose.msk.msra.mxu1 %vm7046_vm3, %v5426_v46  ;;  %v5816_v46 = vunpack.i.h.bf16 %v7518_v61 }
 0x540   : > { %v4977_v47 = vpop.f32.mrb[10].mxu0 }
 0x541   : > { %v7516_v0 = vmul.f32 %v7470_v39, %v4977_v47  ;;  %v1455_v21 = vpop.f32.mrb[11].mxu0 }
 0x542   : > { %v7521_v11 = vmul.f32 %v7457_v13, %v1455_v21  ;;  %5049 = vmatmul.mubr.msk.f32.vlgmr.msra.gmra.mrb[24].mxu1 %vm864_vm2, %v7228_v57  ;;  %v7535_v13 = vpop.permute.xlu1 %5833 }
 0x543   : > { %5051 = vmatprep.mubr.msk.f32.mxu1 %vm864_vm2, %v7223_v54 }
 0x544   : > { %v4980_v51 = vpop.f32.mrb[12].mxu0 }
 0x545   : > { %v7527_v5 = vmul.f32 %v5966_v6, %v4980_v51  ;;  %v1465_v49 = vpop.f32.mrb[13].mxu0 }
 0x546   : > { %v7529_v63 = vmul.f32 %v5968_v36, %v1465_v49  ;;  %5052 = vmatmul.mubr.msk.f32.gmra.mrb[26].mxu1 %vm864_vm2, %v7233_v2  ;;  %v7545_v6 = vpop.permute.xlu1 %2909  ;;  %v8713_v36 = vmov 0  }
 0x547   : > { %5054 = vmatprep.mubr.msk.f32.mxu1 %vm864_vm2, %v7239_v17 }
 0x548   : > { %v4983_v39 = vpop.f32.mrb[14].mxu0 }
 0x549   : > { %v7537_v45 = vmul.f32 %v5970_v50, %v4983_v39  ;;  %v1475_v57 = vpop.f32.mrb[15].mxu0  ;;  %v5815_v50 = vunpack.i.l.bf16 %v7518_v61 }
 0x54a   : > { %v7539_v48 = vmul.f32 %v5972_v29, %v1475_v57  ;;  %5055 = vmatmul.mubr.msk.f32.gmra.mrb[28].mxu1 %vm864_vm2, %v7231_v62  ;;  %v5836_v57 = vunpack.i.h.bf16 %v7535_v13 }
 0x54b   : > { %5057 = vmatprep.mubr.msk.f32.mxu1 %vm864_vm2, %v7241_v30  ;;  %v8714_v30 = vmov 1   ;;  %v5444_v38 = vpack.c.bf16 %v5816_v46, %v5815_v50 }
 0x54c   : > { %v5006_v54 = vpop.f32.mrb[16].mxu0 }
 0x54d   : > { %2247 = vperm.xlu0 %5766, %v5006_v54   ;;  %2193 = vperm.xlu1 %5837, %v5006_v54   ;;  %v1978_v2 = vpop.f32.mrb[17].mxu0  ;;  %v5835_v54 = vunpack.i.l.bf16 %v7535_v13 }
 0x54e   : > { %5058 = vmatmul.mubr.msk.f32.gmra.mrb[30].mxu1 %vm864_vm2, %v7382_v33  ;;  %v5804_v33 = vpop.permute.xlu0 %5803 }
 0x54f   : > { %5168 = vmatprep.mubr.msk.f32.mxu1 %vm864_vm2, %v7545_v6  ;;  %v5806_v31 = vunpack.i.h.bf16 %v5804_v33  ;;  %v5805_v34 = vunpack.i.l.bf16 %v5804_v33 }
 0x550   : > { %v5009_v17 = vpop.f32.mrb[18].mxu0 }
 0x551   : > { %5839 = vset.pattern.permute.xlu0 %v8713_v36  ;;  %2188 = vperm.xlu1 %5837, %v1978_v2   ;;  %v1988_v62 = vpop.f32.mrb[19].mxu0  ;;  %v5436_v23 = vpack.c.bf16 %v5806_v31, %v5805_v34 }
 0x552   : > { %2203 = vperm.xlu0 %5839, %v5009_v17   ;;  %v5819_v29 = vpop.permute.xlu0 %5818 }
 0x553   : > { %5437 = vmatprep.subr.bf16.mxu0 %v5436_v23  ;;  %v5821_v24 = vunpack.i.h.bf16 %v5819_v29  ;;  %v5820_v22 = vunpack.i.l.bf16 %v5819_v29 }
 0x554   : > { %v5012_v60 = vpop.f32.mrb[20].mxu0  ;;  %5439 = vmatpush3.bf16.msra.mxu0 %v5436_v23 }
 0x555   : > { %5838 = vset.pattern.permute.xlu1 %v8714_v30  ;;  %v1998_v18 = vpop.f32.mrb[21].mxu0  ;;  %5441 = vmatprep.subr.bf16.mxu0 %v5440_v8  ;;  %v5448_v21 = vpack.c.bf16 %v5821_v24, %v5820_v22 }
 0x556   : > { %2243 = vperm.xlu1 %5838, %v1978_v2   ;;  %2208 = vperm.xlu0 %5839, %v1998_v18   ;;  %v5824_v9 = vpop.permute.xlu0 %5823 }
 0x557   : > { %v5826_v52 = vunpack.i.h.bf16 %v5824_v9  ;;  %v5825_v47 = vunpack.i.l.bf16 %v5824_v9  ;;  %v8716_v9 = vld [vmem:[#allocation56_spill] sm:$0xff] }
 0x558   : > { %v5015_v19 = vpop.f32.mrb[22].mxu0  ;;  %5443 = vmatpush3.bf16.msra.mxu0 %v5440_v8 }
 0x559   : > { %v2008_v37 = vpop.f32.mrb[23].mxu0  ;;  %5445 = vmatprep.subr.bf16.mxu0 %v5444_v38  ;;  %v5452_v39 = vpack.c.bf16 %v5826_v52, %v5825_v47 }
 0x55a   : > { %2255 = vperm.xlu1 %5838, %v5009_v17   ;;  %5844 = vset.pattern.permute.xlu0 %v8714_v30  ;;  %v5829_v61 = vpop.permute.xlu0 %5828  ;;  %v5460_v17 = vpack.c.bf16 %v5836_v57, %v5835_v54 }
 0x55b   : > { %2259 = vperm.xlu0 %5844, %v1998_v18   ;;  %v5831_v51 = vunpack.i.h.bf16 %v5829_v61  ;;  %v5830_v49 = vunpack.i.l.bf16 %v5829_v61  ;;  %v8717_v61 = vld [vmem:[#allocation57_spill] sm:$0xff] }
 0x55c   : > { %5447 = vmatpush3.bf16.msra.mxu0 %v5444_v38 }
 0x55d   : > { %5449 = vmatprep.subr.bf16.mxu0 %v5448_v21  ;;  %v5456_v2 = vpack.c.bf16 %v5831_v51, %v5830_v49 }
 0x55e   : > { %5840 = vset.pattern.permute.xlu1 %v8713_v36 }
 0x55f   : > { %2198 = vperm.xlu1 %5840, %v1988_v62   ;;  %5845 = vset.pattern.permute.xlu0 %v8713_v36 }
 0x560   : > { %2223 = vperm.xlu0 %5845, %v5015_v19   ;;  %5451 = vmatpush3.bf16.msra.mxu0 %v5448_v21 }
 0x561   : > { %5453 = vmatprep.subr.bf16.mxu0 %v5452_v39 }
 0x563   : > { %5841 = vset.pattern.permute.xlu1 %v8714_v30 }
 0x564   : > { %2251 = vperm.xlu1 %5841, %v1988_v62   ;;  %5455 = vmatpush3.bf16.msra.mxu0 %v5452_v39 }
 0x565   : > { %5457 = vmatprep.subr.bf16.mxu0 %v5456_v2 }
 0x568   : > { %5842 = vset.pattern.permute.xlu1 %v8713_v36  ;;  %5459 = vmatpush3.bf16.msra.mxu0 %v5456_v2 }
 0x569   : > { %2213 = vperm.xlu1 %5842, %v5012_v60   ;;  %5461 = vmatprep.subr.bf16.mxu0 %v5460_v17 }
 0x56c   : > { %5463 = vmatpush3.bf16.msra.mxu0 %v5460_v17  ;;  %v8718_v17 = vld [vmem:[#allocation62_spill] sm:$0xff] }
 0x56d   : > { %5843 = vset.pattern.permute.xlu1 %v8714_v30  ;;  %5466 = vmatprep.subr.msk.bf16.mxu0 %vm6910_vm1, %v7370_v1 }
 0x56e   : > { %2263 = vperm.xlu1 %5843, %v5012_v60  }
 0x572   : > { %2271 = vperm.xlu1 %5843, %v5015_v19  }
 0x576   : > { %5846 = vset.pattern.permute.xlu1 %v8713_v36 }
 0x577   : > { %2218 = vperm.xlu1 %5846, %v2008_v37  }
 0x57b   : > { %5847 = vset.pattern.permute.xlu1 %v8714_v30 }
 0x57c   : > { %2267 = vperm.xlu1 %5847, %v2008_v37  }
 0x580   : > { %5888 = vset.pattern.permute.xlu1 %v8713_v36 }
 0x5cc   : > { %v2194_v34 = vpop.permute.xlu1 %2193  ;;  %v2248_v50 = vpop.permute.xlu0 %2247 }
 0x5cd   : > { %v2227_v22 = vmul.f32 %v7248_v40, %v2194_v34 }
 0x5d0   : > { %v2189_v53 = vpop.permute.xlu1 %2188 }
 0x5d1   : > { %v2204_v38 = vpop.permute.xlu0 %2203  ;;  %v2226_v21 = vmul.f32 %v7256_v42, %v2189_v53 }
 0x5d2   : > { %v2229_v54 = vmul.f32 %v7307_v15, %v2204_v38 }
 0x5d5   : > { %v4990_v60 = vpop.f32.mrb[16].mxu1 }
 0x5d6   : > { %v7572_v13 = vadd.f32 %v4990_v60, %v7463_v26  ;;  %v1653_v18 = vpop.f32.mrb[17].mxu1 }
 0x5d7   : > { %v7575_v19 = vadd.f32 %v1653_v18, %v7467_v3  ;;  %v2244_v3 = vpop.permute.xlu1 %2243 }
 0x5db   : > { %v2256_v23 = vpop.permute.xlu1 %2255 }
 0x5df   : > { %v2199_v8 = vpop.permute.xlu1 %2198 }
 0x5e4   : > { %v4993_v14 = vpop.f32.mrb[18].mxu1 }
 0x5e5   : > { %v7578_v32 = vadd.f32 %v4993_v14, %v7516_v0  ;;  %v1663_v37 = vpop.f32.mrb[19].mxu1 }
 0x5e6   : > { %v7581_v33 = vadd.f32 %v1663_v37, %v7521_v11  ;;  %v8719_v37 = vld [vmem:[#allocation61_spill] sm:$0xff] }
 0x5f5   : > { %v4996_v31 = vpop.f32.mrb[20].mxu1 }
 0x5f6   : > { %v7584_v35 = vadd.f32 %v4996_v31, %v7527_v5  ;;  %v1673_v27 = vpop.f32.mrb[21].mxu1  ;;  %v2252_v5 = vpop.permute.xlu1 %2251 }
 0x5f7   : > { %v7587_v26 = vadd.f32 %v1673_v27, %v7529_v63  ;;  %v2209_v63 = vpop.permute.xlu0 %2208  ;;  %v2277_v27 = vmul.f32 %v7319_v41, %v2256_v23  ;;  %v2276_v23 = vmul.f32 %v7302_v58, %v2252_v5 }
 0x5f8   : > { %v2230_v38 = vmul.f32 %v7313_v4, %v2209_v63 }
 0x5fa   : > { %v2214_v2 = vpop.permute.xlu1 %2213 }
 0x5fb   : > { %v2260_v53 = vpop.permute.xlu0 %2259 }
 0x609   : > { %v4999_v46 = vpop.f32.mrb[22].mxu1 }
 0x60a   : > { %v7590_v0 = vadd.f32 %v4999_v46, %v7537_v45  ;;  %v1683_v29 = vpop.f32.mrb[23].mxu1  ;;  %v2275_v45 = vmul.f32 %v7250_v20, %v2248_v50  ;;  %v2228_v50 = vmul.f32 %v7294_v10, %v2199_v8 }
 0x60b   : > { %v7593_v11 = vadd.f32 %v1683_v29, %v7539_v48  ;;  %v2274_v48 = vmul.f32 %v7259_v43, %v2244_v3 }
 0x615   : > { %v5050_v24 = vpop.f32.mrb[24].mxu1 }
 0x616   : > { %v2153_v52 = vadd.f32 %v5050_v24, %v8716_v9  ;;  %v2147_v47 = vpop.f32.mrb[25].mxu1 }
 0x617   : > { %v2148_v51 = vadd.f32 %v2147_v47, %v8717_v61  ;;  %v8720_v47 = vld [vmem:[#allocation63_spill] sm:$0xff] }
 0x618   : > { %v2235_v49 = vadd.f32 %v2227_v22, %v2153_v52 }
 0x619   : > { %v2234_v39 = vadd.f32 %v2226_v21, %v2148_v51  ;;  %v5053_v57 = vpop.f32.mrb[26].mxu1  ;;  %v2264_v51 = vpop.permute.xlu1 %2263 }
 0x61a   : > { %v2163_v60 = vadd.f32 %v5053_v57, %v8718_v17  ;;  %v2157_v18 = vpop.f32.mrb[27].mxu1  ;;  %v2283_v14 = vadd.f32 %v2275_v45, %v2235_v49  ;;  %v2278_v45 = vmul.f32 %v7329_v59, %v2260_v53  ;;  %v2231_v49 = vmul.f32 %v7326_v28, %v2214_v2 }
 0x61b   : > { %v2158_v31 = vadd.f32 %v2157_v18, %v8719_v37  ;;  %v2282_v34 = vadd.f32 %v2274_v48, %v2234_v39  ;;  %v2224_v39 = vpop.permute.xlu0 %2223 }
 0x61c   : > { %v2237_v46 = vadd.f32 %v2229_v54, %v2163_v60  ;;  %2292 = vmax.xlane.f32.xlu1 %v2283_v14  ;;  %v8721_v60 = vld [vmem:[#allocation69_spill] sm:$0xff] }
 0x61d   : > { %v5056_v3 = vpop.f32.mrb[28].mxu1  ;;  %2290 = vmax.xlane.f32.xlu0 %v2282_v34  ;;  %v2236_v22 = vadd.f32 %v2228_v50, %v2158_v31  ;;  %v2272_v53 = vpop.permute.xlu1 %2271 }
 0x61e   : > { %v2167_v29 = vpop.f32.mrb[29].mxu1  ;;  %v2285_v24 = vadd.f32 %v2277_v27, %v2237_v46  ;;  %v2173_v52 = vadd.f32 %v5056_v3, %v7331_v12  ;;  %v2233_v27 = vmul.f32 %v7355_v56, %v2224_v39  ;;  %v2279_v46 = vmul.f32 %v7344_v44, %v2264_v51 }
 0x61f   : > { %v2168_v21 = vadd.f32 %v2167_v29, %v8720_v47  ;;  %v2284_v31 = vadd.f32 %v2276_v23, %v2236_v22  ;;  %v2281_v2 = vmul.f32 %v7361_v25, %v2272_v53  ;;  %v8722_v29 = vld [vmem:[#allocation40_spill] sm:$0xff] }
 0x620   : > { %v2239_v54 = vadd.f32 %v2231_v49, %v2173_v52  ;;  %v6101_v22 = vld [vmem:[#allocation8] sm:$0xff]  ;;  %v6102_v52 = vld [vmem:[#allocation8 + $0x8] sm:$0xff] }
 0x621   : > { %v2238_v48 = vadd.f32 %v2230_v38, %v2168_v21  ;;  %v5059_v8 = vpop.f32.mrb[30].mxu1  ;;  %2296 = vmax.xlane.f32.xlu0 %v2285_v24  ;;  %v8723_v38 = vld [vmem:[#allocation44_spill] sm:$0xff]  ;;  %v7623_v21 = vpack.i.bf16 %v6102_v52, %v6101_v22  ;;  %v2219_v51 = vpop.permute.xlu1 %2218 }
 0x622   : > { %v2177_v57 = vpop.f32.mrb[31].mxu1  ;;  %v2183_v63 = vadd.f32 %v5059_v8, %v8721_v60  ;;  %v2287_v50 = vadd.f32 %v2279_v46, %v2239_v54  ;;  %v2232_v49 = vmul.f32 %v7338_v55, %v2219_v51 }
 0x623   : > { %v2286_v18 = vadd.f32 %v2278_v45, %v2238_v48  ;;  %v8724_v45 = vld [vmem:[#allocation65_spill] sm:$0xff] }
 0x624   : > { %v2241_v5 = vadd.f32 %v2233_v27, %v2183_v63  ;;  %v2178_v23 = vadd.f32 %v2177_v57, %v8724_v45 }
 0x625   : > { %2298 = vmax.xlane.f32.xlu1 %v2286_v18  ;;  %2294 = vmax.xlane.f32.xlu0 %v2284_v31  ;;  %v2268_v48 = vpop.permute.xlu1 %2267 }
 0x626   : > { %v7616_v3 = vadd.f32 %v2281_v2, %v2241_v5  ;;  %v2240_v8 = vadd.f32 %v2232_v49, %v2178_v23  ;;  %v2280_v39 = vmul.f32 %v7346_v7, %v2268_v48 }
 0x628   : > { %v7630_v54 = vadd.f32 %v2280_v39, %v2240_v8 }
 0x629   : > { %2300 = vmax.xlane.f32.xlu0 %v2287_v50 }
 0x62d   : > { %2304 = vmax.xlane.f32.xlu0 %v7616_v3 }
 0x636   : > { %2911 = vrot.lane.b32.xlu1 %v8722_v29, %s6483_s22 }
 0x63a   : > { %2913 = vrot.lane.b32.xlu1 %v8723_v38, %s6483_s22 }
 0x643   : > { %5849 = vrot.lane.b32.xlu0 %v7623_v21, %s6483_s22 }
 0x65e   : > { %2302 = vmax.xlane.f32.xlu1 %v7630_v54 }
 0x6a9   : > { %v2293_v63 = vpop.xlane.xlu1 %2292 }
 0x6aa   : > { %v2307_v27 = vmax.f32 %v2293_v63, 0.0  ;;  %v2291_v46 = vpop.xlane.xlu0 %2290 }
 0x6ab   : > { %v2306_v53 = vmax.f32 %v2291_v46, 0.0 }
 0x6ac   : > { %v2315_v5 = vsub.f32 %v2283_v14, %v2307_v27 }
 0x6ad   : > { %v2314_v2 = vsub.f32 %v2282_v34, %v2306_v53 }
 0x6ae   : > { %v2324_v29 = vmul.f32 1.442695, %v2315_v5  ;;  %v2297_v38 = vpop.xlane.xlu0 %2296 }
 0x6af   : > { %v2322_v22 = vmul.f32 1.442695, %v2314_v2  ;;  %v2309_v57 = vmax.f32 %v2297_v38, 0.0 }
 0x6b0   : > { %5973 = vpow2.f32 %v2324_v29 }
 0x6b1   : > { %5975 = vpow2.f32 %v2322_v22  ;;  %v2317_v52 = vsub.f32 %v2285_v24, %v2309_v57 }
 0x6b2   : > { %v2299_v51 = vpop.xlane.xlu1 %2298  ;;  %v2295_v23 = vpop.xlane.xlu0 %2294 }
 0x6b3   : > { %v2310_v49 = vmax.f32 %v2299_v51, 0.0  ;;  %v2308_v48 = vmax.f32 %v2295_v23, 0.0  ;;  %v2328_v8 = vmul.f32 1.442695, %v2317_v52 }
 0x6b5   : > { %v2318_v39 = vsub.f32 %v2286_v18, %v2310_v49  ;;  %v2316_v45 = vsub.f32 %v2284_v31, %v2308_v48  ;;  %5977 = vpow2.f32 %v2328_v8 }
 0x6b6   : > { %v2301_v60 = vpop.xlane.xlu0 %2300 }
 0x6b7   : > { %v2326_v63 = vmul.f32 1.442695, %v2316_v45  ;;  %v2311_v12 = vmax.f32 %v2301_v60, 0.0  ;;  %v2330_v46 = vmul.f32 1.442695, %v2318_v39 }
 0x6b9   : > { %v2319_v14 = vsub.f32 %v2287_v50, %v2311_v12  ;;  %5979 = vpow2.f32 %v2326_v63 }
 0x6ba   : > { %v5974_v34 = vpop.eup %5973  ;;  %v2305_v27 = vpop.xlane.xlu0 %2304  ;;  %5981 = vpow2.f32 %v2330_v46 }
 0x6bb   : > { %v5976_v53 = vpop.eup %5975  ;;  %v2332_v5 = vmul.f32 1.442695, %v2319_v14  ;;  %2340 = vadd.xlane.f32.xlu0 %v5974_v34  ;;  %v2556_v24 = vmul.f32 %v5974_v34, %v7250_v20  ;;  %v2532_v18 = vmul.f32 %v5974_v34, %v7248_v40  ;;  %v2313_v57 = vmax.f32 %v2305_v27, 0.0 }
 0x6bc   : > { %2338 = vadd.xlane.f32.xlu1 %v5976_v53  ;;  %5092 = vmatprep.mubr.f32.mxu0 %v5976_v53  ;;  %v2531_v50 = vmul.f32 %v5976_v53, %v7256_v42 }
 0x6bd   : > { %5983 = vpow2.f32 %v2332_v5  ;;  %5093 = vmatmul.mubr.f32.vlgmr.msra.gmra.mrb[24].mxu0 %v5974_v34  ;;  %v2321_v23 = vsub.f32 %v7616_v3, %v2313_v57  ;;  %v7653_v34 = vpop.permute.xlu1 %2911  ;;  %v6103_v57 = vld [vmem:[#allocation8 + $0x10] sm:$0xff] }
 0x6be   : > { %v5850_v31 = vpop.permute.xlu0 %5849  ;;  %5469 = vmatpush3.bf16.xpose.msk.msra.mxu0 %vm6910_vm1, %v7370_v1  ;;  %v2555_v1 = vmul.f32 %v5976_v53, %v7259_v43 }
 0x6bf   : > { %2565 = vadd.xlane.f32.xlu0 %v2556_v24  ;;  %v5852_v12 = vunpack.i.h.bf16 %v5850_v31  ;;  %v5851_v60 = vunpack.i.l.bf16 %v5850_v31  ;;  %v5978_v2 = vpop.eup %5977  ;;  %v2336_v8 = vmul.f32 1.442695, %v2321_v23  ;;  %v8725_v24 = vld [vmem:[#allocation48_spill] sm:$0xff]  ;;  %v8728_v23 = vld [vmem:[#allocation51_spill] sm:$0xff] }
 0x6c0   : > { %2541 = vadd.xlane.f32.xlu1 %v2532_v18  ;;  %v2558_v52 = vmul.f32 %v5978_v2, %v7319_v41  ;;  %v2534_v51 = vmul.f32 %v5978_v2, %v7307_v15 }
 0x6c1   : > { %v5474_v45 = vpack.c.bf16 %v5852_v12, %v5851_v60  ;;  %5985 = vpow2.f32 %v2336_v8  ;;  %v7655_v27 = vpop.permute.xlu1 %2913  ;;  %v8726_v12 = vld [vmem:[#allocation43_spill] sm:$0xff] }
 0x6c3   : > { %2539 = vadd.xlane.f32.xlu0 %v2531_v50  ;;  %5476 = vmatprep.subr.msk.bf16.mxu1 %vm7046_vm3, %v5474_v45  ;;  %v5980_v29 = vpop.eup %5979 }
 0x6c4   : > { %2344 = vadd.xlane.f32.xlu1 %v5978_v2  ;;  %5479 = vmatpush3.bf16.xpose.msk.msra.mxu1 %vm7046_vm3, %v5474_v45  ;;  %v5982_v38 = vpop.eup %5981  ;;  %v2557_v49 = vmul.f32 %v5980_v29, %v7302_v58  ;;  %v2533_v48 = vmul.f32 %v5980_v29, %v7294_v10 }
 0x6c5   : > { %5095 = vmatprep.mubr.f32.mxu0 %v5980_v29  ;;  %v2559_v46 = vmul.f32 %v5982_v38, %v7329_v59  ;;  %v2535_v3 = vmul.f32 %v5982_v38, %v7313_v4 }
 0x6c6   : > { %5096 = vmatmul.mubr.f32.gmra.mrb[26].mxu0 %v5978_v2 }
 0x6c7   : > { %v5984_v22 = vpop.eup %5983  ;;  %5098 = vmatprep.mubr.f32.mxu0 %v5982_v38  ;;  %2563 = vadd.xlane.f32.xlu0 %v2555_v1  ;;  %v2908_v1 = vld [vmem:[#allocation13 + $0x28] sm:$0xff] }
 0x6c8   : > { %2342 = vadd.xlane.f32.xlu1 %v5980_v29  ;;  %v2560_v39 = vmul.f32 %v5984_v22, %v7344_v44  ;;  %v2536_v63 = vmul.f32 %v5984_v22, %v7326_v28 }
 0x6ca   : > { %5099 = vmatmul.mubr.f32.gmra.mrb[28].mxu0 %v5984_v22 }
 0x6cb   : > { %2569 = vadd.xlane.f32.xlu0 %v2558_v52  ;;  %v5986_v14 = vpop.eup %5985  ;;  %v6104_v52 = vld [vmem:[#allocation8 + $0x18] sm:$0xff] }
 0x6cc   : > { %2545 = vadd.xlane.f32.xlu1 %v2534_v51  ;;  %v2562_v50 = vmul.f32 %v5986_v14, %v7361_v25  ;;  %v2538_v45 = vmul.f32 %v5986_v14, %v7355_v56  ;;  %v7671_v51 = vpack.i.bf16 %v6104_v52, %v6103_v57  ;;  %v8736_v57 = vld [vmem:[#allocation42_spill] sm:$0xff]  ;;  %v8737_v52 = vld [vmem:[#allocation45_spill] sm:$0xff] }
 0x6cf   : > { %2567 = vadd.xlane.f32.xlu0 %v2557_v49  ;;  %v6105_v49 = vld [vmem:[#allocation8 + $0x30] sm:$0xff] }
 0x6d0   : > { %2543 = vadd.xlane.f32.xlu1 %v2533_v48  ;;  %v6106_v48 = vld [vmem:[#allocation8 + $0x38] sm:$0xff] }
 0x6d1   : > { %v7677_v8 = vpack.i.bf16 %v6106_v48, %v6105_v49 }
 0x6d3   : > { %2348 = vadd.xlane.f32.xlu0 %v5984_v22  ;;  %v8727_v22 = vld [vmem:[#allocation47_spill] sm:$0xff] }
 0x6d4   : > { %2346 = vadd.xlane.f32.xlu1 %v5982_v38 }
 0x6d7   : > { %2573 = vadd.xlane.f32.xlu0 %v2560_v39  ;;  %v8729_v39 = vld [vmem:[#allocation52_spill] sm:$0xff] }
 0x6d8   : > { %2549 = vadd.xlane.f32.xlu1 %v2536_v63  ;;  %v6107_v63 = vld [vmem:[#allocation8 + $0x20] sm:$0xff] }
 0x6db   : > { %2571 = vadd.xlane.f32.xlu0 %v2559_v46  ;;  %v6108_v46 = vld [vmem:[#allocation8 + $0x28] sm:$0xff] }
 0x6dc   : > { %2547 = vadd.xlane.f32.xlu1 %v2535_v3  ;;  %v7683_v3 = vpack.i.bf16 %v6108_v46, %v6107_v63  ;;  %v8738_v63 = vld [vmem:[#allocation46_spill] sm:$0xff]  ;;  %v8739_v46 = vld [vmem:[#allocation49_spill] sm:$0xff] }
 0x6df   : > { %2352 = vadd.xlane.f32.xlu0 %v5986_v14 }
 0x6eb   : > { %v2303_v53 = vpop.xlane.xlu1 %2302 }
 0x6ec   : > { %v2312_v5 = vmax.f32 %v2303_v53, 0.0  ;;  %v6110_v53 = vld [vmem:[#allocation8 + $0x58] sm:$0xff] }
 0x6ed   : > { %2917 = vrot.lane.b32.xlu1 %v8725_v24, %s6483_s22  ;;  %v6111_v24 = vld [vmem:[#allocation8 + $0x40] sm:$0xff] }
 0x6ee   : > { %v2320_v18 = vsub.f32 %v7630_v54, %v2312_v5  ;;  %v2907_v54 = vld [vmem:[#allocation13 + $0x20] sm:$0xff] }
 0x6ef   : > { %v7666_v38 = vpack.c.bf16 %v2908_v1, %v2907_v54  ;;  %v8733_v54 = vld [vmem:[#allocation38_spill] sm:$0xff]  ;;  %v8734_v1 = vld [vmem:[#allocation39_spill] sm:$0xff] }
 0x6f0   : > { %v2334_v31 = vmul.f32 1.442695, %v2320_v18  ;;  %v6112_v18 = vld [vmem:[#allocation8 + $0x48] sm:$0xff] }
 0x6f1   : > { %5471 = vmatprep.subr.bf16.mxu0 %v7666_v38 }
 0x6f2   : > { %5987 = vpow2.f32 %v2334_v31  ;;  %v7691_v31 = vpack.i.bf16 %v6112_v18, %v6111_v24  ;;  %v8740_v24 = vld [vmem:[#allocation50_spill] sm:$0xff] }
 0x6f5   : > { %2915 = vrot.lane.b32.xlu0 %v8726_v12, %s6483_s22  ;;  %v6113_v12 = vld [vmem:[#allocation8 + $0x70] sm:$0xff] }
 0x6fc   : > { %v5988_v60 = vpop.eup %5987 }
 0x6fd   : > { %5101 = vmatprep.mubr.f32.mxu0 %v5988_v60  ;;  %v2561_v2 = vmul.f32 %v5988_v60, %v7346_v7  ;;  %v2537_v29 = vmul.f32 %v5988_v60, %v7338_v55 }
 0x6fe   : > { %5102 = vmatmul.mubr.f32.gmra.mrb[30].mxu0 %v5986_v14  ;;  %v6109_v14 = vld [vmem:[#allocation8 + $0x50] sm:$0xff] }
 0x6ff   : > { %v7685_v5 = vpack.i.bf16 %v6110_v53, %v6109_v14 }
 0x701   : > { %8730 = vst [vmem:[#allocation54_spill] sm:$0xff] %v7685_v5 }
 0x711   : > { %2350 = vadd.xlane.f32.xlu1 %v5988_v60  ;;  %v6114_v60 = vld [vmem:[#allocation8 + $0x78] sm:$0xff] }
 0x714   : > { %2577 = vadd.xlane.f32.xlu0 %v2562_v50  ;;  %v7693_v50 = vpack.i.bf16 %v6114_v60, %v6113_v12 }
 0x715   : > { %2553 = vadd.xlane.f32.xlu1 %v2538_v45  ;;  %v6115_v45 = vld [vmem:[#allocation8 + $0x60] sm:$0xff] }
 0x716   : > { %8731 = vst [vmem:[#allocation53_spill] sm:$0xff] %v7693_v50 }
 0x718   : > { %2575 = vadd.xlane.f32.xlu0 %v2561_v2  ;;  %v6116_v2 = vld [vmem:[#allocation8 + $0x68] sm:$0xff] }
 0x719   : > { %2551 = vadd.xlane.f32.xlu1 %v2537_v29  ;;  %v7699_v29 = vpack.i.bf16 %v6116_v2, %v6115_v45 }
 0x71b   : > { %8732 = vst [vmem:[#allocation37_spill] sm:$0xff] %v7699_v29 }
 0x72a   : > { %2919 = vrot.lane.b32.xlu1 %v8727_v22, %s6483_s22  ;;  %v8735_v22 = vld [vmem:[#allocation41_spill] sm:$0xff] }
 0x72e   : > { %5854 = vrot.lane.b32.xlu0 %v7671_v51, %s6483_s22  ;;  %2923 = vrot.lane.b32.xlu1 %v8728_v23, %s6483_s22 }
 0x732   : > { %2921 = vrot.lane.b32.xlu0 %v8729_v39, %s6483_s22  ;;  %5864 = vrot.lane.b32.xlu1 %v7677_v8, %s6483_s22 }
 0x736   : > { %5859 = vrot.lane.b32.xlu0 %v7683_v3, %s6483_s22  ;;  %5874 = vrot.lane.b32.xlu1 %v7685_v5, %s6483_s22 }
 0x73a   : > { %5869 = vrot.lane.b32.xlu0 %v7691_v31, %s6483_s22  ;;  %5884 = vrot.lane.b32.xlu1 %v7693_v50, %s6483_s22 }
 0x73e   : > { %5879 = vrot.lane.b32.xlu0 %v7699_v29, %s6483_s22  ;;  %1718 = vrot.lane.b32.xlu1 %v8733_v54, %s6478_s24 }
 0x742   : > { %1716 = vrot.lane.b32.xlu0 %v8734_v1, %s6478_s24  ;;  %1722 = vrot.lane.b32.xlu1 %v8735_v22, %s6478_s24 }
 0x746   : > { %1720 = vrot.lane.b32.xlu0 %v8736_v57, %s6478_s24  ;;  %1726 = vrot.lane.b32.xlu1 %v8737_v52, %s6478_s24 }
 0x748   : > { %v2341_v23 = vpop.xlane.xlu0 %2340 }
 0x749   : > { %v2355_v49 = vmax.f32 %v2341_v23, 1e-30  ;;  %v2339_v48 = vpop.xlane.xlu1 %2338 }
 0x74a   : > { %v2354_v39 = vmax.f32 %v2339_v48, 1e-30  ;;  %1724 = vrot.lane.b32.xlu0 %v8738_v63, %s6478_s24  ;;  %1730 = vrot.lane.b32.xlu1 %v8739_v46, %s6478_s24 }
 0x74b   : > { %5989 = vrcp.f32 %v2355_v49 }
 0x74c   : > { %5991 = vrcp.f32 %v2354_v39  ;;  %v2566_v14 = vpop.xlane.xlu0 %2565 }
 0x74d   : > { %v2542_v53 = vpop.xlane.xlu1 %2541 }
 0x74e   : > { %1728 = vrot.lane.b32.xlu0 %v8740_v24, %s6478_s24  ;;  %v2580_v22 = vsel %vm1540_vm4, %v2542_v53, %v2566_v14 }
 0x750   : > { %v2540_v18 = vpop.xlane.xlu0 %2539 }
 0x751   : > { %v2345_v12 = vpop.xlane.xlu1 %2344 }
 0x752   : > { %v2357_v60 = vmax.f32 %v2345_v12, 1e-30 }
 0x754   : > { %v2564_v45 = vpop.xlane.xlu0 %2563  ;;  %5993 = vrcp.f32 %v2357_v60 }
 0x755   : > { %v5990_v2 = vpop.eup %5989  ;;  %v2579_v23 = vsel %vm1540_vm4, %v2540_v18, %v2564_v45  ;;  %v2343_v48 = vpop.xlane.xlu1 %2342 }
 0x756   : > { %v5992_v52 = vpop.eup %5991  ;;  %v2356_v63 = vmax.f32 %v2343_v48, 1e-30  ;;  %v2588_v39 = vmul.f32 %v5990_v2, %v2580_v22 }
 0x757   : > { %v2587_v49 = vmul.f32 %v5992_v52, %v2579_v23 }
 0x758   : > { %5995 = vrcp.f32 %v2356_v63  ;;  %v2570_v46 = vpop.xlane.xlu0 %2569 }
 0x759   : > { %v2546_v54 = vpop.xlane.xlu1 %2545  ;;  %5108 = vmatprep.mubr.msk.f32.mxu0 %vm672_vm0, %v2587_v49 }
 0x75a   : > { %5109 = vmatmul.mubr.msk.f32.vlgmr.msra.gmra.mrb[32].mxu0 %vm672_vm0, %v2588_v39  ;;  %v2582_v22 = vsel %vm1540_vm4, %v2546_v54, %v2570_v46 }
 0x75b   : > { %5473 = vmatpush3.bf16.msra.mxu0 %v7666_v38 }
 0x75c   : > { %v2568_v12 = vpop.xlane.xlu0 %2567 }
 0x75d   : > { %v2544_v24 = vpop.xlane.xlu1 %2543 }
 0x75e   : > { %v5994_v45 = vpop.eup %5993  ;;  %v2581_v14 = vsel %vm1540_vm4, %v2544_v24, %v2568_v12 }
 0x75f   : > { %v2590_v60 = vmul.f32 %v5994_v45, %v2582_v22 }
 0x760   : > { %v2349_v18 = vpop.xlane.xlu0 %2348 }
 0x761   : > { %v2359_v57 = vmax.f32 %v2349_v18, 1e-30  ;;  %v2347_v48 = vpop.xlane.xlu1 %2346 }
 0x762   : > { %v5996_v1 = vpop.eup %5995  ;;  %v2358_v53 = vmax.f32 %v2347_v48, 1e-30 }
 0x763   : > { %v2589_v63 = vmul.f32 %v5996_v1, %v2581_v14  ;;  %5997 = vrcp.f32 %v2359_v57 }
 0x764   : > { %5999 = vrcp.f32 %v2358_v53  ;;  %v2574_v23 = vpop.xlane.xlu0 %2573 }
 0x765   : > { %v2550_v49 = vpop.xlane.xlu1 %2549  ;;  %5111 = vmatprep.mubr.msk.f32.mxu0 %vm672_vm0, %v2589_v63 }
 0x766   : > { %5112 = vmatmul.mubr.msk.f32.gmra.mrb[34].mxu0 %vm672_vm0, %v2590_v60  ;;  %v2584_v24 = vsel %vm1540_vm4, %v2550_v49, %v2574_v23 }
 0x768   : > { %v2572_v39 = vpop.xlane.xlu0 %2571 }
 0x769   : > { %v2548_v50 = vpop.xlane.xlu1 %2547 }
 0x76a   : > { %v2583_v5 = vsel %vm1540_vm4, %v2548_v50, %v2572_v39 }
 0x76c   : > { %v2353_v53 = vpop.xlane.xlu0 %2352 }
 0x76d   : > { %v5998_v18 = vpop.eup %5997  ;;  %v7736_v63 = vpop.permute.xlu1 %2917  ;;  %v2361_v39 = vmax.f32 %v2353_v53, 1e-30 }
 0x76e   : > { %v6000_v29 = vpop.eup %5999  ;;  %v2592_v54 = vmul.f32 %v5998_v18, %v2584_v24 }
 0x76f   : > { %v2591_v12 = vmul.f32 %v6000_v29, %v2583_v5 }
 0x770   : > { %v7742_v5 = vpop.permute.xlu0 %2915 }
 0x771   : > { %5114 = vmatprep.mubr.msk.f32.mxu0 %vm672_vm0, %v2591_v12 }
 0x772   : > { %5115 = vmatmul.mubr.msk.f32.gmra.mrb[36].mxu0 %vm672_vm0, %v2592_v54 }
 0x790   : > { %v5094_v57 = vpop.f32.mrb[24].mxu0 }
 0x791   : > { %v7732_v46 = vmul.f32 %v5990_v2, %v5094_v57  ;;  %v2484_v48 = vpop.f32.mrb[25].mxu0 }
 0x792   : > { %v7734_v14 = vmul.f32 %v5992_v52, %v2484_v48 }
 0x799   : > { %v5097_v22 = vpop.f32.mrb[26].mxu0 }
 0x79a   : > { %v7738_v60 = vmul.f32 %v5994_v45, %v5097_v22  ;;  %v2494_v50 = vpop.f32.mrb[27].mxu0 }
 0x79b   : > { %v7740_v23 = vmul.f32 %v5996_v1, %v2494_v50 }
 0x79d   : > { %v5100_v49 = vpop.f32.mrb[28].mxu0 }
 0x79e   : > { %v7744_v24 = vmul.f32 %v5998_v18, %v5100_v49  ;;  %v2504_v2 = vpop.f32.mrb[29].mxu0  ;;  %v2351_v12 = vpop.xlane.xlu1 %2350 }
 0x79f   : > { %v7746_v54 = vmul.f32 %v6000_v29, %v2504_v2  ;;  %v2360_v52 = vmax.f32 %v2351_v12, 1e-30 }
 0x7a1   : > { %6001 = vrcp.f32 %v2360_v52  ;;  %v2578_v57 = vpop.xlane.xlu0 %2577 }
 0x7a2   : > { %6003 = vrcp.f32 %v2361_v39  ;;  %v2554_v48 = vpop.xlane.xlu1 %2553 }
 0x7a3   : > { %v2586_v1 = vsel %vm1540_vm4, %v2554_v48, %v2578_v57 }
 0x7a5   : > { %v2576_v45 = vpop.xlane.xlu0 %2575 }
 0x7a6   : > { %v2552_v22 = vpop.xlane.xlu1 %2551 }
 0x7a7   : > { %v2585_v53 = vsel %vm1540_vm4, %v2552_v22, %v2576_v45 }
 0x7a9   : > { %v5855_v7 = vpop.permute.xlu0 %5854 }
 0x7aa   : > { %v5857_v50 = vunpack.i.h.bf16 %v5855_v7  ;;  %v5856_v55 = vunpack.i.l.bf16 %v5855_v7  ;;  %v7749_v25 = vpop.permute.xlu1 %2919 }
 0x7ab   : > { %v7751_v18 = vpop.eup %6001 }
 0x7ac   : > { %v7754_v29 = vpop.eup %6003  ;;  %v2593_v49 = vmul.f32 %v7751_v18, %v2585_v53  ;;  %v5480_v2 = vpack.c.bf16 %v5857_v50, %v5856_v55 }
 0x7ad   : > { %v2594_v39 = vmul.f32 %v7754_v29, %v2586_v1  ;;  %v7758_v12 = vpop.permute.xlu0 %2921 }
 0x7ae   : > { %v7760_v52 = vpop.permute.xlu1 %2923  ;;  %5117 = vmatprep.mubr.msk.f32.mxu0 %vm672_vm0, %v2593_v49  ;;  %5482 = vmatprep.subr.msk.bf16.mxu1 %vm7046_vm3, %v5480_v2 }
 0x7af   : > { %5118 = vmatmul.mubr.msk.f32.gmra.mrb[38].mxu0 %vm672_vm0, %v2594_v39  ;;  %5485 = vmatpush3.bf16.xpose.msk.msra.mxu1 %vm7046_vm3, %v5480_v2 }
 0x7b0   : > { %5124 = vmatprep.mubr.msk.f32.mxu0 %vm864_vm2, %v7545_v6 }
 0x7b1   : > { %v5860_v55 = vpop.permute.xlu0 %5859 }
 0x7b2   : > { %v5862_v7 = vunpack.i.h.bf16 %v5860_v55  ;;  %v5861_v57 = vunpack.i.l.bf16 %v5860_v55  ;;  %v5865_v48 = vpop.permute.xlu1 %5864 }
 0x7b3   : > { %v5867_v45 = vunpack.i.h.bf16 %v5865_v48  ;;  %v5866_v22 = vunpack.i.l.bf16 %v5865_v48  ;;  %5125 = vmatmul.mubr.msk.f32.vlgmr.msra.gmra.mrb[40].mxu0 %vm864_vm2, %v7653_v34 }
 0x7b4   : > { %v5486_v1 = vpack.c.bf16 %v5862_v7, %v5861_v57  ;;  %5127 = vmatprep.mubr.msk.f32.mxu0 %vm864_vm2, %v7655_v27 }
 0x7b5   : > { %v5492_v50 = vpack.c.bf16 %v5867_v45, %v5866_v22  ;;  %v5870_v53 = vpop.permute.xlu0 %5869 }
 0x7b6   : > { %v5875_v49 = vpop.permute.xlu1 %5874  ;;  %5488 = vmatprep.subr.msk.bf16.mxu1 %vm7046_vm3, %v5486_v1  ;;  %v5872_v6 = vunpack.i.h.bf16 %v5870_v53  ;;  %v5871_v2 = vunpack.i.l.bf16 %v5870_v53 }
 0x7b7   : > { %5128 = vmatmul.mubr.msk.f32.gmra.mrb[42].mxu0 %vm864_vm2, %v7742_v5  ;;  %5491 = vmatpush3.bf16.xpose.msk.msra.mxu1 %vm7046_vm3, %v5486_v1  ;;  %v5877_v1 = vunpack.i.h.bf16 %v5875_v49  ;;  %v5876_v53 = vunpack.i.l.bf16 %v5875_v49 }
 0x7b8   : > { %5130 = vmatprep.mubr.msk.f32.mxu0 %vm864_vm2, %v7736_v63  ;;  %5494 = vmatprep.subr.msk.bf16.mxu1 %vm7046_vm3, %v5492_v50  ;;  %v5498_v7 = vpack.c.bf16 %v5872_v6, %v5871_v2 }
 0x7b9   : > { %v5880_v39 = vpop.permute.xlu0 %5879  ;;  %v5504_v49 = vpack.c.bf16 %v5877_v1, %v5876_v53 }
 0x7ba   : > { %v5885_v55 = vpop.permute.xlu1 %5884  ;;  %v5881_v1 = vunpack.i.l.bf16 %v5880_v39 }
 0x7bb   : > { %5131 = vmatmul.mubr.msk.f32.gmra.mrb[44].mxu0 %vm864_vm2, %v7749_v25 }
 0x7bc   : > { %5133 = vmatprep.mubr.msk.f32.mxu0 %vm864_vm2, %v7758_v12 }
 0x7bd   : > { %v1717_v57 = vpop.permute.xlu0 %1716 }
 0x7be   : > { %v7789_v48 = vadd.f32 %v1717_v57, %v7575_v19  ;;  %v1719_v45 = vpop.permute.xlu1 %1718 }
 0x7bf   : > { %v7792_v22 = vadd.f32 %v1719_v45, %v7572_v13  ;;  %5134 = vmatmul.mubr.msk.f32.gmra.mrb[46].mxu0 %vm864_vm2, %v7760_v52  ;;  %5497 = vmatpush3.bf16.xpose.msk.msra.mxu1 %vm7046_vm3, %v5492_v50 }
 0x7c0   : > { %8741 = vst [vmem:[#allocation36_spill] sm:$0xff] %v7789_v48  ;;  %v1748_v6 = vsel %vm864_vm2, %v7789_v48, 0.0  ;;  %5500 = vmatprep.subr.msk.bf16.mxu1 %vm7046_vm3, %v5498_v7 }
 0x7c1   : > { %1749 = vadd.xlane.f32.xlu1 %v1748_v6  ;;  %v1721_v19 = vpop.permute.xlu0 %1720  ;;  %v1751_v13 = vsel %vm864_vm2, %v7792_v22, 0.0 }
 0x7c2   : > { %v7805_v2 = vadd.f32 %v1721_v19, %v7581_v33  ;;  %1752 = vadd.xlane.f32.xlu0 %v1751_v13  ;;  %v1723_v57 = vpop.permute.xlu1 %1722  ;;  %v5886_v13 = vunpack.i.l.bf16 %v5885_v55 }
 0x7c3   : > { %v7808_v50 = vadd.f32 %v1723_v57, %v7578_v32  ;;  %v5882_v32 = vunpack.i.h.bf16 %v5880_v39 }
 0x7c4   : > { %v1754_v45 = vsel %vm864_vm2, %v7805_v2, 0.0 }
 0x7c5   : > { %1755 = vadd.xlane.f32.xlu1 %v1754_v45  ;;  %v1725_v48 = vpop.permute.xlu0 %1724  ;;  %v1757_v6 = vsel %vm864_vm2, %v7808_v50, 0.0 }
 0x7c6   : > { %v7815_v44 = vadd.f32 %v1725_v48, %v7587_v26  ;;  %1758 = vadd.xlane.f32.xlu0 %v1757_v6  ;;  %v1727_v33 = vpop.permute.xlu1 %1726  ;;  %v5510_v48 = vpack.c.bf16 %v5882_v32, %v5881_v1 }
 0x7c7   : > { %v7818_v19 = vadd.f32 %v1727_v33, %v7584_v35  ;;  %5503 = vmatpush3.bf16.xpose.msk.msra.mxu1 %vm7046_vm3, %v5498_v7  ;;  %v5887_v35 = vunpack.i.h.bf16 %v5885_v55 }
 0x7c8   : > { %v1760_v53 = vsel %vm864_vm2, %v7815_v44, 0.0  ;;  %5506 = vmatprep.subr.msk.bf16.mxu1 %vm7046_vm3, %v5504_v49 }
 0x7c9   : > { %1761 = vadd.xlane.f32.xlu1 %v1760_v53  ;;  %v1763_v26 = vsel %vm864_vm2, %v7818_v19, 0.0  ;;  %v5516_v6 = vpack.c.bf16 %v5887_v35, %v5886_v13 }
 0x7ca   : > { %1764 = vadd.xlane.f32.xlu0 %v1763_v26  ;;  %v1731_v35 = vpop.permute.xlu1 %1730 }
 0x7cf   : > { %5509 = vmatpush3.bf16.xpose.msk.msra.mxu1 %vm7046_vm3, %v5504_v49 }
 0x7d0   : > { %5512 = vmatprep.subr.msk.bf16.mxu1 %vm7046_vm3, %v5510_v48 }
 0x7d1   : > { %v5103_v39 = vpop.f32.mrb[30].mxu0 }
 0x7d2   : > { %v2530_v7 = vmul.f32 %v7754_v29, %v5103_v39  ;;  %v2514_v57 = vpop.f32.mrb[31].mxu0  ;;  %v7895_v39 = vadd.f32 %v1731_v35, %v7590_v0 }
 0x7d3   : > { %v2529_v45 = vmul.f32 %v7751_v18, %v2514_v57 }
 0x7d7   : > { %5515 = vmatpush3.bf16.xpose.msk.msra.mxu1 %vm7046_vm3, %v5510_v48 }
 0x7d8   : > { %5518 = vmatprep.subr.msk.bf16.mxu1 %vm7046_vm3, %v5516_v6 }
 0x7df   : > { %5521 = vmatpush3.bf16.xpose.msk.msra.mxu1 %vm7046_vm3, %v5516_v6  ;;  %v1769_v6 = vsel %vm864_vm2, %v7895_v39, 0.0 }
 0x7e0   : > { %5560 = vmatprep.subr.msk.bf16.mxu1 %vm6910_vm1, %v7666_v38 }
 0x7e6   : > { %5169 = vmatmul.mubr.msk.f32.vlgmr.msra.gmra.mrb[32].mxu1 %vm864_vm2, %v7653_v34 }
 0x7e7   : > { %5171 = vmatprep.mubr.msk.f32.mxu1 %vm864_vm2, %v7655_v27  ;;  %5561 = vmatpush3.bf16.xpose.msk.msra.mxu1 %vm6910_vm1, %v7666_v38 }
 0x7ea   : > { %5172 = vmatmul.mubr.msk.f32.gmra.mrb[34].mxu1 %vm864_vm2, %v7742_v5 }
 0x7eb   : > { %5174 = vmatprep.mubr.msk.f32.mxu1 %vm864_vm2, %v7736_v63 }
 0x7ee   : > { %5175 = vmatmul.mubr.msk.f32.gmra.mrb[36].mxu1 %vm864_vm2, %v7749_v25 }
 0x7ef   : > { %5177 = vmatprep.mubr.msk.f32.mxu1 %vm864_vm2, %v7758_v12 }
 0x7f2   : > { %5178 = vmatmul.mubr.msk.f32.gmra.mrb[38].mxu1 %vm864_vm2, %v7760_v52 }
 0x82d   : > { %v5110_v16 = vpop.f32.mrb[32].mxu0 }
 0x82e   : > { %v7861_v34 = vadd.f32 %v5110_v16, %v7732_v46  ;;  %v2691_v27 = vpop.f32.mrb[33].mxu0 }
 0x82f   : > { %v7864_v18 = vadd.f32 %v2691_v27, %v7734_v14 }
 0x839   : > { %v5113_v5 = vpop.f32.mrb[34].mxu0 }
 0x83a   : > { %v7867_v63 = vadd.f32 %v5113_v5, %v7738_v60  ;;  %v2701_v29 = vpop.f32.mrb[35].mxu0 }
 0x83b   : > { %v7870_v25 = vadd.f32 %v2701_v29, %v7740_v23 }
 0x845   : > { %v5116_v12 = vpop.f32.mrb[36].mxu0 }
 0x846   : > { %v7873_v55 = vadd.f32 %v5116_v12, %v7744_v24  ;;  %v2711_v52 = vpop.f32.mrb[37].mxu0 }
 0x847   : > { %v7876_v46 = vadd.f32 %v2711_v52, %v7746_v54 }
 0x848   : > { %8742 = vst [vmem:[#allocation56_spill] sm:$0xff] %v7873_v55 }
 0x882   : > { %v5119_v49 = vpop.f32.mrb[38].mxu0 }
 0x883   : > { %v7878_v33 = vadd.f32 %v5119_v49, %v2530_v7  ;;  %v2721_v14 = vpop.f32.mrb[39].mxu0 }
 0x884   : > { %v7880_v32 = vadd.f32 %v2721_v14, %v2529_v45 }
 0x885   : > { %8743 = vst [vmem:[#allocation57_spill] sm:$0xff] %v7878_v33 }
 0x886   : > { %8744 = vst [vmem:[#allocation62_spill] sm:$0xff] %v7880_v32  ;;  %v5126_v60 = vpop.f32.mrb[40].mxu0 }
 0x887   : > { %v3007_v1 = vpop.f32.mrb[41].mxu0  ;;  %3222 = vperm.xlu1 %5888, %v5126_v60  }
 0x888   : > { %3217 = vperm.xlu0 %5845, %v3007_v1  }
 0x88a   : > { %v5129_v23 = vpop.f32.mrb[42].mxu0 }
 0x88b   : > { %v3017_v53 = vpop.f32.mrb[43].mxu0  ;;  %5889 = vset.pattern.permute.xlu1 %v8714_v30 }
 0x88c   : > { %5890 = vset.pattern.permute.xlu0 %v8714_v30  ;;  %3276 = vperm.xlu1 %5889, %v5126_v60  }
 0x88d   : > { %3272 = vperm.xlu0 %5890, %v3007_v1  }
 0x88e   : > { %v5132_v24 = vpop.f32.mrb[44].mxu0 }
 0x88f   : > { %v3027_v54 = vpop.f32.mrb[45].mxu0 }
 0x890   : > { %3284 = vperm.xlu1 %5889, %v5129_v23  }
 0x891   : > { %5891 = vset.pattern.permute.xlu0 %v8713_v36 }
 0x892   : > { %3232 = vperm.xlu0 %5891, %v5129_v23   ;;  %v5135_v26 = vpop.f32.mrb[46].mxu0 }
 0x893   : > { %v3037_v48 = vpop.f32.mrb[47].mxu0 }
 0x894   : > { %5892 = vset.pattern.permute.xlu1 %v8713_v36 }
 0x895   : > { %3227 = vperm.xlu1 %5892, %v3017_v53  }
 0x896   : > { %3237 = vperm.xlu0 %5891, %v3027_v54  }
 0x899   : > { %5893 = vset.pattern.permute.xlu1 %v8714_v30 }
 0x89a   : > { %5896 = vset.pattern.permute.xlu0 %v8714_v30  ;;  %3280 = vperm.xlu1 %5893, %v3017_v53  }
 0x89b   : > { %3288 = vperm.xlu0 %5896, %v3027_v54  }
 0x89e   : > { %5894 = vset.pattern.permute.xlu1 %v8713_v36 }
 0x89f   : > { %5897 = vset.pattern.permute.xlu0 %v8713_v36  ;;  %3242 = vperm.xlu1 %5894, %v5132_v24  }
 0x8a0   : > { %3252 = vperm.xlu0 %5897, %v5135_v26  }
 0x8a3   : > { %5895 = vset.pattern.permute.xlu1 %v8714_v30 }
 0x8a4   : > { %3292 = vperm.xlu1 %5895, %v5132_v24   ;;  %5940 = vset.pattern.permute.xlu0 %v8714_v30 }
 0x8a8   : > { %3300 = vperm.xlu1 %5895, %v5135_v26  }
 0x8ac   : > { %5898 = vset.pattern.permute.xlu1 %v8713_v36 }
 0x8ad   : > { %3247 = vperm.xlu1 %5898, %v3037_v48  }
 0x8b1   : > { %5899 = vset.pattern.permute.xlu1 %v8714_v30  ;;  %v1729_v30 = vpop.permute.xlu0 %1728 }
 0x8b2   : > { %3296 = vperm.xlu1 %5899, %v3037_v48   ;;  %v7906_v29 = vadd.f32 %v1729_v30, %v7593_v11  ;;  %v7920_v11 = vpop.xlane.xlu1 %1749 }
 0x8b4   : > { %v1766_v0 = vsel %vm864_vm2, %v7906_v29, 0.0 }
 0x8b5   : > { %v7922_v12 = vpop.xlane.xlu0 %1752 }
 0x8b6   : > { %v7924_v52 = vpop.xlane.xlu1 %1755 }
 0x8b9   : > { %v5170_v13 = vpop.f32.mrb[32].mxu1 }
 0x8ba   : > { %v3176_v7 = vpop.f32.mrb[33].mxu1  ;;  %v7928_v49 = vpop.xlane.xlu1 %1761  ;;  %v3182_v53 = vadd.f32 %v5170_v13, %v8716_v9 }
 0x8bb   : > { %v1777_v62 = vmul.f32 0.0625, %v7928_v49 }
 0x8bd   : > { %v5173_v57 = vpop.f32.mrb[34].mxu1 }
 0x8be   : > { %v3186_v45 = vpop.f32.mrb[35].mxu1 }
 0x8bf   : > { %1770 = vadd.xlane.f32.xlu0 %v1769_v6 }
 0x8c1   : > { %v7899_v16 = vpop.f32.mrb[36].mxu1 }
 0x8c2   : > { %v3196_v27 = vpop.f32.mrb[37].mxu1 }
 0x8c5   : > { %v7901_v36 = vpop.f32.mrb[38].mxu1 }
 0x8c6   : > { %v7903_v5 = vpop.f32.mrb[39].mxu1 }
 0x8d5   : > { %5906 = vrot.lane.b32.xlu0 %v7671_v51, %s6484_s18  ;;  %v7926_v51 = vpop.xlane.xlu0 %1758 }
 0x8d6   : > { %1767 = vadd.xlane.f32.xlu1 %v1766_v0 }
 0x8d9   : > { %5921 = vrot.lane.b32.xlu0 %v7691_v31, %s6484_s18  ;;  %v7930_v31 = vpop.xlane.xlu0 %1764 }
 0x8e7   : > { %5901 = vrot.lane.b32.xlu1 %v7623_v21, %s6484_s18 }
 0x8eb   : > { %5911 = vrot.lane.b32.xlu1 %v7683_v3, %s6484_s18  ;;  %v3177_v3 = vadd.f32 %v3176_v7, %v8717_v61  ;;  %v3192_v61 = vadd.f32 %v5173_v57, %v8718_v17  ;;  %v3197_v17 = vadd.f32 %v3196_v27, %v8720_v47 }
 0x8ef   : > { %5916 = vrot.lane.b32.xlu1 %v7677_v8, %s6484_s18 }
 0x906   : > { %v3223_v14 = vpop.permute.xlu1 %3222 }
 0x907   : > { %v3218_v21 = vpop.permute.xlu0 %3217  ;;  %v3256_v8 = vmul.f32 %v7248_v40, %v3223_v14 }
 0x908   : > { %v3255_v60 = vmul.f32 %v7256_v42, %v3218_v21 }
 0x909   : > { %v3264_v48 = vadd.f32 %v3256_v8, %v3182_v53 }
 0x90a   : > { %v3263_v24 = vadd.f32 %v3255_v60, %v3177_v3 }
 0x90b   : > { %v3277_v1 = vpop.permute.xlu1 %3276 }
 0x90c   : > { %v3273_v23 = vpop.permute.xlu0 %3272  ;;  %v3304_v54 = vmul.f32 %v7250_v20, %v3277_v1  ;;  %v3187_v1 = vadd.f32 %v3186_v45, %v8719_v37  ;;  %v8745_v45 = vld [vmem:[#allocation64_spill] sm:$0xff] }
 0x90d   : > { %v3303_v26 = vmul.f32 %v7259_v43, %v3273_v23  ;;  %v3202_v27 = vadd.f32 %v7899_v16, %v8745_v45 }
 0x90e   : > { %v7940_v30 = vadd.f32 %v3304_v54, %v3264_v48 }
 0x90f   : > { %v7938_v35 = vadd.f32 %v3303_v26, %v3263_v24  ;;  %v3285_v6 = vpop.permute.xlu1 %3284 }
 0x910   : > { %v3306_v9 = vmul.f32 %v7319_v41, %v3285_v6 }
 0x911   : > { %v3233_v0 = vpop.permute.xlu0 %3232  ;;  %3319 = vmax.xlane.f32.xlu0 %v7938_v35 }
 0x912   : > { %v3258_v7 = vmul.f32 %v7307_v15, %v3233_v0 }
 0x913   : > { %3321 = vmax.xlane.f32.xlu1 %v7940_v30 }
 0x914   : > { %v3266_v13 = vadd.f32 %v3258_v7, %v3192_v61  ;;  %v3228_v14 = vpop.permute.xlu1 %3227 }
 0x915   : > { %v3238_v21 = vpop.permute.xlu0 %3237  ;;  %v3257_v60 = vmul.f32 %v7294_v10, %v3228_v14 }
 0x916   : > { %v7948_v3 = vadd.f32 %v3306_v9, %v3266_v13  ;;  %v3259_v8 = vmul.f32 %v7313_v4, %v3238_v21  ;;  %v8746_v13 = vld [vmem:[#allocation67_spill] sm:$0xff]  ;;  %v8747_v21 = vld [vmem:[#allocation69_spill] sm:$0xff] }
 0x917   : > { %v3265_v23 = vadd.f32 %v3257_v60, %v3187_v1  ;;  %v3212_v60 = vadd.f32 %v7901_v36, %v8747_v21 }
 0x918   : > { %3325 = vmax.xlane.f32.xlu0 %v7948_v3  ;;  %v3267_v54 = vadd.f32 %v3259_v8, %v3197_v17 }
 0x919   : > { %v3281_v57 = vpop.permute.xlu1 %3280 }
 0x91a   : > { %v3305_v53 = vmul.f32 %v7302_v58, %v3281_v57  ;;  %v3289_v24 = vpop.permute.xlu0 %3288  ;;  %v8748_v57 = vld [vmem:[#allocation70_spill] sm:$0xff] }
 0x91b   : > { %v3307_v26 = vmul.f32 %v7329_v59, %v3289_v24  ;;  %v8749_v24 = vld [vmem:[#allocation66_spill] sm:$0xff] }
 0x91c   : > { %v7956_v48 = vadd.f32 %v3305_v53, %v3265_v23 }
 0x91d   : > { %v7958_v6 = vadd.f32 %v3307_v26, %v3267_v54  ;;  %v8750_v26 = vld [vmem:[#allocation65_spill] sm:$0xff] }
 0x91e   : > { %v3243_v0 = vpop.permute.xlu1 %3242  ;;  %3323 = vmax.xlane.f32.xlu0 %v7956_v48 }
 0x91f   : > { %3327 = vmax.xlane.f32.xlu1 %v7958_v6  ;;  %v3260_v37 = vmul.f32 %v7326_v28, %v3243_v0  ;;  %v3253_v47 = vpop.permute.xlu0 %3252  ;;  %v3207_v0 = vadd.f32 %v7903_v5, %v8750_v26 }
 0x920   : > { %v3262_v9 = vmul.f32 %v7355_v56, %v3253_v47  ;;  %v8751_v47 = vld [vmem:[#allocation68_spill] sm:$0xff] }
 0x921   : > { %v3268_v7 = vadd.f32 %v3260_v37, %v3202_v27 }
 0x922   : > { %v3270_v17 = vadd.f32 %v3262_v9, %v3212_v60  ;;  %v8754_v9 = vld [vmem:[#allocation53_spill] sm:$0xff] }
 0x923   : > { %v3293_v61 = vpop.permute.xlu1 %3292 }
 0x924   : > { %v3308_v14 = vmul.f32 %v8746_v13, %v3293_v61  ;;  %v8752_v61 = vld [vmem:[#allocation54_spill] sm:$0xff] }
 0x926   : > { %v7969_v8 = vadd.f32 %v3308_v14, %v3268_v7  ;;  %v8753_v7 = vld [vmem:[#allocation37_spill] sm:$0xff] }
 0x927   : > { %v3301_v1 = vpop.permute.xlu1 %3300 }
 0x928   : > { %v3310_v23 = vmul.f32 %v8748_v57, %v3301_v1  ;;  %3329 = vmax.xlane.f32.xlu0 %v7969_v8 }
 0x92a   : > { %v7973_v53 = vadd.f32 %v3310_v23, %v3270_v17 }
 0x92c   : > { %v3248_v16 = vpop.permute.xlu1 %3247  ;;  %3333 = vmax.xlane.f32.xlu0 %v7973_v53 }
 0x92d   : > { %v3261_v54 = vmul.f32 %v8749_v24, %v3248_v16 }
 0x92f   : > { %v3269_v36 = vadd.f32 %v3261_v54, %v3207_v0 }
 0x931   : > { %v3297_v37 = vpop.permute.xlu1 %3296 }
 0x932   : > { %v3309_v45 = vmul.f32 %v8751_v47, %v3297_v37 }
 0x934   : > { %v7980_v27 = vadd.f32 %v3309_v45, %v3269_v36 }
 0x936   : > { %3331 = vmax.xlane.f32.xlu1 %v7980_v27 }
 0x942   : > { %5926 = vrot.lane.b32.xlu0 %v8752_v61, %s6484_s18 }
 0x946   : > { %5931 = vrot.lane.b32.xlu0 %v8753_v7, %s6484_s18 }
 0x947   : > { %5936 = vrot.lane.b32.xlu1 %v8754_v9, %s6484_s18 }
 0x94c   : > { %v7989_v14 = vpop.xlane.xlu0 %1770 }
 0x950   : > { %v5907_v21 = vpop.permute.xlu0 %5906 }
 0x951   : > { %v5909_v1 = vunpack.i.h.bf16 %v5907_v21  ;;  %v5908_v17 = vunpack.i.l.bf16 %v5907_v21 }
 0x953   : > { %v5526_v36 = vpack.c.bf16 %v5909_v1, %v5908_v17 }
 0x954   : > { %v5922_v33 = vpop.permute.xlu0 %5921 }
 0x955   : > { %v5924_v32 = vunpack.i.h.bf16 %v5922_v33  ;;  %v5923_v55 = vunpack.i.l.bf16 %v5922_v33 }
 0x963   : > { %v7991_v5 = vpop.xlane.xlu1 %1767 }
 0x964   : > { %v1779_v49 = vmul.f32 0.0625, %v7991_v5 }
 0x967   : > { %v5902_v60 = vpop.permute.xlu1 %5901 }
 0x968   : > { %v5904_v23 = vunpack.i.h.bf16 %v5902_v60  ;;  %v5903_v16 = vunpack.i.l.bf16 %v5902_v60  ;;  %v5538_v60 = vpack.c.bf16 %v5924_v32, %v5923_v55 }
 0x96a   : > { %v5522_v54 = vpack.c.bf16 %v5904_v23, %v5903_v16 }
 0x96b   : > { %v5912_v26 = vpop.permute.xlu1 %5911 }
 0x96c   : > { %v5914_v0 = vunpack.i.h.bf16 %v5912_v26  ;;  %v5913_v37 = vunpack.i.l.bf16 %v5912_v26  ;;  %5523 = vmatprep.subr.bf16.mxu0 %v5522_v54 }
 0x96d   : > { %5525 = vmatpush3.bf16.msra.mxu0 %v5522_v54 }
 0x96e   : > { %5527 = vmatprep.subr.bf16.mxu0 %v5526_v36  ;;  %v5530_v9 = vpack.c.bf16 %v5914_v0, %v5913_v37 }
 0x96f   : > { %v5917_v45 = vpop.permute.xlu1 %5916 }
 0x970   : > { %v5919_v61 = vunpack.i.h.bf16 %v5917_v45  ;;  %v5918_v7 = vunpack.i.l.bf16 %v5917_v45 }
 0x971   : > { %5529 = vmatpush3.bf16.msra.mxu0 %v5526_v36 }
 0x972   : > { %5531 = vmatprep.subr.bf16.mxu0 %v5530_v9  ;;  %v5534_v21 = vpack.c.bf16 %v5919_v61, %v5918_v7 }
 0x975   : > { %5533 = vmatpush3.bf16.msra.mxu0 %v5530_v9 }
 0x976   : > { %5535 = vmatprep.subr.bf16.mxu0 %v5534_v21 }
 0x979   : > { %5537 = vmatpush3.bf16.msra.mxu0 %v5534_v21 }
 0x97a   : > { %5539 = vmatprep.subr.bf16.mxu0 %v5538_v60 }
 0x97d   : > { %5541 = vmatpush3.bf16.msra.mxu0 %v5538_v60 }
 0x99e   : > { %v3320_v23 = vpop.xlane.xlu0 %3319 }
 0x99f   : > { %v3335_v1 = vmax.f32 %v3320_v23, 0.0 }
 0x9a0   : > { %v3322_v17 = vpop.xlane.xlu1 %3321 }
 0x9a1   : > { %v3343_v16 = vsub.f32 %v7938_v35, %v3335_v1  ;;  %v3336_v54 = vmax.f32 %v3322_v17, 0.0 }
 0x9a3   : > { %v3351_v26 = vmul.f32 1.442695, %v3343_v16  ;;  %v3344_v0 = vsub.f32 %v7940_v30, %v3336_v54 }
 0x9a5   : > { %6005 = vpow2.f32 %v3351_v26  ;;  %v3353_v37 = vmul.f32 1.442695, %v3344_v0  ;;  %v3326_v36 = vpop.xlane.xlu0 %3325 }
 0x9a6   : > { %v3338_v33 = vmax.f32 %v3326_v36, 0.0 }
 0x9a7   : > { %6007 = vpow2.f32 %v3353_v37 }
 0x9a8   : > { %v3346_v45 = vsub.f32 %v7948_v3, %v3338_v33 }
 0x9aa   : > { %v3357_v55 = vmul.f32 1.442695, %v3346_v45 }
 0x9ab   : > { %v3324_v32 = vpop.xlane.xlu0 %3323 }
 0x9ac   : > { %6009 = vpow2.f32 %v3357_v55  ;;  %v3337_v61 = vmax.f32 %v3324_v32, 0.0  ;;  %v3328_v9 = vpop.xlane.xlu1 %3327 }
 0x9ad   : > { %v3339_v30 = vmax.f32 %v3328_v9, 0.0 }
 0x9ae   : > { %v3345_v7 = vsub.f32 %v7956_v48, %v3337_v61 }
 0x9af   : > { %v6006_v21 = vpop.eup %6005  ;;  %v3347_v48 = vsub.f32 %v7958_v6, %v3339_v30 }
 0x9b0   : > { %v3355_v35 = vmul.f32 1.442695, %v3345_v7  ;;  %3367 = vadd.xlane.f32.xlu1 %v6006_v21  ;;  %5212 = vmatprep.mubr.f32.mxu0 %v6006_v21  ;;  %v3560_v26 = vmul.f32 %v6006_v21, %v7256_v42 }
 0x9b1   : > { %v7997_v60 = vpop.eup %6007  ;;  %v3359_v0 = vmul.f32 1.442695, %v3347_v48 }
 0x9b2   : > { %6011 = vpow2.f32 %v3355_v35  ;;  %3369 = vadd.xlane.f32.xlu0 %v7997_v60  ;;  %v3561_v3 = vmul.f32 %v7997_v60, %v7248_v40  ;;  %v3585_v23 = vmul.f32 %v7997_v60, %v7250_v20  ;;  %v3584_v20 = vmul.f32 %v6006_v21, %v7259_v43 }
 0x9b3   : > { %6013 = vpow2.f32 %v3359_v0 }
 0x9b4   : > { %3570 = vadd.xlane.f32.xlu1 %v3561_v3 }
 0x9b5   : > { %v3330_v1 = vpop.xlane.xlu0 %3329 }
 0x9b6   : > { %v8005_v17 = vpop.eup %6009  ;;  %v3340_v16 = vmax.f32 %v3330_v1, 0.0  ;;  %3594 = vadd.xlane.f32.xlu0 %v3585_v23 }
 0x9b7   : > { %v3563_v42 = vmul.f32 %v8005_v17, %v7307_v15  ;;  %v3587_v61 = vmul.f32 %v8005_v17, %v7319_v41 }
 0x9b8   : > { %v3348_v54 = vsub.f32 %v7969_v8, %v3340_v16  ;;  %3373 = vadd.xlane.f32.xlu1 %v8005_v17  ;;  %v1773_v16 = vmul.f32 0.0625, %v7920_v11 }
 0x9b9   : > { %v3334_v37 = vpop.xlane.xlu0 %3333 }
 0x9ba   : > { %v3361_v40 = vmul.f32 1.442695, %v3348_v54  ;;  %3568 = vadd.xlane.f32.xlu0 %v3560_v26  ;;  %v3342_v36 = vmax.f32 %v3334_v37, 0.0  ;;  %v8755_v37 = vld [vmem:[#allocation36_spill] sm:$0xff] }
 0x9bc   : > { %v6012_v33 = vpop.eup %6011  ;;  %6015 = vpow2.f32 %v3361_v40  ;;  %v3350_v8 = vsub.f32 %v7973_v53, %v3342_v36  ;;  %v8022_v40 = vsub.f32 %v8755_v37, %v1773_v16 }
 0x9bd   : > { %3371 = vadd.xlane.f32.xlu1 %v6012_v33  ;;  %v5927_v6 = vpop.permute.xlu0 %5926  ;;  %v3562_v30 = vmul.f32 %v6012_v33, %v7294_v10  ;;  %v3586_v23 = vmul.f32 %v6012_v33, %v7302_v58  ;;  %v6014_v41 = vpop.eup %6013 }
 0x9be   : > { %3592 = vadd.xlane.f32.xlu0 %v3584_v20  ;;  %v5929_v45 = vunpack.i.h.bf16 %v5927_v6  ;;  %v5928_v55 = vunpack.i.l.bf16 %v5927_v6  ;;  %v3365_v21 = vmul.f32 1.442695, %v3350_v8  ;;  %v3564_v11 = vmul.f32 %v6014_v41, %v7313_v4 }
 0x9bf   : > { %v1774_v6 = vmul.f32 0.0625, %v7922_v12 }
 0x9c0   : > { %v5542_v32 = vpack.c.bf16 %v5929_v45, %v5928_v55  ;;  %6017 = vpow2.f32 %v3365_v21  ;;  %v8758_v21 = vld [vmem:[#allocation38_spill] sm:$0xff] }
 0x9c1   : > { %3574 = vadd.xlane.f32.xlu1 %v3563_v42  ;;  %v5932_v7 = vpop.permute.xlu0 %5931 }
 0x9c2   : > { %3598 = vadd.xlane.f32.xlu0 %v3587_v61  ;;  %v5934_v43 = vunpack.i.h.bf16 %v5932_v7  ;;  %v5933_v9 = vunpack.i.l.bf16 %v5932_v7  ;;  %5543 = vmatprep.subr.bf16.mxu0 %v5542_v32 }
 0x9c3   : > { %v3332_v35 = vpop.xlane.xlu1 %3331  ;;  %5545 = vmatpush3.bf16.msra.mxu0 %v5542_v32 }
 0x9c4   : > { %v3341_v3 = vmax.f32 %v3332_v35, 0.0  ;;  %v5546_v53 = vpack.c.bf16 %v5934_v43, %v5933_v9  ;;  %v8756_v43 = vld [vmem:[#allocation39_spill] sm:$0xff]  ;;  %v8757_v9 = vld [vmem:[#allocation42_spill] sm:$0xff]  ;;  %v8759_v35 = vld [vmem:[#allocation41_spill] sm:$0xff] }
 0x9c5   : > { %3572 = vadd.xlane.f32.xlu1 %v3562_v30  ;;  %v8760_v30 = vld [vmem:[#allocation46_spill] sm:$0xff] }
 0x9c6   : > { %v3349_v15 = vsub.f32 %v7980_v27, %v3341_v3  ;;  %3596 = vadd.xlane.f32.xlu0 %v3586_v23  ;;  %5547 = vmatprep.subr.bf16.mxu0 %v5546_v53  ;;  %v6016_v1 = vpop.eup %6015  ;;  %v3588_v27 = vmul.f32 %v6014_v41, %v7329_v59  ;;  %v8761_v3 = vld [vmem:[#allocation45_spill] sm:$0xff] }
 0x9c7   : > { %v5937_v48 = vpop.permute.xlu1 %5936  ;;  %5549 = vmatpush3.bf16.msra.mxu0 %v5546_v53  ;;  %v3565_v58 = vmul.f32 %v6016_v1, %v7326_v28  ;;  %v1789_v28 = vmul.f32 %v8022_v40, %v8022_v40  ;;  %v3589_v20 = vmul.f32 %v6016_v1, %v8746_v13  ;;  %v1776_v13 = vmul.f32 0.0625, %v7926_v51  ;;  %v8762_v53 = vld [vmem:[#allocation50_spill] sm:$0xff]  ;;  %v8763_v23 = vld [vmem:[#allocation49_spill] sm:$0xff] }
 0x9c8   : > { %v5939_v54 = vunpack.i.h.bf16 %v5937_v48  ;;  %v5938_v26 = vunpack.i.l.bf16 %v5937_v48  ;;  %v3363_v10 = vmul.f32 1.442695, %v3349_v15 }
 0x9c9   : > { %3375 = vadd.xlane.f32.xlu1 %v6014_v41  ;;  %v1797_v59 = vsel %vm864_vm2, %v1789_v28, 0.0 }
 0x9ca   : > { %v5550_v0 = vpack.c.bf16 %v5939_v54, %v5938_v26  ;;  %3377 = vadd.xlane.f32.xlu0 %v6016_v1  ;;  %6019 = vpow2.f32 %v3363_v10  ;;  %v6018_v36 = vpop.eup %6017 }
 0x9cb   : > { %v3567_v12 = vmul.f32 %v6018_v36, %v7355_v56 }
 0x9cc   : > { %5551 = vmatprep.subr.bf16.mxu0 %v5550_v0 }
 0x9cd   : > { %3578 = vadd.xlane.f32.xlu1 %v3565_v58  ;;  %5553 = vmatpush3.bf16.msra.mxu0 %v5550_v0 }
 0x9ce   : > { %3600 = vadd.xlane.f32.xlu0 %v3588_v27  ;;  %5556 = vmatprep.subr.msk.bf16.mxu0 %vm6910_vm1, %v7666_v38 }
 0x9d0   : > { %5213 = vmatmul.mubr.f32.vlgmr.msra.gmra.mrb[48].mxu0 %v7997_v60  ;;  %v1775_v60 = vmul.f32 0.0625, %v7924_v52  ;;  %v8052_v52 = vsub.f32 %v7808_v50, %v1776_v13 }
 0x9d1   : > { %3576 = vadd.xlane.f32.xlu1 %v3564_v11  ;;  %5215 = vmatprep.mubr.f32.mxu0 %v6012_v33  ;;  %v3591_v33 = vmul.f32 %v6018_v36, %v8748_v57 }
 0x9d2   : > { %3381 = vadd.xlane.f32.xlu0 %v6018_v36  ;;  %v8047_v45 = vsub.f32 %v7805_v2, %v1775_v60  ;;  %v8059_v2 = vsub.f32 %v7815_v44, %v1777_v62  ;;  %v1792_v55 = vmul.f32 %v8052_v52, %v8052_v52  ;;  %v8072_v44 = vsub.f32 %v7906_v29, %v1779_v49 }
 0x9d4   : > { %5216 = vmatmul.mubr.f32.gmra.mrb[50].mxu0 %v8005_v17  ;;  %v6020_v4 = vpop.eup %6019  ;;  %v8042_v17 = vsub.f32 %v7792_v22, %v1774_v6  ;;  %v1778_v22 = vmul.f32 0.0625, %v7930_v31  ;;  %v1791_v57 = vmul.f32 %v8047_v45, %v8047_v45  ;;  %v1780_v31 = vmul.f32 0.0625, %v7989_v14 }
 0x9d5   : > { %1798 = vadd.xlane.f32.xlu1 %v1797_v59  ;;  %5218 = vmatprep.mubr.f32.mxu0 %v6014_v41  ;;  %v3566_v56 = vmul.f32 %v6020_v4, %v8749_v24  ;;  %v1793_v5 = vmul.f32 %v8059_v2, %v8059_v2  ;;  %v1806_v14 = vsel %vm864_vm2, %v1792_v55, 0.0  ;;  %v1795_v29 = vmul.f32 %v8072_v44, %v8072_v44 }
 0x9d6   : > { %3602 = vadd.xlane.f32.xlu0 %v3589_v20  ;;  %5559 = vmatpush3.bf16.xpose.msk.msra.mxu0 %vm6910_vm1, %v7666_v38  ;;  %v3590_v38 = vmul.f32 %v6020_v4, %v8751_v47  ;;  %v1790_v51 = vmul.f32 %v8042_v17, %v8042_v17  ;;  %v8065_v50 = vsub.f32 %v7818_v19, %v1778_v22  ;;  %v1803_v24 = vsel %vm864_vm2, %v1791_v57, 0.0 }
 0x9d7   : > { %v8078_v19 = vsub.f32 %v7895_v39, %v1780_v31  ;;  %v1809_v42 = vsel %vm864_vm2, %v1793_v5, 0.0  ;;  %v1815_v39 = vsel %vm864_vm2, %v1795_v29, 0.0 }
 0x9d8   : > { %5219 = vmatmul.mubr.f32.gmra.mrb[52].mxu0 %v6016_v1  ;;  %v1800_v47 = vsel %vm864_vm2, %v1790_v51, 0.0  ;;  %v1794_v8 = vmul.f32 %v8065_v50, %v8065_v50 }
 0x9d9   : > { %3379 = vadd.xlane.f32.xlu1 %v6020_v4  ;;  %5221 = vmatprep.mubr.f32.mxu0 %v6020_v4  ;;  %v1796_v61 = vmul.f32 %v8078_v19, %v8078_v19 }
 0x9da   : > { %3606 = vadd.xlane.f32.xlu0 %v3591_v33  ;;  %v1812_v32 = vsel %vm864_vm2, %v1794_v8, 0.0 }
 0x9db   : > { %v1818_v7 = vsel %vm864_vm2, %v1796_v61, 0.0 }
 0x9dc   : > { %5222 = vmatmul.mubr.f32.gmra.mrb[54].mxu0 %v6018_v36 }
 0x9dd   : > { %3582 = vadd.xlane.f32.xlu1 %v3567_v12 }
 0x9de   : > { %3604 = vadd.xlane.f32.xlu0 %v3590_v38 }
 0x9e1   : > { %3580 = vadd.xlane.f32.xlu1 %v3566_v56 }
 0x9e2   : > { %1801 = vadd.xlane.f32.xlu0 %v1800_v47 }
 0x9e5   : > { %1804 = vadd.xlane.f32.xlu1 %v1803_v24 }
 0x9e6   : > { %1807 = vadd.xlane.f32.xlu0 %v1806_v14 }
 0x9e9   : > { %1810 = vadd.xlane.f32.xlu1 %v1809_v42 }
 0x9ea   : > { %1813 = vadd.xlane.f32.xlu0 %v1812_v32 }
 0x9ed   : > { %1816 = vadd.xlane.f32.xlu1 %v1815_v39 }
 0x9ee   : > { %1819 = vadd.xlane.f32.xlu0 %v1818_v7 }
 0x9fe   : > { %2746 = vrot.lane.b32.xlu1 %v8756_v43, %s6482_s13 }
 0xa02   : > { %2750 = vrot.lane.b32.xlu1 %v8757_v9, %s6482_s13 }
 0xa04   : > { %2748 = vrot.lane.b32.xlu0 %v8758_v21, %s6482_s13 }
 0xa06   : > { %2752 = vrot.lane.b32.xlu1 %v8759_v35, %s6482_s13 }
 0xa08   : > { %2754 = vrot.lane.b32.xlu0 %v8760_v30, %s6482_s13 }
 0xa0a   : > { %2756 = vrot.lane.b32.xlu1 %v8761_v3, %s6482_s13 }
 0xa0c   : > { %2758 = vrot.lane.b32.xlu0 %v8762_v53, %s6482_s13 }
 0xa0e   : > { %2760 = vrot.lane.b32.xlu1 %v8763_v23, %s6482_s13 }
 0xa3d   : > { %v3368_v15 = vpop.xlane.xlu1 %3367 }
 0xa3e   : > { %v3383_v41 = vmax.f32 %v3368_v15, 1e-30 }
 0xa3f   : > { %v3370_v48 = vpop.xlane.xlu0 %3369 }
 0xa40   : > { %v3384_v1 = vmax.f32 %v3370_v48, 1e-30  ;;  %6021 = vrcp.f32 %v3383_v41 }
 0xa41   : > { %v3571_v16 = vpop.xlane.xlu1 %3570 }
 0xa42   : > { %6023 = vrcp.f32 %v3384_v1 }
 0xa43   : > { %v3595_v54 = vpop.xlane.xlu0 %3594 }
 0xa44   : > { %v3609_v36 = vsel %vm1540_vm4, %v3571_v16, %v3595_v54  ;;  %v1853_v16 = vlaneseq }
 0xa45   : > { %v3374_v26 = vpop.xlane.xlu1 %3373 }
 0xa46   : > { %v3386_v0 = vmax.f32 %v3374_v26, 1e-30 }
 0xa47   : > { %v3569_v10 = vpop.xlane.xlu0 %3568 }
 0xa48   : > { %6025 = vrcp.f32 %v3386_v0  ;;  %v8137_v0 = vshrl.u32 %v1853_v16, 7 }
 0xa4a   : > { %v3372_v58 = vpop.xlane.xlu1 %3371  ;;  %v8107_v37 = vpop.eup %6021 }
 0xa4b   : > { %v3385_v27 = vmax.f32 %v3372_v58, 1e-30  ;;  %v3593_v11 = vpop.xlane.xlu0 %3592 }
 0xa4c   : > { %v8109_v28 = vpop.eup %6023  ;;  %v3608_v59 = vsel %vm1540_vm4, %v3569_v10, %v3593_v11  ;;  %v1855_v11 = vsub.s32 0, %v8137_v0 }
 0xa4d   : > { %v3617_v20 = vmul.f32 %v8109_v28, %v3609_v36  ;;  %6027 = vrcp.f32 %v3385_v27  ;;  %v3616_v6 = vmul.f32 %v8107_v37, %v3608_v59  ;;  %v8140_v59 = vld [vmem:[#allocation14] sm:$0x7] }
 0xa4e   : > { %v3575_v4 = vpop.xlane.xlu1 %3574 }
 0xa4f   : > { %v3599_v60 = vpop.xlane.xlu0 %3598  ;;  %5228 = vmatprep.mubr.msk.f32.mxu0 %vm672_vm0, %v3616_v6 }
 0xa50   : > { %5229 = vmatmul.mubr.msk.f32.vlgmr.msra.gmra.mrb[56].mxu0 %vm672_vm0, %v3617_v20  ;;  %v3611_v49 = vsel %vm1540_vm4, %v3575_v4, %v3599_v60  ;;  %v8143_v60 = vrot.slane %v8140_v59, %v1855_v11 }
 0xa52   : > { %v3573_v33 = vpop.xlane.xlu1 %3572  ;;  %v8117_v12 = vpop.eup %6025 }
 0xa53   : > { %v3597_v13 = vpop.xlane.xlu0 %3596  ;;  %v3619_v47 = vmul.f32 %v8117_v12, %v3611_v49 }
 0xa54   : > { %v3610_v22 = vsel %vm1540_vm4, %v3573_v33, %v3597_v13 }
 0xa56   : > { %v3376_v62 = vpop.xlane.xlu1 %3375 }
 0xa57   : > { %v8119_v38 = vpop.eup %6027  ;;  %v3387_v51 = vmax.f32 %v3376_v62, 1e-30  ;;  %v3378_v56 = vpop.xlane.xlu0 %3377 }
 0xa58   : > { %v3618_v57 = vmul.f32 %v8119_v38, %v3610_v22  ;;  %v3388_v31 = vmax.f32 %v3378_v56, 1e-30 }
 0xa59   : > { %6029 = vrcp.f32 %v3387_v51  ;;  %v8148_v51 = vld [vmem:[#allocation16] sm:$0x7] }
 0xa5a   : > { %6031 = vrcp.f32 %v3388_v31  ;;  %v3579_v55 = vpop.xlane.xlu1 %3578  ;;  %5231 = vmatprep.mubr.msk.f32.mxu0 %vm672_vm0, %v3618_v57 }
 0xa5b   : > { %v3601_v24 = vpop.xlane.xlu0 %3600  ;;  %5232 = vmatmul.mubr.msk.f32.gmra.mrb[58].mxu0 %vm672_vm0, %v3619_v47 }
 0xa5e   : > { %v3577_v5 = vpop.xlane.xlu1 %3576 }
 0xa5f   : > { %v3382_v14 = vpop.xlane.xlu0 %3381  ;;  %v3612_v29 = vsel %vm1540_vm4, %v3577_v5, %v3601_v24 }
 0xa60   : > { %v3390_v15 = vmax.f32 %v3382_v14, 1e-30 }
 0xa62   : > { %v1799_v8 = vpop.xlane.xlu1 %1798 }
 0xa63   : > { %v8127_v42 = vpop.eup %6029  ;;  %v1821_v32 = vmul.f32 0.0625, %v1799_v8  ;;  %v3603_v61 = vpop.xlane.xlu0 %3602 }
 0xa64   : > { %v8130_v39 = vpop.eup %6031  ;;  %v3620_v7 = vmul.f32 %v8127_v42, %v3612_v29  ;;  %v3613_v41 = vsel %vm1540_vm4, %v3579_v55, %v3603_v61  ;;  %v8158_v29 = vrot.slane %v8148_v51, %v1855_v11 }
 0xa65   : > { %v1829_v48 = vadd.f32 1e-05, %v1821_v32  ;;  %v3621_v1 = vmul.f32 %v8130_v39, %v3613_v41 }
 0xa66   : > { %v3380_v54 = vpop.xlane.xlu1 %3379  ;;  %5234 = vmatprep.mubr.msk.f32.mxu0 %vm672_vm0, %v3620_v7 }
 0xa67   : > { %6033 = vrsqrt.f32 %v1829_v48  ;;  %v3389_v26 = vmax.f32 %v3380_v54, 1e-30  ;;  %v3607_v10 = vpop.xlane.xlu0 %3606  ;;  %5235 = vmatmul.mubr.msk.f32.gmra.mrb[60].mxu0 %vm672_vm0, %v3621_v1 }
 0xa68   : > { %6035 = vrcp.f32 %v3390_v15 }
 0xa69   : > { %6037 = vrcp.f32 %v3389_v26 }
 0xa6a   : > { %v3583_v58 = vpop.xlane.xlu1 %3582 }
 0xa6b   : > { %v3605_v27 = vpop.xlane.xlu0 %3604  ;;  %v3615_v13 = vsel %vm1540_vm4, %v3583_v58, %v3607_v10 }
 0xa6e   : > { %v3581_v36 = vpop.xlane.xlu1 %3580 }
 0xa6f   : > { %v1802_v20 = vpop.xlane.xlu0 %1801  ;;  %v3614_v57 = vsel %vm1540_vm4, %v3581_v36, %v3605_v27 }
 0xa70   : > { %v1822_v6 = vmul.f32 0.0625, %v1802_v20 }
 0xa71   : > { %v6034_v4 = vpop.eup %6033 }
 0xa72   : > { %v8145_v33 = vpop.eup %6035  ;;  %v1830_v62 = vadd.f32 1e-05, %v1822_v6  ;;  %v1805_v22 = vpop.xlane.xlu1 %1804  ;;  %v1845_v56 = vmul.f32 %v6034_v4, %v8022_v40 }
 0xa73   : > { %v8151_v49 = vpop.eup %6037  ;;  %v1823_v31 = vmul.f32 0.0625, %v1805_v22  ;;  %v1808_v47 = vpop.xlane.xlu0 %1807  ;;  %v3623_v5 = vmul.f32 %v8145_v33, %v3615_v13 }
 0xa74   : > { %v3622_v55 = vmul.f32 %v8151_v49, %v3614_v57  ;;  %6039 = vrsqrt.f32 %v1830_v62  ;;  %v1824_v24 = vmul.f32 0.0625, %v1808_v47  ;;  %v1857_v8 = vmul.f32 %v8143_v60, %v1845_v56 }
 0xa75   : > { %v1831_v14 = vadd.f32 1e-05, %v1823_v31 }
 0xa76   : > { %v1832_v32 = vadd.f32 1e-05, %v1824_v24  ;;  %v1811_v40 = vpop.xlane.xlu1 %1810  ;;  %5237 = vmatprep.mubr.msk.f32.mxu1 %vm672_vm0, %v3622_v55  ;;  %v1869_v48 = vadd.f32 %v8158_v29, %v1857_v8 }
 0xa77   : > { %6041 = vrsqrt.f32 %v1831_v14  ;;  %v1825_v61 = vmul.f32 0.0625, %v1811_v40  ;;  %5238 = vmatmul.mubr.msk.f32.vlgmr.msra.gmra.mrb[40].mxu1 %vm672_vm0, %v3623_v5  ;;  %v1814_v7 = vpop.xlane.xlu0 %1813 }
 0xa78   : > { %6043 = vrsqrt.f32 %v1832_v32  ;;  %v1826_v15 = vmul.f32 0.0625, %v1814_v7  ;;  %v2738_v27 = vadd.f32 %v7864_v18, %v1869_v48 }
 0xa79   : > { %v1833_v41 = vadd.f32 1e-05, %v1825_v61 }
 0xa7a   : > { %v1834_v1 = vadd.f32 1e-05, %v1826_v15  ;;  %v1817_v16 = vpop.xlane.xlu1 %1816 }
 0xa7b   : > { %6045 = vrsqrt.f32 %v1833_v41  ;;  %v1827_v54 = vmul.f32 0.0625, %v1817_v16  ;;  %v1820_v26 = vpop.xlane.xlu0 %1819 }
 0xa7c   : > { %6047 = vrsqrt.f32 %v1834_v1  ;;  %v1828_v10 = vmul.f32 0.0625, %v1820_v26 }
 0xa7d   : > { %v1835_v58 = vadd.f32 1e-05, %v1827_v54 }
 0xa7e   : > { %v6040_v11 = vpop.eup %6039  ;;  %v1836_v36 = vadd.f32 1e-05, %v1828_v10  ;;  %v2747_v20 = vpop.permute.xlu1 %2746 }
 0xa7f   : > { %6049 = vrsqrt.f32 %v1835_v58  ;;  %v8164_v6 = vadd.f32 %v2747_v20, %v2738_v27  ;;  %v1846_v4 = vmul.f32 %v6040_v11, %v8042_v17  ;;  %v2749_v5 = vpop.permute.xlu0 %2748 }
 0xa80   : > { %6051 = vrsqrt.f32 %v1836_v36 }
 0xa81   : > { %v6042_v13 = vpop.eup %6041  ;;  %v1858_v62 = vmul.f32 %v8143_v60, %v1846_v4  ;;  %v2778_v22 = vsel %vm864_vm2, %v8164_v6, 0.0  ;;  %v8764_v4 = vld [vmem:[#allocation56_spill] sm:$0xff] }
 0xa82   : > { %v6044_v56 = vpop.eup %6043  ;;  %2779 = vadd.xlane.f32.xlu0 %v2778_v22  ;;  %v1847_v57 = vmul.f32 %v6042_v13, %v8047_v45  ;;  %v2751_v18 = vpop.permute.xlu1 %2750 }
 0xa83   : > { %v1870_v31 = vadd.f32 %v8158_v29, %v1858_v62  ;;  %v1848_v47 = vmul.f32 %v6044_v56, %v8052_v52 }
 0xa84   : > { %v1859_v55 = vmul.f32 %v8143_v60, %v1847_v57  ;;  %v8765_v57 = vld [vmem:[#allocation62_spill] sm:$0xff] }
 0xa85   : > { %v6046_v24 = vpop.eup %6045  ;;  %v2739_v17 = vadd.f32 %v7861_v34, %v1870_v31  ;;  %v1860_v14 = vmul.f32 %v8143_v60, %v1848_v47 }
 0xa86   : > { %v6048_v8 = vpop.eup %6047  ;;  %v1871_v32 = vadd.f32 %v8158_v29, %v1859_v55  ;;  %v1849_v40 = vmul.f32 %v6046_v24, %v8059_v2  ;;  %v2753_v45 = vpop.permute.xlu1 %2752  ;;  %v8766_v55 = vld [vmem:[#allocation57_spill] sm:$0xff] }
 0xa87   : > { %v8178_v61 = vadd.f32 %v2749_v5, %v2739_v17  ;;  %v1872_v7 = vadd.f32 %v8158_v29, %v1860_v14  ;;  %v1850_v52 = vmul.f32 %v6048_v8, %v8065_v50  ;;  %v2755_v50 = vpop.permute.xlu0 %2754 }
 0xa88   : > { %v2740_v15 = vadd.f32 %v7870_v25, %v1871_v32  ;;  %v1861_v41 = vmul.f32 %v8143_v60, %v1849_v40 }
 0xa89   : > { %v6050_v34 = vpop.eup %6049  ;;  %v2741_v48 = vadd.f32 %v7867_v63, %v1872_v7  ;;  %v1862_v1 = vmul.f32 %v8143_v60, %v1850_v52  ;;  %v2781_v16 = vsel %vm864_vm2, %v8178_v61, 0.0 }
 0xa8a   : > { %v6052_v2 = vpop.eup %6051  ;;  %v2772_v54 = vadd.f32 %v2751_v18, %v2740_v15  ;;  %v1873_v26 = vadd.f32 %v8158_v29, %v1861_v41  ;;  %v1851_v10 = vmul.f32 %v6050_v34, %v8072_v44  ;;  %2782 = vadd.xlane.f32.xlu1 %v2781_v16  ;;  %v2757_v20 = vpop.permute.xlu1 %2756 }
 0xa8b   : > { %v1874_v25 = vadd.f32 %v8158_v29, %v1862_v1  ;;  %v1852_v58 = vmul.f32 %v6052_v2, %v8078_v19  ;;  %v2773_v63 = vadd.f32 %v2753_v45, %v2741_v48  ;;  %v2759_v47 = vpop.permute.xlu0 %2758 }
 0xa8c   : > { %v2742_v27 = vadd.f32 %v7876_v46, %v1873_v26  ;;  %v1863_v11 = vmul.f32 %v8143_v60, %v1851_v10  ;;  %v2784_v36 = vsel %vm864_vm2, %v2772_v54, 0.0 }
 0xa8d   : > { %v2743_v13 = vadd.f32 %v8764_v4, %v1874_v25  ;;  %2785 = vadd.xlane.f32.xlu0 %v2784_v36  ;;  %v1864_v62 = vmul.f32 %v8143_v60, %v1852_v58  ;;  %v2787_v46 = vsel %vm864_vm2, %v2773_v63, 0.0 }
 0xa8e   : > { %v2774_v44 = vadd.f32 %v2755_v50, %v2742_v27  ;;  %v1875_v22 = vadd.f32 %v8158_v29, %v1863_v11  ;;  %v2761_v5 = vpop.permute.xlu1 %2760 }
 0xa8f   : > { %v1876_v56 = vadd.f32 %v8158_v29, %v1864_v62  ;;  %v2775_v18 = vadd.f32 %v2757_v20, %v2743_v13 }
 0xa90   : > { %v2744_v19 = vadd.f32 %v8765_v57, %v1875_v22  ;;  %v2790_v31 = vsel %vm864_vm2, %v2774_v44, 0.0 }
 0xa91   : > { %v2745_v24 = vadd.f32 %v8766_v55, %v1876_v56  ;;  %2788 = vadd.xlane.f32.xlu0 %v2787_v46  ;;  %2791 = vadd.xlane.f32.xlu1 %v2790_v31  ;;  %v2793_v14 = vsel %vm864_vm2, %v2775_v18, 0.0 }
 0xa92   : > { %v2776_v17 = vadd.f32 %v2759_v47, %v2744_v19 }
 0xa93   : > { %v2777_v60 = vadd.f32 %v2761_v5, %v2745_v24 }
 0xa94   : > { %v2796_v8 = vsel %vm864_vm2, %v2776_v17, 0.0 }
 0xa95   : > { %2794 = vadd.xlane.f32.xlu0 %v2793_v14  ;;  %2797 = vadd.xlane.f32.xlu1 %v2796_v8  ;;  %v2799_v29 = vsel %vm864_vm2, %v2777_v60, 0.0 }
 0xa99   : > { %2800 = vadd.xlane.f32.xlu0 %v2799_v29 }
 0xaa3   : > { %v5214_v32 = vpop.f32.mrb[48].mxu0 }
 0xaa4   : > { %v3513_v40 = vpop.f32.mrb[49].mxu0  ;;  %v3553_v19 = vmul.f32 %v8109_v28, %v5214_v32 }
 0xaa7   : > { %v5217_v45 = vpop.f32.mrb[50].mxu0 }
 0xaa8   : > { %v3523_v7 = vpop.f32.mrb[51].mxu0 }
 0xaab   : > { %v8206_v52 = vpop.f32.mrb[52].mxu0 }
 0xaac   : > { %v8208_v15 = vpop.f32.mrb[53].mxu0 }
 0xaaf   : > { %v8210_v41 = vpop.f32.mrb[54].mxu0 }
 0xab0   : > { %v3543_v34 = vpop.f32.mrb[55].mxu0 }
 0xab1   : > { %v8213_v48 = vmul.f32 %v8151_v49, %v3543_v34 }
 0xb0f   : > { %v2780_v1 = vpop.xlane.xlu0 %2779 }
 0xb10   : > { %v2802_v16 = vmul.f32 0.0625, %v2780_v1 }
 0xb12   : > { %v8216_v2 = vsub.f32 %v8164_v6, %v2802_v16 }
 0xb14   : > { %v2818_v26 = vmul.f32 %v8216_v2, %v8216_v2 }
 0xb16   : > { %v2826_v10 = vsel %vm864_vm2, %v2818_v26, 0.0 }
 0xb17   : > { %v2783_v50 = vpop.xlane.xlu1 %2782  ;;  %2827 = vadd.xlane.f32.xlu1 %v2826_v10 }
 0xb18   : > { %v2803_v25 = vmul.f32 0.0625, %v2783_v50  ;;  %v3555_v50 = vmul.f32 %v8117_v12, %v5217_v45 }
 0xb1a   : > { %v8222_v58 = vsub.f32 %v8178_v61, %v2803_v25  ;;  %v2786_v27 = vpop.xlane.xlu0 %2785 }
 0xb1b   : > { %v2804_v11 = vmul.f32 0.0625, %v2786_v27  ;;  %v3554_v27 = vmul.f32 %v8119_v38, %v3523_v7 }
 0xb1c   : > { %v2819_v49 = vmul.f32 %v8222_v58, %v8222_v58 }
 0xb1d   : > { %v8226_v36 = vsub.f32 %v2772_v54, %v2804_v11  ;;  %v3552_v54 = vmul.f32 %v8107_v37, %v3513_v40 }
 0xb1e   : > { %v2792_v6 = vpop.xlane.xlu1 %2791  ;;  %v2789_v20 = vpop.xlane.xlu0 %2788  ;;  %v2829_v4 = vsel %vm864_vm2, %v2819_v49, 0.0 }
 0xb1f   : > { %v2806_v13 = vmul.f32 0.0625, %v2792_v6  ;;  %v2805_v62 = vmul.f32 0.0625, %v2789_v20  ;;  %2830 = vadd.xlane.f32.xlu0 %v2829_v4  ;;  %v2820_v22 = vmul.f32 %v8226_v36, %v8226_v36  ;;  %v3557_v20 = vmul.f32 %v8130_v39, %v8206_v52 }
 0xb20   : > { %v3556_v4 = vmul.f32 %v8127_v42, %v8208_v15  ;;  %v3559_v42 = vmul.f32 %v8145_v33, %v8210_v41 }
 0xb21   : > { %v8231_v56 = vsub.f32 %v2774_v44, %v2806_v13  ;;  %v8233_v61 = vsub.f32 %v2773_v63, %v2805_v62  ;;  %v2832_v57 = vsel %vm864_vm2, %v2820_v22, 0.0 }
 0xb22   : > { %v2798_v46 = vpop.xlane.xlu1 %2797  ;;  %2833 = vadd.xlane.f32.xlu1 %v2832_v57  ;;  %v2795_v31 = vpop.xlane.xlu0 %2794 }
 0xb23   : > { %v2808_v47 = vmul.f32 0.0625, %v2798_v46  ;;  %v2807_v55 = vmul.f32 0.0625, %v2795_v31  ;;  %v5230_v24 = vpop.f32.mrb[56].mxu0  ;;  %v2822_v5 = vmul.f32 %v8231_v56, %v8231_v56  ;;  %v2821_v44 = vmul.f32 %v8233_v61, %v8233_v61 }
 0xb24   : > { %v8242_v63 = vadd.f32 %v5230_v24, %v3553_v19  ;;  %v3720_v14 = vpop.f32.mrb[57].mxu0 }
 0xb25   : > { %v8244_v8 = vsub.f32 %v2776_v17, %v2808_v47  ;;  %v8246_v28 = vsub.f32 %v2775_v18, %v2807_v55  ;;  %v8248_v37 = vadd.f32 %v3720_v14, %v3552_v54  ;;  %v2838_v29 = vsel %vm864_vm2, %v2822_v5, 0.0 }
 0xb26   : > { %2839 = vadd.xlane.f32.xlu1 %v2838_v29  ;;  %v2835_v32 = vsel %vm864_vm2, %v2821_v44, 0.0  ;;  %v2801_v40 = vpop.xlane.xlu0 %2800 }
 0xb27   : > { %2836 = vadd.xlane.f32.xlu0 %v2835_v32  ;;  %v2809_v34 = vmul.f32 0.0625, %v2801_v40  ;;  %v2824_v1 = vmul.f32 %v8244_v8, %v8244_v8  ;;  %v2823_v16 = vmul.f32 %v8246_v28, %v8246_v28 }
 0xb29   : > { %v8256_v17 = vsub.f32 %v2777_v60, %v2809_v34  ;;  %v2844_v18 = vsel %vm864_vm2, %v2824_v1, 0.0  ;;  %v2841_v26 = vsel %vm864_vm2, %v2823_v16, 0.0 }
 0xb2a   : > { %2845 = vadd.xlane.f32.xlu1 %v2844_v18 }
 0xb2b   : > { %2842 = vadd.xlane.f32.xlu0 %v2841_v26  ;;  %v2825_v10 = vmul.f32 %v8256_v17, %v8256_v17 }
 0xb2d   : > { %v2847_v25 = vsel %vm864_vm2, %v2825_v10, 0.0 }
 0xb2e   : > { %v5233_v11 = vpop.f32.mrb[58].mxu0 }
 0xb2f   : > { %2848 = vadd.xlane.f32.xlu0 %v2847_v25  ;;  %v8265_v49 = vadd.f32 %v5233_v11, %v3555_v50  ;;  %v3730_v60 = vpop.f32.mrb[59].mxu0 }
 0xb30   : > { %v8267_v6 = vadd.f32 %v3730_v60, %v3554_v27 }
 0xb3a   : > { %v5236_v13 = vpop.f32.mrb[60].mxu0 }
 0xb3b   : > { %v8273_v62 = vadd.f32 %v5236_v13, %v3557_v20  ;;  %3775 = vrot.lane.b32.xlu1 %v8756_v43, %s6484_s18  ;;  %v3740_v12 = vpop.f32.mrb[61].mxu0 }
 0xb3c   : > { %v8277_v38 = vadd.f32 %v3740_v12, %v3556_v4 }
 0xb3f   : > { %3779 = vrot.lane.b32.xlu1 %v8757_v9, %s6484_s18 }
 0xb43   : > { %3781 = vrot.lane.b32.xlu1 %v8759_v35, %s6484_s18 }
 0xb45   : > { %3777 = vrot.lane.b32.xlu0 %v8758_v21, %s6484_s18 }
 0xb47   : > { %3785 = vrot.lane.b32.xlu1 %v8761_v3, %s6484_s18 }
 0xb49   : > { %3783 = vrot.lane.b32.xlu0 %v8760_v30, %s6484_s18  ;;  %v2884_v30 = vsub.s32 1, %v8137_v0 }
 0xb4a   : > { %v5239_v43 = vpop.f32.mrb[40].mxu1 }
 0xb4b   : > { %v8291_v39 = vadd.f32 %v5239_v43, %v3559_v42  ;;  %v3750_v45 = vpop.f32.mrb[41].mxu1  ;;  %3789 = vrot.lane.b32.xlu1 %v8763_v23, %s6484_s18  ;;  %v8302_v23 = vrot.slane %v8140_v59, %v2884_v30  ;;  %v8306_v46 = vrot.slane %v8148_v51, %v2884_v30 }
 0xb4c   : > { %v8296_v9 = vadd.f32 %v3750_v45, %v8213_v48 }
 0xb4d   : > { %3787 = vrot.lane.b32.xlu0 %v8762_v53, %s6484_s18 }
 0xba4   : > { %v2828_v21 = vpop.xlane.xlu1 %2827 }
 0xba5   : > { %v2850_v35 = vmul.f32 0.0625, %v2828_v21 }
 0xba7   : > { %v2858_v3 = vadd.f32 1e-05, %v2850_v35 }
 0xba9   : > { %6053 = vrsqrt.f32 %v2858_v3 }
 0xbac   : > { %v2831_v33 = vpop.xlane.xlu0 %2830 }
 0xbad   : > { %v2851_v7 = vmul.f32 0.0625, %v2831_v33 }
 0xbaf   : > { %v2859_v52 = vadd.f32 1e-05, %v2851_v7  ;;  %v2834_v15 = vpop.xlane.xlu1 %2833 }
 0xbb0   : > { %v2852_v41 = vmul.f32 0.0625, %v2834_v15 }
 0xbb1   : > { %6055 = vrsqrt.f32 %v2859_v52 }
 0xbb2   : > { %v2860_v22 = vadd.f32 1e-05, %v2852_v41 }
 0xbb3   : > { %v6054_v48 = vpop.eup %6053  ;;  %v2840_v57 = vpop.xlane.xlu1 %2839 }
 0xbb4   : > { %6057 = vrsqrt.f32 %v2860_v22  ;;  %v2854_v53 = vmul.f32 0.0625, %v2840_v57  ;;  %v2837_v19 = vpop.xlane.xlu0 %2836  ;;  %v2874_v54 = vmul.f32 %v6054_v48, %v8216_v2 }
 0xbb5   : > { %v2853_v31 = vmul.f32 0.0625, %v2837_v19 }
 0xbb6   : > { %v2862_v47 = vadd.f32 1e-05, %v2854_v53  ;;  %v2886_v55 = vmul.f32 %v8302_v23, %v2874_v54 }
 0xbb7   : > { %v2861_v24 = vadd.f32 1e-05, %v2853_v31  ;;  %v2846_v5 = vpop.xlane.xlu1 %2845 }
 0xbb8   : > { %6059 = vrsqrt.f32 %v2862_v47  ;;  %v2856_v44 = vmul.f32 0.0625, %v2846_v5  ;;  %v2843_v14 = vpop.xlane.xlu0 %2842  ;;  %v2898_v29 = vadd.f32 %v8306_v46, %v2886_v55 }
 0xbb9   : > { %6061 = vrsqrt.f32 %v2861_v24  ;;  %v2855_v32 = vmul.f32 0.0625, %v2843_v14 }
 0xbba   : > { %v2864_v40 = vadd.f32 1e-05, %v2856_v44  ;;  %v3767_v34 = vadd.f32 %v8248_v37, %v2898_v29 }
 0xbbb   : > { %v6056_v2 = vpop.eup %6055  ;;  %v2863_v1 = vadd.f32 1e-05, %v2855_v32  ;;  %v3776_v16 = vpop.permute.xlu1 %3775 }
 0xbbc   : > { %6063 = vrsqrt.f32 %v2864_v40  ;;  %v8311_v18 = vadd.f32 %v3776_v16, %v3767_v34  ;;  %v2849_v26 = vpop.xlane.xlu0 %2848  ;;  %v2875_v10 = vmul.f32 %v6056_v2, %v8222_v58 }
 0xbbd   : > { %6065 = vrsqrt.f32 %v2863_v1  ;;  %v2857_v50 = vmul.f32 0.0625, %v2849_v26 }
 0xbbe   : > { %v6058_v25 = vpop.eup %6057  ;;  %v2887_v27 = vmul.f32 %v8302_v23, %v2875_v10  ;;  %v3807_v11 = vsel %vm864_vm2, %v8311_v18, 0.0 }
 0xbbf   : > { %v2865_v60 = vadd.f32 1e-05, %v2857_v50  ;;  %v2876_v37 = vmul.f32 %v6058_v25, %v8226_v36  ;;  %3808 = vadd.xlane.f32.xlu0 %v3807_v11  ;;  %v3780_v13 = vpop.permute.xlu1 %3779 }
 0xbc0   : > { %v2899_v20 = vadd.f32 %v8306_v46, %v2887_v27  ;;  %v3778_v58 = vpop.permute.xlu0 %3777 }
 0xbc1   : > { %6067 = vrsqrt.f32 %v2865_v60  ;;  %v2888_v4 = vmul.f32 %v8302_v23, %v2876_v37 }
 0xbc2   : > { %v6060_v12 = vpop.eup %6059  ;;  %v3768_v42 = vadd.f32 %v8242_v63, %v2899_v20 }
 0xbc3   : > { %v6062_v43 = vpop.eup %6061  ;;  %v2900_v45 = vadd.f32 %v8306_v46, %v2888_v4  ;;  %v2878_v21 = vmul.f32 %v6060_v12, %v8231_v56  ;;  %v3782_v63 = vpop.permute.xlu1 %3781 }
 0xbc4   : > { %v3800_v35 = vadd.f32 %v3778_v58, %v3768_v42  ;;  %v2877_v3 = vmul.f32 %v6062_v43, %v8233_v61  ;;  %v3784_v61 = vpop.permute.xlu0 %3783 }
 0xbc5   : > { %v3769_v36 = vadd.f32 %v8267_v6, %v2900_v45  ;;  %v2890_v33 = vmul.f32 %v8302_v23, %v2878_v21 }
 0xbc6   : > { %v6064_v7 = vpop.eup %6063  ;;  %v2889_v30 = vmul.f32 %v8302_v23, %v2877_v3  ;;  %v3810_v52 = vsel %vm864_vm2, %v3800_v35, 0.0 }
 0xbc7   : > { %v6066_v15 = vpop.eup %6065  ;;  %v3801_v41 = vadd.f32 %v3780_v13, %v3769_v36  ;;  %v2902_v22 = vadd.f32 %v8306_v46, %v2890_v33  ;;  %v2880_v48 = vmul.f32 %v6064_v7, %v8244_v8  ;;  %3811 = vadd.xlane.f32.xlu1 %v3810_v52  ;;  %v3786_v44 = vpop.permute.xlu1 %3785 }
 0xbc8   : > { %v2901_v56 = vadd.f32 %v8306_v46, %v2889_v30  ;;  %v2879_v6 = vmul.f32 %v6066_v15, %v8246_v28 }
 0xbc9   : > { %v3771_v57 = vadd.f32 %v8277_v38, %v2902_v22  ;;  %v2892_v53 = vmul.f32 %v8302_v23, %v2880_v48  ;;  %v3813_v19 = vsel %vm864_vm2, %v3801_v41, 0.0 }
 0xbca   : > { %v3770_v54 = vadd.f32 %v8265_v49, %v2901_v56  ;;  %v2891_v31 = vmul.f32 %v8302_v23, %v2879_v6  ;;  %3814 = vadd.xlane.f32.xlu0 %v3813_v19  ;;  %v3788_v49 = vpop.permute.xlu0 %3787 }
 0xbcb   : > { %v6068_v47 = vpop.eup %6067  ;;  %v3803_v55 = vadd.f32 %v3784_v61, %v3771_v57  ;;  %v2904_v8 = vadd.f32 %v8306_v46, %v2892_v53  ;;  %v3790_v26 = vpop.permute.xlu1 %3789 }
 0xbcc   : > { %v3802_v24 = vadd.f32 %v3782_v63, %v3770_v54  ;;  %v2903_v5 = vadd.f32 %v8306_v46, %v2891_v31  ;;  %v2881_v28 = vmul.f32 %v6068_v47, %v8256_v17 }
 0xbcd   : > { %v3773_v38 = vadd.f32 %v8296_v9, %v2904_v8  ;;  %v3819_v14 = vsel %vm864_vm2, %v3803_v55, 0.0 }
 0xbce   : > { %v3772_v29 = vadd.f32 %v8273_v62, %v2903_v5  ;;  %v2893_v32 = vmul.f32 %v8302_v23, %v2881_v28  ;;  %v3816_v40 = vsel %vm864_vm2, %v3802_v24, 0.0  ;;  %3820 = vadd.xlane.f32.xlu1 %v3819_v14 }
 0xbcf   : > { %v3805_v34 = vadd.f32 %v3788_v49, %v3773_v38  ;;  %3817 = vadd.xlane.f32.xlu0 %v3816_v40 }
 0xbd0   : > { %v3804_v2 = vadd.f32 %v3786_v44, %v3772_v29  ;;  %v2905_v1 = vadd.f32 %v8306_v46, %v2893_v32  ;;  %v8772_v44 = vld [vmem:[#allocation59_spill] sm:$0xff]  ;;  %v8775_v29 = vld [vmem:[#allocation60_spill] sm:$0xff] }
 0xbd1   : > { %v3825_v17 = vsel %vm864_vm2, %v3805_v34, 0.0  ;;  %v8773_v38 = vunpack.c.l.bf16 %v8772_v44  ;;  %v8776_v49 = vunpack.c.l.bf16 %v8775_v29  ;;  %v8777_v32 = vunpack.c.h.bf16 %v8772_v44 }
 0xbd2   : > { %v3774_v16 = vadd.f32 %v8291_v39, %v2905_v1  ;;  %v3822_v9 = vsel %vm864_vm2, %v3804_v2, 0.0  ;;  %3826 = vadd.xlane.f32.xlu1 %v3825_v17  ;;  %v8778_v40 = vunpack.c.h.bf16 %v8775_v29 }
 0xbd3   : > { %3823 = vadd.xlane.f32.xlu0 %v3822_v9 }
 0xbd4   : > { %v3806_v62 = vadd.f32 %v3790_v26, %v3774_v16  ;;  %v3913_v26 = vsub.s32 2, %v8137_v0 }
 0xbd6   : > { %v3828_v23 = vsel %vm864_vm2, %v3806_v62, 0.0 }
 0xbd7   : > { %3829 = vadd.xlane.f32.xlu0 %v3828_v23 }
 0xc4c   : > { %v3809_v10 = vpop.xlane.xlu0 %3808 }
 0xc4d   : > { %v3831_v50 = vmul.f32 0.0625, %v3809_v10 }
 0xc4f   : > { %v8351_v25 = vsub.f32 %v8311_v18, %v3831_v50  ;;  %v8411_v50 = vrot.slane %v8140_v59, %v3913_v26 }
 0xc51   : > { %v3847_v46 = vmul.f32 %v8351_v25, %v8351_v25 }
 0xc53   : > { %v3855_v27 = vsel %vm864_vm2, %v3847_v46, 0.0 }
 0xc54   : > { %v3812_v39 = vpop.xlane.xlu1 %3811  ;;  %3856 = vadd.xlane.f32.xlu1 %v3855_v27 }
 0xc55   : > { %v3832_v11 = vmul.f32 0.0625, %v3812_v39 }
 0xc57   : > { %v8356_v60 = vsub.f32 %v3800_v35, %v3832_v11  ;;  %v3815_v37 = vpop.xlane.xlu0 %3814  ;;  %v8414_v11 = vrot.slane %v8148_v51, %v3913_v26 }
 0xc58   : > { %v3833_v20 = vmul.f32 0.0625, %v3815_v37 }
 0xc59   : > { %v3848_v4 = vmul.f32 %v8356_v60, %v8356_v60 }
 0xc5a   : > { %v8360_v13 = vsub.f32 %v3801_v41, %v3833_v20 }
 0xc5b   : > { %v3821_v12 = vpop.xlane.xlu1 %3820  ;;  %v3858_v18 = vsel %vm864_vm2, %v3848_v4, 0.0 }
 0xc5c   : > { %v3818_v58 = vpop.xlane.xlu0 %3817  ;;  %v3835_v42 = vmul.f32 0.0625, %v3821_v12  ;;  %3859 = vadd.xlane.f32.xlu0 %v3858_v18  ;;  %v3849_v43 = vmul.f32 %v8360_v13, %v8360_v13 }
 0xc5d   : > { %v3834_v45 = vmul.f32 0.0625, %v3818_v58 }
 0xc5e   : > { %v8365_v21 = vsub.f32 %v3803_v55, %v3835_v42  ;;  %v3861_v35 = vsel %vm864_vm2, %v3849_v43, 0.0  ;;  %v8767_v55 = vld [vmem:[#allocation55_spill] sm:$0xff] }
 0xc5f   : > { %v8368_v3 = vsub.f32 %v3802_v24, %v3834_v45  ;;  %3862 = vadd.xlane.f32.xlu1 %v3861_v35  ;;  %v3827_v36 = vpop.xlane.xlu1 %3826  ;;  %v8768_v8 = vunpack.c.l.bf16 %v8767_v55  ;;  %v8769_v24 = vld [vmem:[#allocation58_spill] sm:$0xff]  ;;  %v8771_v28 = vunpack.c.h.bf16 %v8767_v55 }
 0xc60   : > { %v3824_v33 = vpop.xlane.xlu0 %3823  ;;  %v3837_v7 = vmul.f32 0.0625, %v3827_v36  ;;  %v3851_v30 = vmul.f32 %v8365_v21, %v8365_v21  ;;  %v8770_v5 = vunpack.c.l.bf16 %v8769_v24  ;;  %v8774_v14 = vunpack.c.h.bf16 %v8769_v24 }
 0xc61   : > { %v3836_v52 = vmul.f32 0.0625, %v3824_v33  ;;  %v3850_v15 = vmul.f32 %v8368_v3, %v8368_v3 }
 0xc62   : > { %v8374_v41 = vsub.f32 %v3805_v34, %v3837_v7  ;;  %v3867_v63 = vsel %vm864_vm2, %v3851_v30, 0.0  ;;  %v3975_v34 = vld [vmem:[#allocation17] sm:$0x3] }
 0xc63   : > { %v8377_v22 = vsub.f32 %v3804_v2, %v3836_v52  ;;  %v3864_v48 = vsel %vm864_vm2, %v3850_v15, 0.0  ;;  %3868 = vadd.xlane.f32.xlu1 %v3867_v63  ;;  %5240 = vmatprep.subr.msk.mxu0 %vm864_vm2, %v3975_v34 }
 0xc64   : > { %3865 = vadd.xlane.f32.xlu0 %v3864_v48  ;;  %v3830_v56 = vpop.xlane.xlu0 %3829  ;;  %v3853_v61 = vmul.f32 %v8374_v41, %v8374_v41  ;;  %5241 = vmatpush3.xpose.msk.msra.mxu0 %vm864_vm2, %v3975_v34 }
 0xc65   : > { %v3838_v6 = vmul.f32 0.0625, %v3830_v56  ;;  %v3852_v57 = vmul.f32 %v8377_v22, %v8377_v22 }
 0xc66   : > { %v3873_v53 = vsel %vm864_vm2, %v3853_v61, 0.0 }
 0xc67   : > { %v8385_v19 = vsub.f32 %v3806_v62, %v3838_v6  ;;  %v3870_v54 = vsel %vm864_vm2, %v3852_v57, 0.0  ;;  %3874 = vadd.xlane.f32.xlu1 %v3873_v53 }
 0xc68   : > { %3871 = vadd.xlane.f32.xlu0 %v3870_v54 }
 0xc69   : > { %v3854_v31 = vmul.f32 %v8385_v19, %v8385_v19 }
 0xc6b   : > { %v3876_v47 = vsel %vm864_vm2, %v3854_v31, 0.0  ;;  %3943 = vadd.xlane.f32.xlu1 %v8768_v8 }
 0xc6c   : > { %3877 = vadd.xlane.f32.xlu0 %v3876_v47 }
 0xc6f   : > { %3947 = vadd.xlane.f32.xlu1 %v8770_v5 }
 0xc70   : > { %3945 = vadd.xlane.f32.xlu0 %v8771_v28 }
 0xc73   : > { %3951 = vadd.xlane.f32.xlu1 %v8773_v38 }
 0xc74   : > { %3949 = vadd.xlane.f32.xlu0 %v8774_v14 }
 0xc77   : > { %3955 = vadd.xlane.f32.xlu1 %v8776_v49 }
 0xc78   : > { %3953 = vadd.xlane.f32.xlu0 %v8777_v32 }
 0xc7c   : > { %3957 = vadd.xlane.f32.xlu0 %v8778_v40 }
 0xce1   : > { %v3857_v2 = vpop.xlane.xlu1 %3856 }
 0xce2   : > { %v3879_v1 = vmul.f32 0.0625, %v3857_v2 }
 0xce4   : > { %v3887_v17 = vadd.f32 1e-05, %v3879_v1 }
 0xce6   : > { %6069 = vrsqrt.f32 %v3887_v17 }
 0xce9   : > { %v3860_v16 = vpop.xlane.xlu0 %3859 }
 0xcea   : > { %v3880_v9 = vmul.f32 0.0625, %v3860_v16 }
 0xcec   : > { %v3888_v62 = vadd.f32 1e-05, %v3880_v9  ;;  %v3863_v23 = vpop.xlane.xlu1 %3862 }
 0xced   : > { %v3881_v10 = vmul.f32 0.0625, %v3863_v23 }
 0xcee   : > { %6071 = vrsqrt.f32 %v3888_v62 }
 0xcef   : > { %v3889_v46 = vadd.f32 1e-05, %v3881_v10 }
 0xcf0   : > { %v6070_v27 = vpop.eup %6069  ;;  %v3869_v39 = vpop.xlane.xlu1 %3868 }
 0xcf1   : > { %6073 = vrsqrt.f32 %v3889_v46  ;;  %v3866_v37 = vpop.xlane.xlu0 %3865  ;;  %v3883_v20 = vmul.f32 0.0625, %v3869_v39  ;;  %v3903_v4 = vmul.f32 %v6070_v27, %v8351_v25 }
 0xcf2   : > { %v3882_v12 = vmul.f32 0.0625, %v3866_v37 }
 0xcf3   : > { %v3891_v0 = vadd.f32 1e-05, %v3883_v20  ;;  %v3915_v18 = vmul.f32 %v8411_v50, %v3903_v4 }
 0xcf4   : > { %v3890_v58 = vadd.f32 1e-05, %v3882_v12  ;;  %v3875_v42 = vpop.xlane.xlu1 %3874 }
 0xcf5   : > { %6075 = vrsqrt.f32 %v3891_v0  ;;  %v3872_v59 = vpop.xlane.xlu0 %3871  ;;  %v3885_v43 = vmul.f32 0.0625, %v3875_v42  ;;  %v3927_v45 = vadd.f32 %v8414_v11, %v3915_v18 }
 0xcf6   : > { %6077 = vrsqrt.f32 %v3890_v58  ;;  %v3884_v35 = vmul.f32 0.0625, %v3872_v59 }
 0xcf7   : > { %v3893_v51 = vadd.f32 1e-05, %v3885_v43  ;;  %v3935_v36 = vmax.f32 %v3927_v45, 0.0 }
 0xcf8   : > { %v6072_v33 = vpop.eup %6071  ;;  %v3892_v7 = vadd.f32 1e-05, %v3884_v35  ;;  %v3944_v26 = vpop.xlane.xlu1 %3943 }
 0xcf9   : > { %v3904_v30 = vmul.f32 %v6072_v33, %v8356_v60  ;;  %6079 = vrsqrt.f32 %v3893_v51  ;;  %v3878_v25 = vpop.xlane.xlu0 %3877  ;;  %5242 = vmatprep.mubr.msk.f32.mxu0 %vm864_vm2, %v3935_v36  ;;  %v3959_v23 = vadd.f32 1.0, %v3944_v26 }
 0xcfa   : > { %6081 = vrsqrt.f32 %v3892_v7  ;;  %v3886_v52 = vmul.f32 0.0625, %v3878_v25 }
 0xcfb   : > { %v6074_v15 = vpop.eup %6073  ;;  %v3916_v63 = vmul.f32 %v8411_v50, %v3904_v30 }
 0xcfc   : > { %v3894_v48 = vadd.f32 1e-05, %v3886_v52  ;;  %v3905_v56 = vmul.f32 %v6074_v15, %v8360_v13  ;;  %v3948_v10 = vpop.xlane.xlu1 %3947 }
 0xcfd   : > { %v3928_v61 = vadd.f32 %v8414_v11, %v3916_v63  ;;  %v3946_v9 = vpop.xlane.xlu0 %3945  ;;  %v3961_v39 = vadd.f32 1.0, %v3948_v10 }
 0xcfe   : > { %6083 = vrsqrt.f32 %v3894_v48  ;;  %v3917_v6 = vmul.f32 %v8411_v50, %v3905_v56  ;;  %v3960_v62 = vadd.f32 1.0, %v3946_v9 }
 0xcff   : > { %v6076_v57 = vpop.eup %6075  ;;  %v3936_v53 = vmax.f32 %v3928_v61, 0.0 }
 0xd00   : > { %v6078_v60 = vpop.eup %6077  ;;  %v3929_v54 = vadd.f32 %v8414_v11, %v3917_v6  ;;  %v3907_v31 = vmul.f32 %v6076_v57, %v8365_v21  ;;  %6085 = vrsqrt.f32 %v3960_v62 }
 0xd01   : > { %5243 = vmatmul.mubr.msk.f32.vlgmr.msra.gmra.mrb[62].mxu0 %vm864_vm2, %v3936_v53  ;;  %v3906_v47 = vmul.f32 %v6078_v60, %v8368_v3  ;;  %6087 = vrsqrt.f32 %v3959_v23 }
 0xd02   : > { %v3937_v55 = vmax.f32 %v3929_v54, 0.0  ;;  %v3919_v8 = vmul.f32 %v8411_v50, %v3907_v31 }
 0xd03   : > { %v6080_v13 = vpop.eup %6079  ;;  %v3918_v24 = vmul.f32 %v8411_v50, %v3906_v47 }
 0xd04   : > { %v6082_v5 = vpop.eup %6081  ;;  %5245 = vmatprep.mubr.msk.f32.mxu0 %vm864_vm2, %v3937_v55  ;;  %v3931_v28 = vadd.f32 %v8414_v11, %v3919_v8  ;;  %v3909_v44 = vmul.f32 %v6080_v13, %v8374_v41 }
 0xd05   : > { %v3930_v38 = vadd.f32 %v8414_v11, %v3918_v24  ;;  %v3908_v21 = vmul.f32 %v6082_v5, %v8377_v22 }
 0xd06   : > { %v3939_v14 = vmax.f32 %v3931_v28, 0.0  ;;  %v3921_v3 = vmul.f32 %v8411_v50, %v3909_v44 }
 0xd07   : > { %v3938_v29 = vmax.f32 %v3930_v38, 0.0  ;;  %v3920_v49 = vmul.f32 %v8411_v50, %v3908_v21 }
 0xd08   : > { %v6084_v32 = vpop.eup %6083  ;;  %v3933_v40 = vadd.f32 %v8414_v11, %v3921_v3 }
 0xd09   : > { %5246 = vmatmul.mubr.msk.f32.gmra.mrb[64].mxu0 %vm864_vm2, %v3938_v29  ;;  %v3932_v34 = vadd.f32 %v8414_v11, %v3920_v49  ;;  %v3910_v2 = vmul.f32 %v6084_v32, %v8385_v19  ;;  %v3950_v19 = vpop.xlane.xlu0 %3949 }
 0xd0a   : > { %5248 = vmatprep.mubr.msk.f32.mxu0 %vm864_vm2, %v3939_v14  ;;  %v3941_v41 = vmax.f32 %v3933_v40, 0.0  ;;  %v3962_v27 = vadd.f32 1.0, %v3950_v19  ;;  %v6086_v4 = vpop.eup %6085 }
 0xd0b   : > { %v3940_v1 = vmax.f32 %v3932_v34, 0.0  ;;  %v3922_v22 = vmul.f32 %v8411_v50, %v3910_v2  ;;  %v3952_v50 = vpop.xlane.xlu1 %3951  ;;  %v6088_v0 = vpop.eup %6087 }
 0xd0c   : > { %6089 = vrsqrt.f32 %v3962_v27 }
 0xd0d   : > { %5249 = vmatmul.mubr.msk.f32.gmra.mrb[66].mxu0 %vm864_vm2, %v3940_v1  ;;  %v3934_v17 = vadd.f32 %v8414_v11, %v3922_v22  ;;  %v3954_v46 = vpop.xlane.xlu0 %3953  ;;  %6091 = vrsqrt.f32 %v3961_v39  ;;  %v3963_v11 = vadd.f32 1.0, %v3952_v50 }
 0xd0e   : > { %5251 = vmatprep.mubr.msk.f32.mxu0 %vm864_vm2, %v3941_v41  ;;  %v3964_v37 = vadd.f32 1.0, %v3954_v46 }
 0xd0f   : > { %v3942_v16 = vmax.f32 %v3934_v17, 0.0  ;;  %v3956_v12 = vpop.xlane.xlu1 %3955 }
 0xd10   : > { %6093 = vrsqrt.f32 %v3964_v37  ;;  %v3965_v43 = vadd.f32 1.0, %v3956_v12 }
 0xd11   : > { %5252 = vmatmul.mubr.msk.f32.gmra.mrb[68].mxu0 %vm864_vm2, %v3942_v16  ;;  %v3958_v20 = vpop.xlane.xlu0 %3957  ;;  %6095 = vrsqrt.f32 %v3963_v11 }
 0xd12   : > { %v3966_v58 = vadd.f32 1.0, %v3958_v20 }
 0xd14   : > { %6097 = vrsqrt.f32 %v3966_v58 }
 0xd15   : > { %6099 = vrsqrt.f32 %v3965_v43 }
 0xd16   : > { %v6090_v7 = vpop.eup %6089 }
 0xd17   : > { %v6092_v30 = vpop.eup %6091 }
 0xd1a   : > { %v6094_v63 = vpop.eup %6093 }
 0xd1b   : > { %v6096_v56 = vpop.eup %6095 }
 0xd1e   : > { %v6098_v47 = vpop.eup %6097 }
 0xd1f   : > { %v6100_v8 = vpop.eup %6099 }
 0xdd4   : > { %v5244_v18 = vpop.f32.mrb[62].mxu0 }
 0xdd5   : > { %v4109_v42 = vmul.f32 %v6086_v4, %v5244_v18  ;;  %v4069_v59 = vpop.f32.mrb[63].mxu0 }
 0xdd6   : > { %v4108_v45 = vmul.f32 %v6088_v0, %v4069_v59 }
 0xdd7   : > { %v4117_v35 = vsel %vm672_vm0, %v4109_v42, %v6086_v4 }
 0xdd8   : > { %v4126_v51 = vsel %vm4124_vm5, %v4117_v35, 0.0  ;;  %v4116_v36 = vsel %vm672_vm0, %v4108_v45, %v6088_v0 }
 0xdd9   : > { %4135 = vst.msk [vmem:[%s8452_s20 + $0x8] sm:$0xff] %vm4133_vm6, %v4126_v51  ;;  %v4125_v33 = vsel %vm4124_vm5, %v4116_v36, 0.0 }
 0xdda   : > { %4134 = vst.msk [vmem:[%s8452_s20] sm:$0xff] %vm4133_vm6, %v4125_v33 }
 0xddc   : > { %v5247_v25 = vpop.f32.mrb[64].mxu0 }
 0xddd   : > { %v4111_v52 = vmul.f32 %v6090_v7, %v5247_v25  ;;  %v4079_v15 = vpop.f32.mrb[65].mxu0 }
 0xdde   : > { %v4110_v48 = vmul.f32 %v6092_v30, %v4079_v15 }
 0xddf   : > { %v4119_v61 = vsel %vm672_vm0, %v4111_v52, %v6090_v7 }
 0xde0   : > { %v4128_v6 = vsel %vm4124_vm5, %v4119_v61, 0.0  ;;  %v4118_v57 = vsel %vm672_vm0, %v4110_v48, %v6092_v30  ;;  %v5250_v53 = vpop.f32.mrb[66].mxu0 }
 0xde1   : > { %4137 = vst.msk [vmem:[%s8452_s20 + $0x18] sm:$0xff] %vm4133_vm6, %v4128_v6  ;;  %v4127_v60 = vsel %vm4124_vm5, %v4118_v57, 0.0  ;;  %v4113_v54 = vmul.f32 %v6094_v63, %v5250_v53  ;;  %v4089_v31 = vpop.f32.mrb[67].mxu0 }
 0xde2   : > { %4136 = vst.msk [vmem:[%s8452_s20 + $0x10] sm:$0xff] %vm4133_vm6, %v4127_v60  ;;  %v4112_v55 = vmul.f32 %v6096_v56, %v4089_v31 }
 0xde3   : > { %v4121_v13 = vsel %vm672_vm0, %v4113_v54, %v6094_v63 }
 0xde4   : > { %v4130_v24 = vsel %vm4124_vm5, %v4121_v13, 0.0  ;;  %v4120_v5 = vsel %vm672_vm0, %v4112_v55, %v6096_v56  ;;  %v5253_v28 = vpop.f32.mrb[68].mxu0 }
 0xde5   : > { %4139 = vst.msk [vmem:[%s8452_s20 + $0x28] sm:$0xff] %vm4133_vm6, %v4130_v24  ;;  %v4129_v44 = vsel %vm4124_vm5, %v4120_v5, 0.0  ;;  %v4115_v38 = vmul.f32 %v6098_v47, %v5253_v28  ;;  %v4099_v21 = vpop.f32.mrb[69].mxu0 }
 0xde6   : > { %4138 = vst.msk [vmem:[%s8452_s20 + $0x20] sm:$0xff] %vm4133_vm6, %v4129_v44  ;;  %v4114_v14 = vmul.f32 %v6100_v8, %v4099_v21 }
 0xde7   : > { %v4123_v3 = vsel %vm672_vm0, %v4115_v38, %v6098_v47 }
 0xde8   : > { %v4132_v29 = vsel %vm4124_vm5, %v4123_v3, 0.0  ;;  %v4122_v49 = vsel %vm672_vm0, %v4114_v14, %v6100_v8 }
 0xde9   : > { %4141 = vst.msk [vmem:[%s8452_s20 + $0x38] sm:$0xff] %vm4133_vm6, %v4132_v29  ;;  %v4131_v32 = vsel %vm4124_vm5, %v4122_v49, 0.0 }
 0xdea   : > { %4140 = vst.msk [vmem:[%s8452_s20 + $0x30] sm:$0xff] %vm4133_vm6, %v4131_v32 }
 0xdeb   : > { %6382 = shalt.err (!%p6379_p1)
}
 0xdec   : > { %s6383_s17 = scalar_lea.hbm %s8481_s12, 1024  ;;  %s6387_s13 = scalar_lea.hbm %s8780_s5, 2048 }
 0xded   : > { %p6384_p2 = scmp.ne.s32.totalorder %s8481_s12, %s6383_s17  ;;  %p6388_p12 = scmp.lt.u32.totalorder %s8481_s12, %s8780_s5 }
 0xdee   : > { %p6389_p6 = scmp.lt.u32.totalorder %s6387_s13, %s6383_s17  ;;  %p6391_p8 = scmp.lt.u32.totalorder %s6383_s17, %s8481_s12 }
 0xdef   : > { %p6385_p5 = pnand %p6384_p2, %p8781_p7 }
 0xdf0   : > { %p6390_p13 = por %p6389_p6, %p6388_p12 }
 0xdf1   : > { %p6386_p11 = pneg %p6385_p5 }
 0xdf2   : > { %p6392_p0 = por %p6391_p8, %p6390_p13 }
 0xdf4   : > { %p6393_p9 = pnand %p6392_p0, %p6386_p11 }
 0xdf6   : > { %6396 = shalt.err (!%p6393_p9)
}
 0xdf7   : > { %s6486_s20 = smov 128   ;;  %s6487_s28 = smov 8  }
 0xdf8   : > { %5603 = dma.vmem_to_hbm [thread:$0]  (%p8781_p7), %s8483_s26, 1024, %s8481_s12, %s4143_s23, %s6486_s20, %s6486_s20, %s6487_s28  }
 0xdf9 PF: > { %s8782_s10 = sld [smem:[#allocation30_spill]]  ;;  %s8783_s3 = sld [smem:[#allocation35_spill]] }
 0xdff   : > { %s4171_s27 = sand.u32 1, %s8782_s10   ;;  %p8784_p3 = scmp.ne.s32.totalorder %s8783_s3, 0 }
 0xe00   : > { %s4172_s19 = scalar_lea.sflag [#allocation4], %s4171_s27 }
 0xe01   : > { %p5628_p10 = pnand %p4348_p4, %p8784_p3 }
 0xe03   : > { %6438 = dma.done.wait (!%p5628_p10), %s4172_s19, 1024  }
 0xe04   : > { %6440 = vsyncadd (!%p5628_p10), %s4172_s19, 4294966272  ;;  %s8785_s16 = sld [smem:[#allocation32_spill]]  ;;  %s8786_s30 = sld [smem:[#allocation33_spill]] }
 0xe05   : > { %s8787_s13 = smov %s6447_s14  ;;  %s8788_s14 = smov %s6451_s15 }
 0xe0a   : > { %p30_p1 = scmp.ge.s32.totalorder %s8785_s16, 4   ;;  %s8789_s15 = smov %s8786_s30 }
 0xe0c   :  { %32 = sbr.rel (!%p30_p1) target bundleno = 15 (0xf), region = 165 }
 0xe13   :  { %4177 = vsyncpa [#allocation3], 1 }
 0xe14   :  { %4179 = vsyncpa [#allocation3 + $0x1], 1 }
 0xe15   :  { %4180 = vsyncpa [#allocation6], 1 }
 0xe16   :  { %4182 = vsyncpa [#allocation6 + $0x1], 1 }
 0xe17   :  { %4183 = vsyncpa [#allocation9], 1 }
 0xe18   :  { %4184 = vsyncpa [#allocation12], 1 }
 0xe19   :  { %4185 = vsyncpa [#allocation15], 1 }
 0xe1a   :  { %4186 = vsyncpa [#allocation18], 1 }
 0xe1b   :  { %4187 = vsyncpa [#allocation4], 1 }
 0xe1c   :  { %4189 = vsyncpa [#allocation4 + $0x1], 1 }

</bundles_post_ra>
